<compile_context>
chip_gen: v7x
topology: tpu7x:2x2x1
jax: 0.10.0
libtpu: 0.0.40
codegen_flags: <defaults>
</compile_context>

<pallas_src>
import jax
import jax.numpy as jnp
from jax import lax
from jax.experimental import pallas as pl
from jax.experimental.pallas import tpu as pltpu

_K_RAW = 27          # 3*3*3 im2col features
_K_PAD = 32          # padded feature dim
_C0_RAW = 24         # stem output channels
_C0_PAD = 128        # padded stem channels
_C_HEAD = 1280       # head channels
_N_CLASSES = 2
_N_PAD = 128         # padded classifier lanes (lane-dense output)


def _pick_patch_tile(P, cap=2048):
    # Largest tile (multiple of 8) dividing P, capped for v7x VMEM safety.
    for cand in (2048, 1024, 512, 256, 128, 64, 32, 16, 8):
        if cand <= cap and P % cand == 0:
            return cand
    return P  # full-extent fallback (block dim == array dim is allowed)


def _pick_chunk(TP, cap=256):
    for cand in (256, 128, 64, 32, 16, 8):
        if cand <= cap and TP % cand == 0:
            return cand
    return TP


# ----------------------------------------------------------------------------
# Fused kernel: stem matmul+SiLU -> head matmul+SiLU -> global-avg-pool
#               -> Linear(1280->2, padded to 128) -> softmax
# ----------------------------------------------------------------------------
def fused_backbone_classifier(patches, w_stem, b_stem, w_head, b_head,
                              fc_w, fc_b, *, tile_p=2048):
    B, P, Kp = patches.shape
    C0 = w_stem.shape[1]
    C = w_head.shape[1]
    Np = fc_w.shape[1]

    TP = _pick_patch_tile(P, cap=tile_p)
    # Block the whole batch into one grid step when each image fits a single
    # patch tile (small inputs); keeps the out block's sublane dim == full dim.
    TB = B if (TP == P and B * P <= 4096 and B <= 8) else 1
    CH = _pick_chunk(TP)
    n_chunks = TP // CH
    n_tiles = P // TP
    inv_p = 1.0 / float(P)

    def kernel(p_ref, ws_ref, bs_ref, wh_ref, bh_ref, fw_ref, fb_ref,
               o_ref, acc_ref):
        t = pl.program_id(1)

        @pl.when(t == 0)
        def _():
            acc_ref[...] = jnp.zeros_like(acc_ref)

        def image_partial(b):
            def chunk_body(c, acc_row):
                x = p_ref[b, pl.ds(c * CH, CH), :]                 # (CH, Kp) bf16
                # stem conv (im2col matmul, BN scale folded) + bias + SiLU
                h = jnp.dot(x, ws_ref[...],
                            preferred_element_type=jnp.float32)    # (CH, C0) f32
                h = h + bs_ref[...]
                h = h * jax.nn.sigmoid(h)
                # head 1x1 conv matmul (BN folded) + bias + SiLU
                y = jnp.dot(h.astype(jnp.bfloat16), wh_ref[...],
                            preferred_element_type=jnp.float32)    # (CH, C) f32
                y = y + bh_ref[...]
                # SiLU via single bf16 exp + approx reciprocal (EUP-friendly)
                sig = pl.reciprocal(
                    (1.0 + jnp.exp(-y.astype(jnp.bfloat16))).astype(jnp.float32),
                    approx=True)
                y = y * sig
                return acc_row + jnp.sum(y, axis=0, keepdims=True)  # (1, C)

            return lax.fori_loop(0, n_chunks, chunk_body,
                                 jnp.zeros((1, C), jnp.float32),
                                 unroll=(n_chunks <= 8))

        for b in range(TB):  # static, small batch block
            part = image_partial(b)
            acc_ref[pl.ds(b, 1), :] = acc_ref[pl.ds(b, 1), :] + part

        @pl.when(t == pl.num_programs(1) - 1)
        def _():
            pooled = acc_ref[...] * inv_p                           # (TB, C) f32
            logits = jnp.dot(pooled, fw_ref[...],
                             preferred_element_type=jnp.float32) + fb_ref[...]
            m = jnp.max(logits, axis=-1, keepdims=True)
            e = jnp.exp(logits - m)
            o_ref[...] = e / jnp.sum(e, axis=-1, keepdims=True)     # (TB, Np)

    # Explicit VMEM budget (double-buffered patches + resident weights +
    # in-flight chunk temporaries + accumulator/output), clamped to a limit
    # that is safe on v5e/v6e (128 MiB phys) and v7x (64 MiB phys).
    vmem_bytes = (
        2 * TB * TP * Kp * 2
        + 2 * (Kp * C0 * 2 + C0 * 4 + C0 * C * 2 + C * 4 + C * Np * 4 + Np * 4)
        + 6 * CH * C * 4
        + TB * C * 4 + 2 * TB * Np * 4)
    vmem_limit = int(min(max(2 * vmem_bytes, 32 * 1024 * 1024),
                         56 * 1024 * 1024))

    return pl.pallas_call(
        kernel,
        out_shape=jax.ShapeDtypeStruct((B, Np), jnp.float32),
        grid=(B // TB, n_tiles),
        in_specs=[
            pl.BlockSpec((TB, TP, Kp), lambda b, t: (b, t, 0)),   # patch tile
            pl.BlockSpec((Kp, C0), lambda b, t: (0, 0)),          # stem weight
            pl.BlockSpec((1, C0), lambda b, t: (0, 0)),           # stem bias
            pl.BlockSpec((C0, C), lambda b, t: (0, 0)),           # head weight
            pl.BlockSpec((1, C), lambda b, t: (0, 0)),            # head bias
            pl.BlockSpec((C, Np), lambda b, t: (0, 0)),           # fc weight
            pl.BlockSpec((1, Np), lambda b, t: (0, 0)),           # fc bias
        ],
        out_specs=pl.BlockSpec((TB, Np), lambda b, t: (b, 0)),    # resident out
        scratch_shapes=[pltpu.VMEM((TB, C), jnp.float32)],        # pool accum
        compiler_params=pltpu.CompilerParams(
            dimension_semantics=("parallel", "arbitrary"),
            vmem_limit_bytes=vmem_limit),
    )(patches, w_stem, b_stem, w_head, b_head, fc_w, fc_b)


# ----------------------------------------------------------------------------
# Glue: im2col patch extraction (pure data movement, stays in JAX)
#   returns (B, OH*OW, k*k*C) with (kh, kw, Cin) tap ordering.
# ----------------------------------------------------------------------------
def _im2col(x_nhwc, ksize, stride, padding):
    B, H, W, C = x_nhwc.shape
    x_p = jnp.pad(x_nhwc, ((0, 0), (padding, padding), (padding, padding), (0, 0)))
    OH = (H + 2 * padding - ksize) // stride + 1
    OW = (W + 2 * padding - ksize) // stride + 1
    taps = []
    for kh in range(ksize):
        for kw in range(ksize):
            taps.append(x_p[:, kh:kh + stride * OH:stride,
                            kw:kw + stride * OW:stride, :])        # (B,OH,OW,C)
    pat = jnp.stack(taps, axis=3)                                   # (B,OH,OW,KK,C)
    return pat.reshape(B, OH * OW, ksize * ksize * C), OH, OW


# ----------------------------------------------------------------------------
# Parameter construction (deterministic, synthetic; no checkpoint load)
# ----------------------------------------------------------------------------
def _fold_bn(gamma, beta, mean, var, eps=1e-5):
    scale = gamma / jnp.sqrt(var + eps)
    bias = beta - mean * scale
    return scale.reshape(1, -1), bias.reshape(1, -1)


def make_params(key):
    ks = jax.random.split(key, 10)
    p = {}
    # stem: Conv2d(3, 24, k=3, s=2, p=1, bias=False) + BN + SiLU
    p["stem_w"] = 0.1 * jax.random.normal(ks[0], (24, 3, 3, 3), jnp.float32)
    p["stem_scale"], p["stem_bias"] = _fold_bn(
        1.0 + 0.05 * jax.random.normal(ks[1], (24,), jnp.float32),
        0.05 * jax.random.normal(ks[2], (24,), jnp.float32),
        0.05 * jax.random.normal(ks[3], (24,), jnp.float32),
        1.0 + 0.1 * jnp.abs(jax.random.normal(ks[4], (24,), jnp.float32)))
    # head: Conv2d(24, 1280, k=1, bias=False) + BN + SiLU
    p["head_w"] = 0.05 * jax.random.normal(ks[5], (1280, 24, 1, 1), jnp.float32)
    p["head_scale"], p["head_bias"] = _fold_bn(
        jnp.ones((1280,), jnp.float32),
        jnp.zeros((1280,), jnp.float32),
        0.02 * jax.random.normal(ks[6], (1280,), jnp.float32),
        1.0 + 0.1 * jnp.abs(jax.random.normal(ks[7], (1280,), jnp.float32)))
    # classifier[-1]: Linear(1280 -> 2, bias=True); classifier[0] is Dropout
    # (identity in eval mode).
    p["fc_w"] = 0.02 * jax.random.normal(ks[8], (2, 1280), jnp.float32)
    p["fc_b"] = 0.02 * jax.random.normal(ks[9], (2,), jnp.float32)
    return p


# ----------------------------------------------------------------------------
# Forward pass (mirrors Classifier.forward: backbone(img) -> softmax(-1))
# ----------------------------------------------------------------------------
@jax.jit
def classifier_forward(img_nchw, params):
    x = jnp.transpose(img_nchw, (0, 2, 3, 1)).astype(jnp.float32)   # NCHW->NHWC

    # im2col for the stem 3x3/s2 conv; pad K 27->32, bf16 for the MXU.
    patches, _, _ = _im2col(x, ksize=3, stride=2, padding=1)        # (B, P, 27)
    patches = jnp.pad(patches, ((0, 0), (0, 0), (0, _K_PAD - _K_RAW)))
    patches = patches.astype(jnp.bfloat16)

    # Stem weight: (Cout,Cin,kh,kw) -> (kh,kw,Cin,Cout) -> (27,24); fold BN
    # scale; zero-pad to lane/sublane-aligned (32, 128).
    w_stem = jnp.transpose(params["stem_w"], (2, 3, 1, 0)).reshape(_K_RAW, _C0_RAW)
    w_stem = w_stem * params["stem_scale"]
    w_stem = jnp.pad(w_stem, ((0, _K_PAD - _K_RAW),
                              (0, _C0_PAD - _C0_RAW))).astype(jnp.bfloat16)
    b_stem = jnp.pad(params["stem_bias"], ((0, 0), (0, _C0_PAD - _C0_RAW)))

    # TODO(synk): EfficientNetV2-S FusedMBConv/MBConv (+SE) stages omitted here.

    # Head 1x1 conv weight: (1280,24,1,1) -> (24,1280), fold BN, pad rows ->128.
    w_head = params["head_w"].reshape(_C_HEAD, _C0_RAW).T * params["head_scale"]
    w_head = jnp.pad(w_head, ((0, _C0_PAD - _C0_RAW), (0, 0))).astype(jnp.bfloat16)
    b_head = params["head_bias"]                                    # (1,1280) f32

    # Classifier weights padded to 128 output lanes; padded logits get -1e9 so
    # the in-kernel softmax over 128 lanes equals softmax over 2 classes.
    fc_w = jnp.pad(params["fc_w"].T, ((0, 0), (0, _N_PAD - _N_CLASSES)))
    fc_b = jnp.full((1, _N_PAD), -1e9, jnp.float32)
    fc_b = fc_b.at[0, :_N_CLASSES].set(params["fc_b"])

    probs_pad = fused_backbone_classifier(patches, w_stem, b_stem,
                                          w_head, b_head, fc_w, fc_b)
    return probs_pad[:, :_N_CLASSES]                                 # (B, 2)


# Pure-JAX reference (same synthetic params, f32 end-to-end) for validation.
def _reference_forward(img_nchw, params):
    x = jnp.transpose(img_nchw, (0, 2, 3, 1)).astype(jnp.float32)
    patches, _, _ = _im2col(x, 3, 2, 1)                              # (B,P,27)
    w_stem = (jnp.transpose(params["stem_w"], (2, 3, 1, 0)).reshape(_K_RAW, _C0_RAW)
              * params["stem_scale"])
    h = patches @ w_stem + params["stem_bias"]
    h = h * jax.nn.sigmoid(h)
    w_head = params["head_w"].reshape(_C_HEAD, _C0_RAW).T * params["head_scale"]
    y = h @ w_head + params["head_bias"]
    y = y * jax.nn.sigmoid(y)
    pooled = jnp.mean(y, axis=1)
    logits = pooled @ params["fc_w"].T + params["fc_b"]
    return jax.nn.softmax(logits, axis=-1)


if __name__ == "__main__":
    key = jax.random.PRNGKey(0)
    k_img, k_par = jax.random.split(key)
    img = jax.random.normal(k_img, (2, 3, 16, 16), jnp.float32)      # NCHW input
    params = make_params(k_par)

    probs = classifier_forward(img, params)
    probs = jax.block_until_ready(probs)

    assert probs.shape == (2, 2)
    assert bool(jnp.all(jnp.isfinite(probs)))
    assert bool(jnp.allclose(jnp.sum(probs, axis=-1), 1.0, atol=1e-5))

    ref = _reference_forward(img, params)
    assert bool(jnp.allclose(probs, ref, atol=3e-2)), (probs, ref)

    print("KERNEL_OK")
</pallas_src>

<mosaic_0001>
module attributes {stable_mosaic.version = 11 : i64} {
  func.func @kernel(%arg0: i32, %arg1: i32, %arg2: memref<2x64x32xbf16, #tpu.memory_space<vmem>>, %arg3: memref<32x128xbf16, #tpu.memory_space<vmem>>, %arg4: memref<1x128xf32, #tpu.memory_space<vmem>>, %arg5: memref<128x1280xbf16, #tpu.memory_space<vmem>>, %arg6: memref<1x1280xf32, #tpu.memory_space<vmem>>, %arg7: memref<1280x128xf32, #tpu.memory_space<vmem>>, %arg8: memref<1x128xf32, #tpu.memory_space<vmem>>, %arg9: memref<2x128xf32, #tpu.memory_space<vmem>>, %arg10: memref<2x1280xf32, #tpu.memory_space<vmem>>) attributes {dimension_semantics = [#tpu.dimension_semantics<parallel>, #tpu.dimension_semantics<arbitrary>], iteration_bounds = array<i64: 1, 1>, scalar_prefetch = 0 : i64, scratch_operands = 1 : i64, tpu.core_type = #tpu.core_type<tc>, window_params = [{transform_indices = @transform_0, window_bounds = array<i64: 2, 64, 32>}, {pipeline_mode = #tpu.pipeline_mode<synchronous>, transform_indices = @transform_1, window_bounds = array<i64: 32, 128>}, {pipeline_mode = #tpu.pipeline_mode<synchronous>, transform_indices = @transform_2, window_bounds = array<i64: 1, 128>}, {pipeline_mode = #tpu.pipeline_mode<synchronous>, transform_indices = @transform_3, window_bounds = array<i64: 128, 1280>}, {pipeline_mode = #tpu.pipeline_mode<synchronous>, transform_indices = @transform_4, window_bounds = array<i64: 1, 1280>}, {pipeline_mode = #tpu.pipeline_mode<synchronous>, transform_indices = @transform_5, window_bounds = array<i64: 1280, 128>}, {pipeline_mode = #tpu.pipeline_mode<synchronous>, transform_indices = @transform_6, window_bounds = array<i64: 1, 128>}, {transform_indices = @transform_7, window_bounds = array<i64: 2, 128>}]} {
    %c0_i32 = arith.constant 0 : i32
    %0 = arith.cmpi eq, %arg1, %c0_i32 : i32
    %1 = arith.extui %0 : i1 to i32
    %c0_i32_0 = arith.constant 0 : i32
    %2 = arith.cmpi ne, %1, %c0_i32_0 : i32
    scf.if %2 {
      %cst_46 = arith.constant 0.000000e+00 : f32
      %80 = vector.broadcast %cst_46 : f32 to vector<2x1280xf32>
      %c0_47 = arith.constant 0 : index
      %c0_48 = arith.constant 0 : index
      %81 = vector.load %arg10[%c0_47, %c0_48] : memref<2x1280xf32, #tpu.memory_space<vmem>>, vector<2x1280xf32>
      tpu.vector_store %arg10[%c0_47, %c0_48], %80 {strides = array<i32>} : memref<2x1280xf32, #tpu.memory_space<vmem>>, vector<2x1280xf32>,
    } else {
    }
    %cst = arith.constant 0.000000e+00 : f32
    %3 = vector.broadcast %cst : f32 to vector<1x1280xf32>
    %c0_i32_1 = arith.constant 0 : i32
    %c64_i32 = arith.constant 64 : i32
    %4 = arith.muli %c0_i32_1, %c64_i32 : i32
    %c0 = arith.constant 0 : index
    %5 = arith.index_cast %4 : i32 to index
    %c0_2 = arith.constant 0 : index
    %6 = vector.load %arg2[%c0, %5, %c0_2] : memref<2x64x32xbf16, #tpu.memory_space<vmem>>, vector<1x64x32xbf16>
    %7 = vector.shape_cast %6 : vector<1x64x32xbf16> to vector<64x32xbf16>
    %c0_3 = arith.constant 0 : index
    %c0_4 = arith.constant 0 : index
    %8 = vector.load %arg3[%c0_3, %c0_4] : memref<32x128xbf16, #tpu.memory_space<vmem>>, vector<32x128xbf16>
    %cst_5 = arith.constant dense<0.000000e+00> : vector<64x128xf32>
    %9 = tpu.matmul %7, %8, %cst_5 {dimension_numbers = #tpu.dot_dimension_numbers<[1], [0], [0], [1], [0, 0, 1, 1], [], []>} : vector<64x32xbf16>, vector<32x128xbf16>, vector<64x128xf32> -> vector<64x128xf32>
    %c0_6 = arith.constant 0 : index
    %c0_7 = arith.constant 0 : index
    %10 = vector.load %arg4[%c0_6, %c0_7] : memref<1x128xf32, #tpu.memory_space<vmem>>, vector<1x128xf32>
    %11 = vector.broadcast %10 : vector<1x128xf32> to vector<64x128xf32>
    %12 = arith.addf %9, %11 : vector<64x128xf32>
    %13 = arith.negf %12 : vector<64x128xf32>
    %14 = math.exp %13 : vector<64x128xf32>
    %cst_8 = arith.constant 1.000000e+00 : f32
    %15 = vector.broadcast %cst_8 : f32 to vector<64x128xf32>
    %16 = arith.addf %15, %14 : vector<64x128xf32>
    %17 = arith.divf %15, %16 : vector<64x128xf32>
    %18 = arith.mulf %12, %17 : vector<64x128xf32>
    %19 = arith.truncf %18 : vector<64x128xf32> to vector<64x128xbf16>
    %c0_9 = arith.constant 0 : index
    %c0_10 = arith.constant 0 : index
    %20 = vector.load %arg5[%c0_9, %c0_10] : memref<128x1280xbf16, #tpu.memory_space<vmem>>, vector<128x1280xbf16>
    %cst_11 = arith.constant dense<0.000000e+00> : vector<64x1280xf32>
    %21 = tpu.matmul %19, %20, %cst_11 {dimension_numbers = #tpu.dot_dimension_numbers<[1], [0], [0], [1], [0, 0, 1, 1], [], []>} : vector<64x128xbf16>, vector<128x1280xbf16>, vector<64x1280xf32> -> vector<64x1280xf32>
    %c0_12 = arith.constant 0 : index
    %c0_13 = arith.constant 0 : index
    %22 = vector.load %arg6[%c0_12, %c0_13] : memref<1x1280xf32, #tpu.memory_space<vmem>>, vector<1x1280xf32>
    %23 = vector.broadcast %22 : vector<1x1280xf32> to vector<64x1280xf32>
    %24 = arith.addf %21, %23 : vector<64x1280xf32>
    %25 = arith.truncf %24 : vector<64x1280xf32> to vector<64x1280xbf16>
    %cst_14 = arith.constant 0.000000e+00 : bf16
    %26 = vector.broadcast %cst_14 : bf16 to vector<64x1280xbf16>
    %27 = arith.subf %26, %25 : vector<64x1280xbf16>
    %28 = math.exp %27 : vector<64x1280xbf16>
    %cst_15 = arith.constant 1.000000e+00 : bf16
    %29 = vector.broadcast %cst_15 : bf16 to vector<64x1280xbf16>
    %30 = arith.addf %29, %28 : vector<64x1280xbf16>
    %31 = arith.extf %30 : vector<64x1280xbf16> to vector<64x1280xf32>
    %32 = tpu.reciprocal %31 {approx = true} : vector<64x1280xf32> -> vector<64x1280xf32>
    %33 = arith.mulf %24, %32 : vector<64x1280xf32>
    %cst_16 = arith.constant dense<0.000000e+00> : vector<1280xf32>
    %34 = vector.multi_reduction <add>, %33, %cst_16 [0] : vector<64x1280xf32> to vector<1280xf32>
    %35 = vector.shape_cast %34 : vector<1280xf32> to vector<1x1280xf32>
    %36 = arith.addf %3, %35 : vector<1x1280xf32>
    %c1_i32 = arith.constant 1 : i32
    %c0_17 = arith.constant 0 : index
    %c0_18 = arith.constant 0 : index
    %37 = vector.load %arg10[%c0_17, %c0_18] : memref<2x1280xf32, #tpu.memory_space<vmem>>, vector<1x1280xf32>
    %38 = arith.addf %37, %36 : vector<1x1280xf32>
    %c0_19 = arith.constant 0 : index
    %c0_20 = arith.constant 0 : index
    %39 = vector.load %arg10[%c0_19, %c0_20] : memref<2x1280xf32, #tpu.memory_space<vmem>>, vector<1x1280xf32>
    tpu.vector_store %arg10[%c0_19, %c0_20], %38 {strides = array<i32>} : memref<2x1280xf32, #tpu.memory_space<vmem>>, vector<1x1280xf32>,
    %cst_21 = arith.constant 0.000000e+00 : f32
    %40 = vector.broadcast %cst_21 : f32 to vector<1x1280xf32>
    %c0_i32_22 = arith.constant 0 : i32
    %c64_i32_23 = arith.constant 64 : i32
    %41 = arith.muli %c0_i32_22, %c64_i32_23 : i32
    %c1 = arith.constant 1 : index
    %42 = arith.index_cast %41 : i32 to index
    %c0_24 = arith.constant 0 : index
    %43 = vector.load %arg2[%c1, %42, %c0_24] : memref<2x64x32xbf16, #tpu.memory_space<vmem>>, vector<1x64x32xbf16>
    %44 = vector.shape_cast %43 : vector<1x64x32xbf16> to vector<64x32xbf16>
    %c0_25 = arith.constant 0 : index
    %c0_26 = arith.constant 0 : index
    %45 = vector.load %arg3[%c0_25, %c0_26] : memref<32x128xbf16, #tpu.memory_space<vmem>>, vector<32x128xbf16>
    %cst_27 = arith.constant dense<0.000000e+00> : vector<64x128xf32>
    %46 = tpu.matmul %44, %45, %cst_27 {dimension_numbers = #tpu.dot_dimension_numbers<[1], [0], [0], [1], [0, 0, 1, 1], [], []>} : vector<64x32xbf16>, vector<32x128xbf16>, vector<64x128xf32> -> vector<64x128xf32>
    %c0_28 = arith.constant 0 : index
    %c0_29 = arith.constant 0 : index
    %47 = vector.load %arg4[%c0_28, %c0_29] : memref<1x128xf32, #tpu.memory_space<vmem>>, vector<1x128xf32>
    %48 = vector.broadcast %47 : vector<1x128xf32> to vector<64x128xf32>
    %49 = arith.addf %46, %48 : vector<64x128xf32>
    %50 = arith.negf %49 : vector<64x128xf32>
    %51 = math.exp %50 : vector<64x128xf32>
    %cst_30 = arith.constant 1.000000e+00 : f32
    %52 = vector.broadcast %cst_30 : f32 to vector<64x128xf32>
    %53 = arith.addf %52, %51 : vector<64x128xf32>
    %54 = arith.divf %52, %53 : vector<64x128xf32>
    %55 = arith.mulf %49, %54 : vector<64x128xf32>
    %56 = arith.truncf %55 : vector<64x128xf32> to vector<64x128xbf16>
    %c0_31 = arith.constant 0 : index
    %c0_32 = arith.constant 0 : index
    %57 = vector.load %arg5[%c0_31, %c0_32] : memref<128x1280xbf16, #tpu.memory_space<vmem>>, vector<128x1280xbf16>
    %cst_33 = arith.constant dense<0.000000e+00> : vector<64x1280xf32>
    %58 = tpu.matmul %56, %57, %cst_33 {dimension_numbers = #tpu.dot_dimension_numbers<[1], [0], [0], [1], [0, 0, 1, 1], [], []>} : vector<64x128xbf16>, vector<128x1280xbf16>, vector<64x1280xf32> -> vector<64x1280xf32>
    %c0_34 = arith.constant 0 : index
    %c0_35 = arith.constant 0 : index
    %59 = vector.load %arg6[%c0_34, %c0_35] : memref<1x1280xf32, #tpu.memory_space<vmem>>, vector<1x1280xf32>
    %60 = vector.broadcast %59 : vector<1x1280xf32> to vector<64x1280xf32>
    %61 = arith.addf %58, %60 : vector<64x1280xf32>
    %62 = arith.truncf %61 : vector<64x1280xf32> to vector<64x1280xbf16>
    %cst_36 = arith.constant 0.000000e+00 : bf16
    %63 = vector.broadcast %cst_36 : bf16 to vector<64x1280xbf16>
    %64 = arith.subf %63, %62 : vector<64x1280xbf16>
    %65 = math.exp %64 : vector<64x1280xbf16>
    %cst_37 = arith.constant 1.000000e+00 : bf16
    %66 = vector.broadcast %cst_37 : bf16 to vector<64x1280xbf16>
    %67 = arith.addf %66, %65 : vector<64x1280xbf16>
    %68 = arith.extf %67 : vector<64x1280xbf16> to vector<64x1280xf32>
    %69 = tpu.reciprocal %68 {approx = true} : vector<64x1280xf32> -> vector<64x1280xf32>
    %70 = arith.mulf %61, %69 : vector<64x1280xf32>
    %cst_38 = arith.constant dense<0.000000e+00> : vector<1280xf32>
    %71 = vector.multi_reduction <add>, %70, %cst_38 [0] : vector<64x1280xf32> to vector<1280xf32>
    %72 = vector.shape_cast %71 : vector<1280xf32> to vector<1x1280xf32>
    %73 = arith.addf %40, %72 : vector<1x1280xf32>
    %c1_i32_39 = arith.constant 1 : i32
    %c1_40 = arith.constant 1 : index
    %c0_41 = arith.constant 0 : index
    %74 = vector.load %arg10[%c1_40, %c0_41] : memref<2x1280xf32, #tpu.memory_space<vmem>>, vector<1x1280xf32>
    %75 = arith.addf %74, %73 : vector<1x1280xf32>
    %c1_42 = arith.constant 1 : index
    %c0_43 = arith.constant 0 : index
    %76 = vector.load %arg10[%c1_42, %c0_43] : memref<2x1280xf32, #tpu.memory_space<vmem>>, vector<1x1280xf32>
    tpu.vector_store %arg10[%c1_42, %c0_43], %75 {strides = array<i32>} : memref<2x1280xf32, #tpu.memory_space<vmem>>, vector<1x1280xf32>,
    %c0_i32_44 = arith.constant 0 : i32
    %77 = arith.cmpi eq, %arg1, %c0_i32_44 : i32
    %78 = arith.extui %77 : i1 to i32
    %c0_i32_45 = arith.constant 0 : i32
    %79 = arith.cmpi ne, %78, %c0_i32_45 : i32
    scf.if %79 {
      %c0_46 = arith.constant 0 : index
      %c0_47 = arith.constant 0 : index
      %80 = vector.load %arg10[%c0_46, %c0_47] : memref<2x1280xf32, #tpu.memory_space<vmem>>, vector<2x1280xf32>
      %cst_48 = arith.constant 1.562500e-02 : f32
      %81 = vector.broadcast %cst_48 : f32 to vector<2x1280xf32>
      %82 = arith.mulf %80, %81 : vector<2x1280xf32>
      %c0_49 = arith.constant 0 : index
      %c0_50 = arith.constant 0 : index
      %83 = vector.load %arg7[%c0_49, %c0_50] : memref<1280x128xf32, #tpu.memory_space<vmem>>, vector<1280x128xf32>
      %cst_51 = arith.constant dense<0.000000e+00> : vector<2x128xf32>
      %84 = tpu.matmul %82, %83, %cst_51 {dimension_numbers = #tpu.dot_dimension_numbers<[1], [0], [0], [1], [0, 0, 1, 1], [], []>} : vector<2x1280xf32>, vector<1280x128xf32>, vector<2x128xf32> -> vector<2x128xf32>
      %c0_52 = arith.constant 0 : index
      %c0_53 = arith.constant 0 : index
      %85 = vector.load %arg8[%c0_52, %c0_53] : memref<1x128xf32, #tpu.memory_space<vmem>>, vector<1x128xf32>
      %86 = vector.broadcast %85 : vector<1x128xf32> to vector<2x128xf32>
      %87 = arith.addf %84, %86 : vector<2x128xf32>
      %cst_54 = arith.constant dense<0xFF800000> : vector<2xf32>
      %88 = vector.multi_reduction <maximumf>, %87, %cst_54 [1] : vector<2x128xf32> to vector<2xf32>
      %89 = vector.shape_cast %88 : vector<2xf32> to vector<2x1xf32>
      %90 = vector.broadcast %89 : vector<2x1xf32> to vector<2x128xf32>
      %91 = arith.subf %87, %90 : vector<2x128xf32>
      %92 = math.exp %91 : vector<2x128xf32>
      %cst_55 = arith.constant dense<0.000000e+00> : vector<2xf32>
      %93 = vector.multi_reduction <add>, %92, %cst_55 [1] : vector<2x128xf32> to vector<2xf32>
      %94 = vector.shape_cast %93 : vector<2xf32> to vector<2x1xf32>
      %95 = vector.broadcast %94 : vector<2x1xf32> to vector<2x128xf32>
      %96 = arith.divf %92, %95 : vector<2x128xf32>
      %c0_56 = arith.constant 0 : index
      %c0_57 = arith.constant 0 : index
      %97 = vector.load %arg9[%c0_56, %c0_57] : memref<2x128xf32, #tpu.memory_space<vmem>>, vector<2x128xf32>
      tpu.vector_store %arg9[%c0_56, %c0_57], %96 {strides = array<i32>} : memref<2x128xf32, #tpu.memory_space<vmem>>, vector<2x128xf32>,
    } else {
    }
    return
  }
  func.func @transform_0(%arg0: i32, %arg1: i32) -> (i32, i32, i32) {
    %c0_i32 = arith.constant 0 : i32
    %c0_i32_0 = arith.constant 0 : i32
    return %arg0, %arg1, %c0_i32 : i32, i32, i32
  }
  func.func @transform_1(%arg0: i32, %arg1: i32) -> (i32, i32) {
    %c0_i32 = arith.constant 0 : i32
    %c0_i32_0 = arith.constant 0 : i32
    %c0_i32_1 = arith.constant 0 : i32
    return %c0_i32, %c0_i32_0 : i32, i32
  }
  func.func @transform_2(%arg0: i32, %arg1: i32) -> (i32, i32) {
    %c0_i32 = arith.constant 0 : i32
    %c0_i32_0 = arith.constant 0 : i32
    %c0_i32_1 = arith.constant 0 : i32
    return %c0_i32, %c0_i32_0 : i32, i32
  }
  func.func @transform_3(%arg0: i32, %arg1: i32) -> (i32, i32) {
    %c0_i32 = arith.constant 0 : i32
    %c0_i32_0 = arith.constant 0 : i32
    %c0_i32_1 = arith.constant 0 : i32
    return %c0_i32, %c0_i32_0 : i32, i32
  }
  func.func @transform_4(%arg0: i32, %arg1: i32) -> (i32, i32) {
    %c0_i32 = arith.constant 0 : i32
    %c0_i32_0 = arith.constant 0 : i32
    %c0_i32_1 = arith.constant 0 : i32
    return %c0_i32, %c0_i32_0 : i32, i32
  }
  func.func @transform_5(%arg0: i32, %arg1: i32) -> (i32, i32) {
    %c0_i32 = arith.constant 0 : i32
    %c0_i32_0 = arith.constant 0 : i32
    %c0_i32_1 = arith.constant 0 : i32
    return %c0_i32, %c0_i32_0 : i32, i32
  }
  func.func @transform_6(%arg0: i32, %arg1: i32) -> (i32, i32) {
    %c0_i32 = arith.constant 0 : i32
    %c0_i32_0 = arith.constant 0 : i32
    %c0_i32_1 = arith.constant 0 : i32
    return %c0_i32, %c0_i32_0 : i32, i32
  }
  func.func @transform_7(%arg0: i32, %arg1: i32) -> (i32, i32) {
    %c0_i32 = arith.constant 0 : i32
    %c0_i32_0 = arith.constant 0 : i32
    return %arg0, %c0_i32 : i32, i32
  }
}

</mosaic_0001>

<bundles_post_ra>
// kernel: classifier_forward.1
= control target key start
LH: loop header
LB: loop body
LE: loop exit
PB: predicated region body
PF: predicated region fallthrough
CT: control target
= control target key end

     0   :  { %vm87_vm0 = vcmask 261120   ;;  %s8397_s0 = inlined_call_operand.vmem [shape: bf16[2,64,32], index: 0, kind: input, shape index: {}]   ;;  %s8398_s1 = inlined_call_operand.vmem [shape: bf16[32,128], index: 1, kind: input, shape index: {}]   ;;  %s8399_s2 = inlined_call_operand.vmem [shape: f32[1,128], index: 2, kind: input, shape index: {}]   ;;  %s8400_s3 = inlined_call_operand.vmem [shape: bf16[128,1280], index: 3, kind: input, shape index: {}]   ;;  %s8401_s4 = inlined_call_operand.vmem [shape: f32[1,1280], index: 4, kind: input, shape index: {}]   ;;  %s8402_s5 = inlined_call_operand.vmem [shape: f32[1280,128], index: 5, kind: input, shape index: {}]   ;;  %s8403_s6 = inlined_call_operand.vmem [shape: f32[1,128], index: 6, kind: input, shape index: {}]   ;;  %s8404_s7 = inlined_call_operand.hbm [shape: f32[2,128], index: 7, kind: output, shape index: {}]  }
   0x1   :  { %v4814_v0 = vld [vmem:[%s8398_s1] sm:$0xff]   ;;  %v4815_v1 = vld [vmem:[%s8398_s1 + $0x8] sm:$0xff]   ;;  %v4818_v4 = vld [vmem:[%s8397_s0 + $0x10] sm:$0xff]  }
   0x2   :  { %4625 = vmatprep.subr.bf16.mxu0 %v4814_v0  ;;  %v4816_v2 = vld [vmem:[%s8397_s0] sm:$0xff]   ;;  %v4817_v3 = vld [vmem:[%s8397_s0 + $0x8] sm:$0xff]   ;;  %v4819_v5 = vld [vmem:[%s8397_s0 + $0x18] sm:$0xff]  }
   0x3   :  { %4626 = vmatpush3.bf16.msra.mxu0 %v4814_v0  ;;  %4629 = vmatprep.mubr.msk.bf16.mxu0 %vm87_vm0, %v4816_v2 }
   0x4   :  { %4627 = vmatprep.subr.bf16.mxu0 %v4815_v1 }
   0x7   :  { %4628 = vmatpush3.bf16.msra.mxu0 %v4815_v1 }
   0xa   :  { %4630 = vmatmul.mubr.msk.bf16.vlgmr.msra.gmra.mrb[0].mxu0 %vm87_vm0, %v4817_v3 }
   0xb   :  { %4633 = vmatprep.mubr.msk.bf16.mxu0 %vm87_vm0, %v4818_v4 }
  0x12   :  { %4634 = vmatmul.mubr.msk.bf16.gmra.mrb[4].mxu0 %vm87_vm0, %v4819_v5 }
  0x13   :  { %12 = vsyncpa [#allocation4], 0  ;;  %v4822_v6 = vld [vmem:[%s8400_s3 + $0xc] ss:$40 sps:$4 sm:$0xff]   ;;  %v4820_v8 = vld [vmem:[%s8400_s3 + $0x8] ss:$40 sps:$4 sm:$0xff]  }
  0x14   :  { %v4823_v7 = vld [vmem:[%s8400_s3 + $0x4] ss:$40 sps:$4 sm:$0xff]   ;;  %v4825_v9 = vld [vmem:[%s8400_s3] ss:$40 sps:$4 sm:$0xff]   ;;  %832 = vmatprep.subr.bf16.mxu0 %v4822_v6  ;;  %v4829_v11 = vld [vmem:[%s8400_s3 + $0x54] ss:$40 sps:$4 sm:$0xff]  }
  0x15   :  { %759 = vmatprep.subr.bf16.mxu1 %v4823_v7  ;;  %833 = vmatpush1.bf16.msra.mxu0 %v4820_v8  ;;  %v4828_v10 = vld [vmem:[%s8400_s3 + $0x5c] ss:$40 sps:$4 sm:$0xff]   ;;  %v4826_v12 = vld [vmem:[%s8400_s3 + $0x58] ss:$40 sps:$4 sm:$0xff]   ;;  %v4834_v14 = vld [vmem:[%s8400_s3 + $0xac] ss:$40 sps:$4 sm:$0xff]  }
  0x16   :  { %760 = vmatpush1.bf16.msra.mxu1 %v4825_v9  ;;  %v4831_v13 = vld [vmem:[%s8400_s3 + $0x50] ss:$40 sps:$4 sm:$0xff]   ;;  %834 = vmatprep.subr.bf16.mxu0 %v4828_v10  ;;  %v4835_v15 = vld [vmem:[%s8400_s3 + $0xa4] ss:$40 sps:$4 sm:$0xff]   ;;  %v4837_v17 = vld [vmem:[%s8400_s3 + $0xa0] ss:$40 sps:$4 sm:$0xff]  }
  0x17   :  { %761 = vmatprep.subr.bf16.mxu1 %v4829_v11  ;;  %v4832_v16 = vld [vmem:[%s8400_s3 + $0xa8] ss:$40 sps:$4 sm:$0xff]   ;;  %v4840_v18 = vld [vmem:[%s8400_s3 + $0xfc] ss:$40 sps:$4 sm:$0xff]   ;;  %v4838_v20 = vld [vmem:[%s8400_s3 + $0xf8] ss:$40 sps:$4 sm:$0xff]  }
  0x18   :  { %v4841_v19 = vld [vmem:[%s8400_s3 + $0xf4] ss:$40 sps:$4 sm:$0xff]   ;;  %v4843_v21 = vld [vmem:[%s8400_s3 + $0xf0] ss:$40 sps:$4 sm:$0xff]   ;;  %v4847_v23 = vld [vmem:[%s8400_s3 + $0x144] ss:$40 sps:$4 sm:$0xff]  }
  0x19   :  { %835 = vmatpush1.bf16.msra.mxu0 %v4826_v12  ;;  %v4846_v22 = vld [vmem:[%s8400_s3 + $0x14c] ss:$40 sps:$4 sm:$0xff]   ;;  %v4844_v24 = vld [vmem:[%s8400_s3 + $0x148] ss:$40 sps:$4 sm:$0xff]   ;;  %v4852_v26 = vld [vmem:[%s8400_s3 + $0x19c] ss:$40 sps:$4 sm:$0xff]  }
  0x1a   :  { %762 = vmatpush1.bf16.msra.mxu1 %v4831_v13  ;;  %836 = vmatprep.subr.bf16.mxu0 %v4834_v14  ;;  %v4849_v25 = vld [vmem:[%s8400_s3 + $0x140] ss:$40 sps:$4 sm:$0xff]   ;;  %v4853_v27 = vld [vmem:[%s8400_s3 + $0x194] ss:$40 sps:$4 sm:$0xff]   ;;  %v4855_v29 = vld [vmem:[%s8400_s3 + $0x190] ss:$40 sps:$4 sm:$0xff]  }
  0x1b   :  { %763 = vmatprep.subr.bf16.mxu1 %v4835_v15  ;;  %v4850_v28 = vld [vmem:[%s8400_s3 + $0x198] ss:$40 sps:$4 sm:$0xff]   ;;  %v4858_v30 = vld [vmem:[%s8400_s3 + $0x1ec] ss:$40 sps:$4 sm:$0xff]   ;;  %v4856_v32 = vld [vmem:[%s8400_s3 + $0x1e8] ss:$40 sps:$4 sm:$0xff]  }
  0x1c   :  { %v4859_v31 = vld [vmem:[%s8400_s3 + $0x1e4] ss:$40 sps:$4 sm:$0xff]   ;;  %v4861_v33 = vld [vmem:[%s8400_s3 + $0x1e0] ss:$40 sps:$4 sm:$0xff]   ;;  %v4865_v35 = vld [vmem:[%s8400_s3 + $0x234] ss:$40 sps:$4 sm:$0xff]  }
  0x1d   :  { %837 = vmatpush1.bf16.msra.mxu0 %v4832_v16  ;;  %v4864_v34 = vld [vmem:[%s8400_s3 + $0x23c] ss:$40 sps:$4 sm:$0xff]   ;;  %v4862_v36 = vld [vmem:[%s8400_s3 + $0x238] ss:$40 sps:$4 sm:$0xff]   ;;  %v8412_v40 = vmov 0   ;;  %vm4204_vm2 = vcmask 1041408  }
  0x1e   :  { %764 = vmatpush1.bf16.msra.mxu1 %v4837_v17  ;;  %838 = vmatprep.subr.bf16.mxu0 %v4840_v18  ;;  %v4867_v37 = vld [vmem:[%s8400_s3 + $0x230] ss:$40 sps:$4 sm:$0xff]   ;;  %v4870_v38 = vld [vmem:[%s8400_s3 + $0x1c] ss:$40 sps:$4 sm:$0xff]   ;;  %v4231_v41 = vld [vmem:[%s8399_s2] ss:$0 sm:$0xff] }
  0x1f   :  { %765 = vmatprep.subr.bf16.mxu1 %v4841_v19  ;;  %v4873_v39 = vld [vmem:[%s8400_s3 + $0x14] ss:$40 sps:$4 sm:$0xff]   ;;  %791 = vmatprep.mubr.bf16.mxu1 %v8412_v40 }
  0x20   :  { %864 = vmatprep.mubr.bf16.mxu0 %v8412_v40 }
  0x21   :  { %839 = vmatpush1.bf16.msra.mxu0 %v4838_v20 }
  0x22   :  { %766 = vmatpush1.bf16.msra.mxu1 %v4843_v21  ;;  %840 = vmatprep.subr.bf16.mxu0 %v4846_v22 }
  0x23   :  { %767 = vmatprep.subr.bf16.mxu1 %v4847_v23 }
  0x25   :  { %841 = vmatpush1.bf16.msra.mxu0 %v4844_v24 }
  0x26   :  { %768 = vmatpush1.bf16.msra.mxu1 %v4849_v25  ;;  %842 = vmatprep.subr.bf16.mxu0 %v4852_v26 }
  0x27   :  { %769 = vmatprep.subr.bf16.mxu1 %v4853_v27  ;;  %v4868_v27 = vld [vmem:[%s8400_s3 + $0x18] ss:$40 sps:$4 sm:$0xff]  }
  0x29   :  { %843 = vmatpush1.bf16.msra.mxu0 %v4850_v28  ;;  %v4871_v28 = vld [vmem:[%s8400_s3 + $0x10] ss:$40 sps:$4 sm:$0xff]  }
  0x2a   :  { %770 = vmatpush1.bf16.msra.mxu1 %v4855_v29  ;;  %844 = vmatprep.subr.bf16.mxu0 %v4858_v30  ;;  %v4876_v30 = vld [vmem:[%s8400_s3 + $0x6c] ss:$40 sps:$4 sm:$0xff]  }
  0x2b   :  { %771 = vmatprep.subr.bf16.mxu1 %v4859_v31  ;;  %v4879_v31 = vld [vmem:[%s8400_s3 + $0x64] ss:$40 sps:$4 sm:$0xff]  }
  0x2d   :  { %845 = vmatpush1.bf16.msra.mxu0 %v4856_v32 }
  0x2e   :  { %772 = vmatpush1.bf16.msra.mxu1 %v4861_v33  ;;  %846 = vmatprep.subr.bf16.mxu0 %v4864_v34  ;;  %v4874_v34 = vld [vmem:[%s8400_s3 + $0x68] ss:$40 sps:$4 sm:$0xff]  }
  0x2f   :  { %773 = vmatprep.subr.bf16.mxu1 %v4865_v35  ;;  %v4877_v35 = vld [vmem:[%s8400_s3 + $0x60] ss:$40 sps:$4 sm:$0xff]  }
  0x31   :  { %847 = vmatpush1.bf16.msra.mxu0 %v4862_v36 }
  0x32   :  { %774 = vmatpush1.bf16.msra.mxu1 %v4867_v37  ;;  %978 = vmatprep.subr.bf16.mxu0 %v4870_v38  ;;  %v4882_v37 = vld [vmem:[%s8400_s3 + $0xbc] ss:$40 sps:$4 sm:$0xff]  }
  0x33   :  { %905 = vmatprep.subr.bf16.mxu1 %v4873_v39  ;;  %v4885_v38 = vld [vmem:[%s8400_s3 + $0xb4] ss:$40 sps:$4 sm:$0xff]  }
  0xdd   :  { %v4631_v42 = vpop.f32.mrb[0].mxu0 }
  0xde   :  { %v143_v43 = vadd.f32 %v4631_v42, %v4231_v41  ;;  %v134_v44 = vpop.f32.mrb[1].mxu0 }
  0xdf   :  { %v135_v45 = vadd.f32 %v4231_v41, %v134_v44  ;;  %v4632_v46 = vpop.f32.mrb[2].mxu0 }
  0xe0   :  { %v4244_v47 = vmul.f32 -1.442695, %v143_v43  ;;  %v146_v48 = vadd.f32 %v4632_v46, %v4231_v41  ;;  %v137_v49 = vpop.f32.mrb[3].mxu0  ;;  %v4880_v46 = vld [vmem:[%s8400_s3 + $0xb8] ss:$40 sps:$4 sm:$0xff]  }
  0xe1   :  { %v4242_v50 = vmul.f32 -1.442695, %v135_v45  ;;  %v138_v51 = vadd.f32 %v4231_v41, %v137_v49  ;;  %v4888_v49 = vld [vmem:[%s8400_s3 + $0x10c] ss:$40 sps:$4 sm:$0xff]  }
  0xe2   :  { %5066 = vpow2.f32 %v4244_v47  ;;  %v4245_v52 = vmul.f32 -1.442695, %v146_v48  ;;  %v4883_v47 = vld [vmem:[%s8400_s3 + $0xb0] ss:$40 sps:$4 sm:$0xff]  }
  0xe3   :  { %5068 = vpow2.f32 %v4242_v50  ;;  %v4243_v53 = vmul.f32 -1.442695, %v138_v51  ;;  %v4891_v50 = vld [vmem:[%s8400_s3 + $0x104] ss:$40 sps:$4 sm:$0xff]  }
  0xe4   :  { %5070 = vpow2.f32 %v4245_v52  ;;  %v4889_v52 = vld [vmem:[%s8400_s3 + $0x100] ss:$40 sps:$4 sm:$0xff]  }
  0xe5   :  { %5072 = vpow2.f32 %v4243_v53  ;;  %v4635_v54 = vpop.f32.mrb[4].mxu0  ;;  %v4894_v53 = vld [vmem:[%s8400_s3 + $0x15c] ss:$40 sps:$4 sm:$0xff]  }
  0xe6   :  { %v5812_v55 = vadd.f32 %v4635_v54, %v4231_v41  ;;  %v150_v56 = vpop.f32.mrb[5].mxu0  ;;  %v4897_v54 = vld [vmem:[%s8400_s3 + $0x154] ss:$40 sps:$4 sm:$0xff]  }
  0xe7   :  { %v5814_v57 = vadd.f32 %v4231_v41, %v150_v56  ;;  %v4636_v58 = vpop.f32.mrb[6].mxu0  ;;  %v4895_v56 = vld [vmem:[%s8400_s3 + $0x150] ss:$40 sps:$4 sm:$0xff]  }
  0xe8   :  { %v4248_v59 = vmul.f32 -1.442695, %v5812_v55  ;;  %v5817_v60 = vadd.f32 %v4636_v58, %v4231_v41  ;;  %v153_v61 = vpop.f32.mrb[7].mxu0  ;;  %v4903_v58 = vld [vmem:[%s8400_s3 + $0x1a4] ss:$40 sps:$4 sm:$0xff]  }
  0xe9   :  { %v4246_v62 = vmul.f32 -1.442695, %v5814_v57  ;;  %v5820_v63 = vadd.f32 %v4231_v41, %v153_v61  ;;  %v4906_v61 = vld [vmem:[%s8400_s3 + $0x1fc] ss:$40 sps:$4 sm:$0xff]  }
  0xea   :  { %5074 = vpow2.f32 %v4248_v59  ;;  %v4249_v0 = vmul.f32 -1.442695, %v5817_v60  ;;  %v4898_v59 = vld [vmem:[%s8400_s3 + $0x1a8] ss:$40 sps:$4 sm:$0xff]  }
  0xeb   :  { %5076 = vpow2.f32 %v4246_v62  ;;  %v4247_v1 = vmul.f32 -1.442695, %v5820_v63  ;;  %v4909_v62 = vld [vmem:[%s8400_s3 + $0x1f4] ss:$40 sps:$4 sm:$0xff]  }
  0xec   :  { %v5067_v2 = vpop.eup %5066  ;;  %5078 = vpow2.f32 %v4249_v0  ;;  %v4907_v0 = vld [vmem:[%s8400_s3 + $0x1f0] ss:$40 sps:$4 sm:$0xff]  }
  0xed   :  { %v5069_v3 = vpop.eup %5068  ;;  %v191_v4 = vadd.f32 1.0, %v5067_v2  ;;  %5080 = vpow2.f32 %v4247_v1  ;;  %v4912_v1 = vld [vmem:[%s8400_s3 + $0x24c] ss:$40 sps:$4 sm:$0xff]  }
  0xee   :  { %v5071_v5 = vpop.eup %5070  ;;  %v189_v6 = vadd.f32 1.0, %v5069_v3  ;;  %v4915_v2 = vld [vmem:[%s8400_s3 + $0x244] ss:$40 sps:$4 sm:$0xff]   ;;  %v4910_v3 = vld [vmem:[%s8400_s3 + $0x248] ss:$40 sps:$4 sm:$0xff]  }
  0xef   :  { %v5073_v7 = vpop.eup %5072  ;;  %5082 = vrcp.f32 %v191_v4  ;;  %v192_v8 = vadd.f32 1.0, %v5071_v5  ;;  %v4913_v4 = vld [vmem:[%s8400_s3 + $0x240] ss:$40 sps:$4 sm:$0xff]  }
  0xf0   :  { %5084 = vrcp.f32 %v189_v6  ;;  %v190_v9 = vadd.f32 1.0, %v5073_v7  ;;  %v4916_v5 = vld [vmem:[%s8398_s1] sm:$0xff]  }
  0xf1   :  { %5086 = vrcp.f32 %v192_v8  ;;  %v4919_v6 = vld [vmem:[%s8400_s3 + $0x24] ss:$40 sps:$4 sm:$0xff]   ;;  %v4917_v7 = vld [vmem:[%s8400_s3 + $0x20] ss:$40 sps:$4 sm:$0xff]   ;;  %v4922_v8 = vld [vmem:[%s8400_s3 + $0x74] ss:$40 sps:$4 sm:$0xff]  }
  0xf2   :  { %5088 = vrcp.f32 %v190_v9  ;;  %v4929_v9 = vld [vmem:[%s8398_s1 + $0x8] sm:$0xff]  }
  0xf4   :  { %v5075_v10 = vpop.eup %5074 }
  0xf5   :  { %v5077_v11 = vpop.eup %5076  ;;  %v195_v12 = vadd.f32 1.0, %v5075_v10  ;;  %v4920_v10 = vld [vmem:[%s8400_s3 + $0x70] ss:$40 sps:$4 sm:$0xff]  }
  0xf6   :  { %v5079_v13 = vpop.eup %5078  ;;  %v193_v14 = vadd.f32 1.0, %v5077_v11  ;;  %v4925_v11 = vld [vmem:[%s8400_s3 + $0xc4] ss:$40 sps:$4 sm:$0xff]  }
  0xf7   :  { %v5081_v15 = vpop.eup %5080  ;;  %5090 = vrcp.f32 %v195_v12  ;;  %v196_v16 = vadd.f32 1.0, %v5079_v13  ;;  %v4923_v12 = vld [vmem:[%s8400_s3 + $0xc0] ss:$40 sps:$4 sm:$0xff]   ;;  %v4928_v13 = vld [vmem:[%s8400_s3 + $0x114] ss:$40 sps:$4 sm:$0xff]  }
  0xf8   :  { %5092 = vrcp.f32 %v193_v14  ;;  %v194_v17 = vadd.f32 1.0, %v5081_v15  ;;  %v4926_v14 = vld [vmem:[%s8400_s3 + $0x110] ss:$40 sps:$4 sm:$0xff]   ;;  %v4932_v15 = vld [vmem:[%s8400_s3 + $0x164] ss:$40 sps:$4 sm:$0xff]  }
  0xf9   :  { %v5083_v18 = vpop.eup %5082  ;;  %5094 = vrcp.f32 %v196_v16  ;;  %v4930_v16 = vld [vmem:[%s8400_s3 + $0x160] ss:$40 sps:$4 sm:$0xff]  }
  0xfa   :  { %v5085_v19 = vpop.eup %5084  ;;  %5096 = vrcp.f32 %v194_v17  ;;  %v215_v22 = vmul.f32 %v5083_v18, %v143_v43  ;;  %v4935_v17 = vld [vmem:[%s8400_s3 + $0x1b4] ss:$40 sps:$4 sm:$0xff]   ;;  %v4933_v18 = vld [vmem:[%s8400_s3 + $0x1b0] ss:$40 sps:$4 sm:$0xff]  }
  0xfb   :  { %v5087_v20 = vpop.eup %5086  ;;  %v213_v24 = vmul.f32 %v5085_v19, %v135_v45  ;;  %v4938_v19 = vld [vmem:[%s8400_s3 + $0x204] ss:$40 sps:$4 sm:$0xff]  }
  0xfc   :  { %v5089_v21 = vpop.eup %5088  ;;  %v216_v23 = vmul.f32 %v5087_v20, %v146_v48  ;;  %v4936_v20 = vld [vmem:[%s8400_s3 + $0x200] ss:$40 sps:$4 sm:$0xff]  }
  0xfd   :  { %v214_v25 = vmul.f32 %v5089_v21, %v138_v51  ;;  %v4886_v51 = vld [vmem:[%s8400_s3 + $0x108] ss:$40 sps:$4 sm:$0xff]   ;;  %v4941_v21 = vld [vmem:[%s8400_s3 + $0x254] ss:$40 sps:$4 sm:$0xff]  }
  0xfe   :  { %v5824_v26 = vpack.c.bf16 %v216_v23, %v215_v22  ;;  %v4942_v22 = vld [vmem:[%s8397_s0 + $0x20] sm:$0xff]   ;;  %v4939_v23 = vld [vmem:[%s8400_s3 + $0x250] ss:$40 sps:$4 sm:$0xff]  }
  0xff   :  { %v5832_v29 = vpack.c.bf16 %v214_v25, %v213_v24  ;;  %v4943_v24 = vld [vmem:[%s8397_s0 + $0x28] sm:$0xff]   ;;  %v4944_v25 = vld [vmem:[%s8397_s0 + $0x30] sm:$0xff]  }
 0x101   :  { %v5091_v32 = vpop.eup %5090  ;;  %792 = vmatmul.mubr.bf16.vlgmr.msra.gmra.mrb[0].mxu1 %v5832_v29  ;;  %865 = vmatmul.mubr.bf16.vlgmr.msra.gmra.mrb[8].mxu0 %v5832_v29 }
 0x102   :  { %v5093_v33 = vpop.eup %5092  ;;  %979 = vmatpush1.bf16.msra.mxu0 %v4868_v27  ;;  %906 = vmatpush1.bf16.msra.mxu1 %v4871_v28  ;;  %v219_v41 = vmul.f32 %v5091_v32, %v5812_v55  ;;  %v4892_v55 = vld [vmem:[%s8400_s3 + $0x158] ss:$40 sps:$4 sm:$0xff]   ;;  %v8411_v28 = vlaneseq }
 0x103   :  { %v5095_v36 = vpop.eup %5094  ;;  %980 = vmatprep.subr.bf16.mxu0 %v4876_v30  ;;  %907 = vmatprep.subr.bf16.mxu1 %v4879_v31  ;;  %v217_v43 = vmul.f32 %v5093_v33, %v5814_v57  ;;  %v4900_v57 = vld [vmem:[%s8400_s3 + $0x1ac] ss:$40 sps:$4 sm:$0xff]   ;;  %v4945_v27 = vld [vmem:[%s8397_s0 + $0x38] sm:$0xff]   ;;  %v6046_v31 = vld [vmem:[%s8401_s4] sm:$0xff] }
 0x104   :  { %v5097_v39 = vpop.eup %5096  ;;  %v220_v42 = vmul.f32 %v5095_v36, %v5817_v60  ;;  %801 = vmatprep.mubr.bf16.mxu1 %v8412_v40  ;;  %874 = vmatprep.mubr.bf16.mxu0 %v8412_v40  ;;  %v4901_v60 = vld [vmem:[%s8400_s3 + $0x1a0] ss:$40 sps:$4 sm:$0xff]  }
 0x105   :  { %v218_v44 = vmul.f32 %v5097_v39, %v5820_v63  ;;  %v4904_v63 = vld [vmem:[%s8400_s3 + $0x1f8] ss:$40 sps:$4 sm:$0xff]  }
 0x106   :  { %v5860_v45 = vpack.c.bf16 %v220_v42, %v219_v41  ;;  %981 = vmatpush1.bf16.msra.mxu0 %v4874_v34  ;;  %908 = vmatpush1.bf16.msra.mxu1 %v4877_v35 }
 0x107   :  { %v5868_v48 = vpack.c.bf16 %v218_v44, %v217_v43  ;;  %982 = vmatprep.subr.bf16.mxu0 %v4882_v37  ;;  %909 = vmatprep.subr.bf16.mxu1 %v4885_v38 }
 0x109   :  { %802 = vmatmul.mubr.bf16.gmra.mrb[4].mxu1 %v5824_v26  ;;  %875 = vmatmul.mubr.bf16.gmra.mrb[12].mxu0 %v5824_v26 }
 0x10a   :  { %983 = vmatpush1.bf16.msra.mxu0 %v4880_v46  ;;  %910 = vmatpush1.bf16.msra.mxu1 %v4883_v47 }
 0x10b   :  { %984 = vmatprep.subr.bf16.mxu0 %v4888_v49  ;;  %911 = vmatprep.subr.bf16.mxu1 %v4891_v50 }
 0x10c   :  { %811 = vmatprep.mubr.bf16.mxu1 %v8412_v40  ;;  %884 = vmatprep.mubr.bf16.mxu0 %v8412_v40 }
 0x10e   :  { %985 = vmatpush1.bf16.msra.mxu0 %v4886_v51  ;;  %912 = vmatpush1.bf16.msra.mxu1 %v4889_v52 }
 0x10f   :  { %986 = vmatprep.subr.bf16.mxu0 %v4894_v53  ;;  %913 = vmatprep.subr.bf16.mxu1 %v4897_v54 }
 0x111   :  { %812 = vmatmul.mubr.bf16.gmra.mrb[8].mxu1 %v5868_v48  ;;  %885 = vmatmul.mubr.bf16.gmra.mrb[16].mxu0 %v5868_v48 }
 0x112   :  { %987 = vmatpush1.bf16.msra.mxu0 %v4892_v55  ;;  %914 = vmatpush1.bf16.msra.mxu1 %v4895_v56 }
 0x113   :  { %988 = vmatprep.subr.bf16.mxu0 %v4900_v57  ;;  %915 = vmatprep.subr.bf16.mxu1 %v4903_v58 }
 0x114   :  { %821 = vmatprep.mubr.bf16.mxu1 %v8412_v40  ;;  %894 = vmatprep.mubr.bf16.mxu0 %v8412_v40 }
 0x116   :  { %989 = vmatpush1.bf16.msra.mxu0 %v4898_v59  ;;  %916 = vmatpush1.bf16.msra.mxu1 %v4901_v60 }
 0x117   :  { %990 = vmatprep.subr.bf16.mxu0 %v4906_v61  ;;  %917 = vmatprep.subr.bf16.mxu1 %v4909_v62 }
 0x119   :  { %822 = vmatmul.mubr.bf16.gmra.mrb[12].mxu1 %v5860_v45  ;;  %895 = vmatmul.mubr.bf16.gmra.mrb[20].mxu0 %v5860_v45 }
 0x11a   :  { %991 = vmatpush1.bf16.msra.mxu0 %v4904_v63  ;;  %918 = vmatpush1.bf16.msra.mxu1 %v4907_v0 }
 0x11b   :  { %992 = vmatprep.subr.bf16.mxu0 %v4912_v1  ;;  %919 = vmatprep.subr.bf16.mxu1 %v4915_v2 }
 0x11c   :  { %937 = vmatprep.mubr.bf16.mxu1 %v8412_v40  ;;  %1010 = vmatprep.mubr.bf16.mxu0 %v8412_v40 }
 0x11e   :  { %993 = vmatpush1.bf16.msra.mxu0 %v4910_v3  ;;  %920 = vmatpush1.bf16.msra.mxu1 %v4913_v4 }
 0x11f   :  { %4637 = vmatprep.subr.bf16.mxu0 %v4916_v5  ;;  %1051 = vmatprep.subr.bf16.mxu1 %v4919_v6 }
 0x121   :  { %938 = vmatmul.mubr.bf16.vlgmr.msra.gmra.mrb[16].mxu1 %v5832_v29  ;;  %1011 = vmatmul.mubr.bf16.vlgmr.msra.gmra.mrb[24].mxu0 %v5832_v29 }
 0x122   :  { %4638 = vmatpush3.bf16.msra.mxu0 %v4916_v5  ;;  %1052 = vmatpush1.bf16.msra.mxu1 %v4917_v7 }
 0x123   :  { %1053 = vmatprep.subr.bf16.mxu1 %v4922_v8  ;;  %947 = vmatprep.mubr.bf16.mxu1 %v8412_v40 }
 0x124   :  { %1020 = vmatprep.mubr.bf16.mxu0 %v8412_v40  ;;  %4639 = vmatprep.subr.bf16.mxu0 %v4929_v9 }
 0x126   :  { %1054 = vmatpush1.bf16.msra.mxu1 %v4920_v10  ;;  %4640 = vmatpush3.bf16.msra.mxu0 %v4929_v9 }
 0x127   :  { %1055 = vmatprep.subr.bf16.mxu1 %v4925_v11 }
 0x129   :  { %948 = vmatmul.mubr.bf16.gmra.mrb[20].mxu1 %v5824_v26  ;;  %1021 = vmatmul.mubr.bf16.gmra.mrb[28].mxu0 %v5824_v26 }
 0x12a   :  { %1056 = vmatpush1.bf16.msra.mxu1 %v4923_v12  ;;  %957 = vmatprep.mubr.bf16.mxu1 %v8412_v40 }
 0x12b   :  { %1057 = vmatprep.subr.bf16.mxu1 %v4928_v13  ;;  %1030 = vmatprep.mubr.bf16.mxu0 %v8412_v40 }
 0x12e   :  { %1058 = vmatpush1.bf16.msra.mxu1 %v4926_v14 }
 0x12f   :  { %1059 = vmatprep.subr.bf16.mxu1 %v4932_v15 }
 0x131   :  { %958 = vmatmul.mubr.bf16.gmra.mrb[24].mxu1 %v5868_v48  ;;  %1031 = vmatmul.mubr.bf16.gmra.mrb[32].mxu0 %v5868_v48 }
 0x132   :  { %1060 = vmatpush1.bf16.msra.mxu1 %v4930_v16  ;;  %967 = vmatprep.mubr.bf16.mxu1 %v8412_v40 }
 0x133   :  { %1061 = vmatprep.subr.bf16.mxu1 %v4935_v17  ;;  %1040 = vmatprep.mubr.bf16.mxu0 %v8412_v40 }
 0x136   :  { %1062 = vmatpush1.bf16.msra.mxu1 %v4933_v18 }
 0x137   :  { %1063 = vmatprep.subr.bf16.mxu1 %v4938_v19 }
 0x139   :  { %968 = vmatmul.mubr.bf16.gmra.mrb[28].mxu1 %v5860_v45  ;;  %1041 = vmatmul.mubr.bf16.gmra.mrb[36].mxu0 %v5860_v45 }
 0x13a   :  { %1064 = vmatpush1.bf16.msra.mxu1 %v4936_v20  ;;  %1083 = vmatprep.mubr.bf16.mxu1 %v8412_v40 }
 0x13b   :  { %1065 = vmatprep.subr.bf16.mxu1 %v4941_v21  ;;  %4641 = vmatprep.mubr.msk.bf16.mxu0 %vm87_vm0, %v4942_v22 }
 0x13e   :  { %1066 = vmatpush1.bf16.msra.mxu1 %v4939_v23 }
 0x141   :  { %1084 = vmatmul.mubr.bf16.vlgmr.msra.gmra.mrb[32].mxu1 %v5832_v29  ;;  %4642 = vmatmul.mubr.msk.bf16.vlgmr.msra.gmra.mrb[40].mxu0 %vm87_vm0, %v4943_v24  ;;  %v6037_v29 = vshrl.u32 %v8411_v28, 7  ;;  %v5639_v24 = vmov 1966171168  }
 0x142   :  { %1093 = vmatprep.mubr.bf16.mxu1 %v8412_v40  ;;  %4645 = vmatprep.mubr.msk.bf16.mxu0 %vm87_vm0, %v4944_v25  ;;  %v6133_v25 = vunpack.c.l.s4 %v5639_v24  ;;  %v4954_v24 = vld [vmem:[%s8400_s3 + $0x54] ss:$40 sps:$4 sm:$0xff]  }
 0x143   :  { %8453 = vst [vmem:[#allocation6_spill] sm:$0xff] %v6037_v29  ;;  %v8410_v30 = vsub.s32 2, %v6037_v29  ;;  %v6049_v32 = vsub.s32 1, %v6037_v29  ;;  %v8409_v33 = vsub.s32 3, %v6037_v29  ;;  %v8408_v59 = vsub.s32 4, %v6037_v29 }
 0x144   :  { %v8407_v62 = vsub.s32 6, %v6037_v29  ;;  %v8406_v63 = vsub.s32 5, %v6037_v29 }
 0x145   :  { %8455 = vst [vmem:[#allocation8_spill] sm:$0xff] %v6049_v32  ;;  %v6059_v35 = vrot.slane %v6046_v31, %v8410_v30  ;;  %v6063_v38 = vrot.slane %v6046_v31, %v6049_v32  ;;  %v6068_v39 = vrot.slane %v6046_v31, %v8409_v33 }
 0x149   :  { %1094 = vmatmul.mubr.bf16.gmra.mrb[36].mxu1 %v5824_v26  ;;  %4646 = vmatmul.mubr.msk.bf16.gmra.mrb[44].mxu0 %vm87_vm0, %v4945_v27  ;;  %v6040_v26 = vsub.s32 0, %v6037_v29 }
 0x14a   :  { %1103 = vmatprep.mubr.bf16.mxu1 %v8412_v40  ;;  %2659 = vmatprep.mubr.bf16.mxu0 %v8412_v40 }
 0x14b   :  { %8454 = vst [vmem:[#allocation7_spill] sm:$0xff] %v6040_v26  ;;  %v6054_v34 = vrot.slane %v6046_v31, %v6040_v26 }
 0x151   :  { %1104 = vmatmul.mubr.bf16.gmra.mrb[40].mxu1 %v5868_v48 }
 0x152   :  { %1113 = vmatprep.mubr.bf16.mxu1 %v8412_v40 }
 0x159   :  { %1114 = vmatmul.mubr.bf16.gmra.mrb[44].mxu1 %v5860_v45 }
 0x15a   :  { %2586 = vmatprep.mubr.bf16.mxu1 %v8412_v40 }
 0x1d4   :  { %v793_v36 = vpop.f32.mrb[0].mxu1  ;;  %v866_v37 = vpop.f32.mrb[8].mxu0 }
 0x1d5   :  { %v795_v41 = vpop.f32.mrb[1].mxu1  ;;  %v868_v42 = vpop.f32.mrb[9].mxu0  ;;  %v6071_v45 = vadd.f32 %v793_v36, %v6054_v34  ;;  %v6074_v46 = vadd.f32 %v866_v37, %v6059_v35  ;;  %v8405_v37 = vsub.s32 7, %v6037_v29 }
 0x1d6   :  { %v797_v43 = vpop.f32.mrb[2].mxu1  ;;  %v870_v44 = vpop.f32.mrb[10].mxu0  ;;  %v6083_v51 = vadd.f32 %v795_v41, %v6063_v38  ;;  %v6086_v52 = vadd.f32 %v868_v42, %v6068_v39 }
 0x1d7   :  { %v6077_v47 = vadd.f32 %v797_v43, %v6054_v34  ;;  %v6080_v48 = vadd.f32 %v870_v44, %v6059_v35  ;;  %v799_v49 = vpop.f32.mrb[3].mxu1  ;;  %v872_v50 = vpop.f32.mrb[11].mxu0  ;;  %v4948_v43 = vld [vmem:[%s8400_s3 + $0x4] ss:$40 sps:$4 sm:$0xff]  }
 0x1d8   :  { %v6089_v53 = vadd.f32 %v799_v49, %v6063_v38  ;;  %v6092_v54 = vadd.f32 %v872_v50, %v6068_v39  ;;  %v4951_v44 = vld [vmem:[%s8400_s3 + $0xc] ss:$40 sps:$4 sm:$0xff]   ;;  %2554 = vmatprep.subr.bf16.mxu1 %v4948_v43 }
 0x1d9   :  { %v1124_v55 = vpack.c.bf16 %v6077_v47, %v6071_v45  ;;  %v1126_v56 = vpack.c.bf16 %v6080_v48, %v6074_v46  ;;  %2627 = vmatprep.subr.bf16.mxu0 %v4951_v44 }
 0x1da   :  { %v1125_v57 = vpack.c.bf16 %v6089_v53, %v6083_v51  ;;  %v1127_v58 = vpack.c.bf16 %v6092_v54, %v6086_v52 }
 0x1db   :  { %v1164_v60 = vsub.bf16 0, %v1124_v55  ;;  %v1166_v61 = vsub.bf16 0, %v1126_v56 }
 0x1dc   :  { %v1165_v0 = vsub.bf16 0, %v1125_v57  ;;  %v1167_v1 = vsub.bf16 0, %v1127_v58  ;;  %v803_v2 = vpop.f32.mrb[4].mxu1  ;;  %v876_v3 = vpop.f32.mrb[12].mxu0  ;;  %v6149_v57 = vrot.slane %v6046_v31, %v8408_v59  ;;  %v4946_v58 = vld [vmem:[%s8400_s3] ss:$40 sps:$4 sm:$0xff]  }
 0x1dd   :  { %v1205_v4 = vmul.bf16 1069105081, %v1164_v60  ;;  %v1211_v5 = vmul.bf16 1069105081, %v1166_v61  ;;  %v805_v6 = vpop.f32.mrb[5].mxu1  ;;  %v878_v7 = vpop.f32.mrb[13].mxu0  ;;  %v6106_v10 = vadd.f32 %v803_v2, %v6054_v34  ;;  %v6109_v11 = vadd.f32 %v876_v3, %v6059_v35  ;;  %2555 = vmatpush1.bf16.msra.mxu1 %v4946_v58 }
 0x1de   :  { %v1208_v8 = vmul.bf16 1069105081, %v1165_v0  ;;  %v1214_v9 = vmul.bf16 1069105081, %v1167_v1  ;;  %v807_v12 = vpop.f32.mrb[6].mxu1  ;;  %v880_v13 = vpop.f32.mrb[14].mxu0  ;;  %v6112_v14 = vadd.f32 %v805_v6, %v6063_v38  ;;  %v6121_v19 = vadd.f32 %v878_v7, %v6068_v39  ;;  %2556 = vmatprep.subr.bf16.mxu1 %v4954_v24 }
 0x1df   :  { %5098 = vpow.bf16 %v1205_v4  ;;  %v6115_v15 = vadd.f32 %v807_v12, %v6054_v34  ;;  %v6118_v16 = vadd.f32 %v880_v13, %v6059_v35  ;;  %v809_v17 = vpop.f32.mrb[7].mxu1  ;;  %v882_v18 = vpop.f32.mrb[15].mxu0  ;;  %v1763_v2 = vunpack.c.0.s8 %v6133_v25 }
 0x1e0   :  { %5100 = vpow.bf16 %v1211_v5  ;;  %v6124_v20 = vadd.f32 %v809_v17, %v6063_v38  ;;  %v6127_v21 = vadd.f32 %v882_v18, %v6068_v39  ;;  %v6158_v3 = vrot.slane %v6046_v31, %v8407_v62 }
 0x1e1   :  { %5102 = vpow.bf16 %v1208_v8  ;;  %v1134_v22 = vpack.c.bf16 %v6115_v15, %v6106_v10  ;;  %v1136_v23 = vpack.c.bf16 %v6118_v16, %v6109_v11 }
 0x1e2   :  { %5104 = vpow.bf16 %v1214_v9  ;;  %v1135_v27 = vpack.c.bf16 %v6124_v20, %v6112_v14  ;;  %v1137_v36 = vpack.c.bf16 %v6127_v21, %v6121_v19 }
 0x1e3   :  { %v1174_v41 = vsub.bf16 0, %v1134_v22  ;;  %v1176_v42 = vsub.bf16 0, %v1136_v23  ;;  %v4949_v23 = vld [vmem:[%s8400_s3 + $0x8] ss:$40 sps:$4 sm:$0xff]  }
 0x1e4   :  { %v1175_v49 = vsub.bf16 0, %v1135_v27  ;;  %v1177_v50 = vsub.bf16 0, %v1137_v36  ;;  %v813_v55 = vpop.f32.mrb[8].mxu1  ;;  %v886_v56 = vpop.f32.mrb[16].mxu0  ;;  %2628 = vmatpush1.bf16.msra.mxu0 %v4949_v23 }
 0x1e5   :  { %v1235_v60 = vmul.bf16 1069105081, %v1174_v41  ;;  %v1241_v61 = vmul.bf16 1069105081, %v1176_v42  ;;  %v815_v0 = vpop.f32.mrb[9].mxu1  ;;  %v888_v1 = vpop.f32.mrb[17].mxu0  ;;  %v6161_v6 = vadd.f32 %v813_v55, %v6054_v34  ;;  %v6164_v7 = vadd.f32 %v886_v56, %v6059_v35 }
 0x1e6   :  { %v1238_v4 = vmul.bf16 1069105081, %v1175_v49  ;;  %v1244_v5 = vmul.bf16 1069105081, %v1177_v50  ;;  %v817_v8 = vpop.f32.mrb[10].mxu1  ;;  %v890_v9 = vpop.f32.mrb[18].mxu0  ;;  %v6167_v12 = vadd.f32 %v815_v0, %v6063_v38  ;;  %v6182_v25 = vadd.f32 %v888_v1, %v6068_v39 }
 0x1e7   :  { %5106 = vpow.bf16 %v1235_v60  ;;  %v6170_v13 = vadd.f32 %v817_v8, %v6054_v34  ;;  %v6173_v17 = vadd.f32 %v890_v9, %v6059_v35  ;;  %v819_v18 = vpop.f32.mrb[11].mxu1  ;;  %v892_v22 = vpop.f32.mrb[19].mxu0  ;;  %v4952_v41 = vld [vmem:[%s8400_s3 + $0x50] ss:$40 sps:$4 sm:$0xff]   ;;  %v4957_v42 = vld [vmem:[%s8400_s3 + $0x5c] ss:$40 sps:$4 sm:$0xff]   ;;  %v6203_v49 = vrot.slane %v6046_v31, %v8406_v63 }
 0x1e8   :  { %5108 = vpow.bf16 %v1241_v61  ;;  %v6185_v27 = vadd.f32 %v819_v18, %v6063_v38  ;;  %v6188_v36 = vadd.f32 %v892_v22, %v6068_v39  ;;  %v6208_v50 = vld [vmem:[%s8401_s4 + $0x8] sm:$0x3]  ;;  %v4955_v55 = vld [vmem:[%s8400_s3 + $0x58] ss:$40 sps:$4 sm:$0xff]   ;;  %v6220_v61 = vrot.slane %v6046_v31, %v8405_v37  ;;  %2629 = vmatprep.subr.bf16.mxu0 %v4957_v42  ;;  %2557 = vmatpush1.bf16.msra.mxu1 %v4952_v41  ;;  %v4960_v9 = vld [vmem:[%s8400_s3 + $0xa4] ss:$40 sps:$4 sm:$0xff]  }
 0x1e9   :  { %5110 = vpow.bf16 %v1238_v4  ;;  %v1144_v43 = vpack.c.bf16 %v6170_v13, %v6161_v6  ;;  %v1146_v44 = vpack.c.bf16 %v6173_v17, %v6164_v7  ;;  %8456 = vst [vmem:[#allocation9_spill] sm:$0xff] %v6208_v50  ;;  %v6238_v42 = vrot.slane %v6208_v50, %v6040_v26  ;;  %2630 = vmatpush1.bf16.msra.mxu0 %v4955_v55  ;;  %v4958_v37 = vld [vmem:[%s8400_s3 + $0xa0] ss:$40 sps:$4 sm:$0xff]  }
 0x1ea   :  { %v5099_v56 = vpop.eup %5098  ;;  %5112 = vpow.bf16 %v1244_v5  ;;  %v1145_v58 = vpack.c.bf16 %v6185_v27, %v6167_v12  ;;  %v1147_v60 = vpack.c.bf16 %v6188_v36, %v6182_v25  ;;  %v6227_v5 = vsub.s32 %v1763_v2, %v6037_v29  ;;  %2558 = vmatprep.subr.bf16.mxu1 %v4960_v9 }
 0x1eb   :  { %v5101_v0 = vpop.eup %5100  ;;  %v1324_v1 = vadd.bf16 1065369472, %v5099_v56  ;;  %v6222_v4 = vsub.bf16 0, %v1144_v43  ;;  %v6224_v8 = vsub.bf16 0, %v1146_v44  ;;  %8458 = vst [vmem:[#allocation11_spill] sm:$0xff] %v6238_v42 }
 0x1ec   :  { %8457 = vst [vmem:[#allocation10_spill] sm:$0xff] %v6227_v5  ;;  %v5103_v18 = vpop.eup %5102  ;;  %v1326_v22 = vadd.bf16 1065369472, %v5101_v0  ;;  %v6232_v23 = vsub.bf16 0, %v1145_v58  ;;  %v6234_v31 = vsub.bf16 0, %v1147_v60  ;;  %v823_v24 = vpop.f32.mrb[12].mxu1  ;;  %2559 = vmatpush1.bf16.msra.mxu1 %v4958_v37 }
 0x1ed   :  { %v896_v41 = vpop.f32.mrb[20].mxu0  ;;  %v5105_v43 = vpop.eup %5104  ;;  %v1364_v44 = vunpack.c.l.bf16 %v1324_v1  ;;  %v1374_v2 = vunpack.c.h.bf16 %v1324_v1  ;;  %v1325_v56 = vadd.bf16 1065369472, %v5103_v18  ;;  %v4969_v37 = vld [vmem:[%s8400_s3 + $0xfc] ss:$40 sps:$4 sm:$0xff]  }
 0x1ee   :  { %v825_v63 = vpop.f32.mrb[13].mxu1  ;;  %v898_v62 = vpop.f32.mrb[21].mxu0  ;;  %v1366_v58 = vunpack.c.l.bf16 %v1326_v22  ;;  %v1376_v0 = vunpack.c.h.bf16 %v1326_v22  ;;  %v1327_v60 = vadd.bf16 1065369472, %v5105_v43  ;;  %v4961_v43 = vld [vmem:[%s8400_s3 + $0xa8] ss:$40 sps:$4 sm:$0xff]   ;;  %v6257_v29 = vadd.f32 %v896_v41, %v6059_v35 }
 0x1ef   :  { %v827_v33 = vpop.f32.mrb[14].mxu1  ;;  %v900_v30 = vpop.f32.mrb[22].mxu0  ;;  %5114 = vrcp.f32 %v1364_v44  ;;  %v1365_v28 = vunpack.c.l.bf16 %v1325_v56  ;;  %v1375_v40 = vunpack.c.h.bf16 %v1325_v56  ;;  %v4963_v44 = vld [vmem:[%s8400_s3 + $0xac] ss:$40 sps:$4 sm:$0xff]   ;;  %v6254_v56 = vadd.f32 %v823_v24, %v6054_v34 }
 0x1f0   :  { %v829_v1 = vpop.f32.mrb[15].mxu1  ;;  %v902_v18 = vpop.f32.mrb[23].mxu0  ;;  %5116 = vrcp.f32 %v1374_v2  ;;  %v1367_v55 = vunpack.c.l.bf16 %v1327_v60  ;;  %v1377_v9 = vunpack.c.h.bf16 %v1327_v60  ;;  %8459 = vst [vmem:[#allocation12_spill] sm:$0xff] %v6257_v29  ;;  %v6260_v2 = vadd.f32 %v825_v63, %v6063_v38  ;;  %v4964_v60 = vld [vmem:[%s8400_s3 + $0xf0] ss:$40 sps:$4 sm:$0xff]   ;;  %2631 = vmatprep.subr.bf16.mxu0 %v4963_v44 }
 0x1f1   :  { %5118 = vrcp.f32 %v1366_v58  ;;  %v4966_v22 = vld [vmem:[%s8400_s3 + $0xf4] ss:$40 sps:$4 sm:$0xff]   ;;  %v6269_v24 = vadd.f32 %v898_v62, %v6068_v39  ;;  %v6272_v41 = vadd.f32 %v827_v33, %v6054_v34  ;;  %v6275_v63 = vadd.f32 %v900_v30, %v6059_v35  ;;  %2632 = vmatpush1.bf16.msra.mxu0 %v4961_v43  ;;  %v4967_v30 = vld [vmem:[%s8400_s3 + $0xf8] ss:$40 sps:$4 sm:$0xff]  }
 0x1f2   :  { %8460 = vst [vmem:[#allocation13_spill] sm:$0xff] %v6260_v2  ;;  %v5107_v59 = vpop.eup %5106  ;;  %5120 = vrcp.f32 %v1376_v0  ;;  %v6281_v42 = vadd.f32 %v829_v1, %v6063_v38  ;;  %v6284_v62 = vadd.f32 %v902_v18, %v6068_v39  ;;  %2560 = vmatprep.subr.bf16.mxu1 %v4966_v22  ;;  %2633 = vmatprep.subr.bf16.mxu0 %v4969_v37 }
 0x1f3   :  { %8461 = vst [vmem:[#allocation14_spill] sm:$0xff] %v6269_v24  ;;  %8462 = vst [vmem:[#allocation15_spill] sm:$0xff] %v6272_v41  ;;  %v5109_v58 = vpop.eup %5108  ;;  %5122 = vrcp.f32 %v1365_v28  ;;  %v1334_v26 = vadd.bf16 1065369472, %v5107_v59  ;;  %v1154_v35 = vpack.c.bf16 %v6272_v41, %v6254_v56  ;;  %v1156_v28 = vpack.c.bf16 %v6275_v63, %v6257_v29  ;;  %2561 = vmatpush1.bf16.msra.mxu1 %v4964_v60 }
 0x1f4   :  { %8463 = vst [vmem:[#allocation16_spill] sm:$0xff] %v6275_v63  ;;  %8464 = vst [vmem:[#allocation17_spill] sm:$0xff] %v6281_v42  ;;  %v5111_v33 = vpop.eup %5110  ;;  %5124 = vrcp.f32 %v1375_v40  ;;  %v1336_v34 = vadd.bf16 1065369472, %v5109_v58  ;;  %v939_v38 = vpop.f32.mrb[16].mxu1 }
 0x1f5   :  { %8465 = vst [vmem:[#allocation18_spill] sm:$0xff] %v6284_v62  ;;  %v1012_v59 = vpop.f32.mrb[24].mxu0  ;;  %v5113_v39 = vpop.eup %5112  ;;  %5126 = vrcp.f32 %v1367_v55  ;;  %v1384_v0 = vunpack.c.l.bf16 %v1334_v26  ;;  %v1394_v1 = vunpack.c.h.bf16 %v1334_v26  ;;  %v1335_v18 = vadd.bf16 1065369472, %v5111_v33  ;;  %2634 = vmatpush1.bf16.msra.mxu0 %v4967_v30 }
 0x1f6   :  { %v941_v22 = vpop.f32.mrb[17].mxu1  ;;  %v6293_v43 = vpop.f32.mrb[25].mxu0  ;;  %5128 = vrcp.f32 %v1377_v9  ;;  %v1386_v40 = vunpack.c.l.bf16 %v1336_v34  ;;  %v1396_v44 = vunpack.c.h.bf16 %v1336_v34  ;;  %v1337_v58 = vadd.bf16 1065369472, %v5113_v39  ;;  %v4972_v34 = vld [vmem:[%s8400_s3 + $0x144] ss:$40 sps:$4 sm:$0xff]  }
 0x1f7   :  { %v6295_v5 = vpop.f32.mrb[18].mxu1  ;;  %v6297_v50 = vpop.f32.mrb[26].mxu0  ;;  %5130 = vrcp.f32 %v1384_v0  ;;  %v1385_v32 = vunpack.c.l.bf16 %v1335_v18  ;;  %v1395_v37 = vunpack.c.h.bf16 %v1335_v18  ;;  %v6299_v63 = vsub.bf16 0, %v1154_v35  ;;  %v4975_v39 = vld [vmem:[%s8400_s3 + $0x14c] ss:$40 sps:$4 sm:$0xff]   ;;  %2562 = vmatprep.subr.bf16.mxu1 %v4972_v34 }
 0x1f8   :  { %v6301_v55 = vpop.f32.mrb[19].mxu1  ;;  %v6303_v26 = vpop.f32.mrb[27].mxu0  ;;  %5132 = vrcp.f32 %v1394_v1  ;;  %v1387_v60 = vunpack.c.l.bf16 %v1337_v58  ;;  %v1397_v9 = vunpack.c.h.bf16 %v1337_v58  ;;  %v6305_v33 = vsub.bf16 0, %v1156_v28  ;;  %v4970_v28 = vld [vmem:[%s8400_s3 + $0x140] ss:$40 sps:$4 sm:$0xff]   ;;  %2635 = vmatprep.subr.bf16.mxu0 %v4975_v39 }
 0x1f9   :  { %v5115_v35 = vpop.eup %5114  ;;  %5134 = vrcp.f32 %v1386_v40  ;;  %v1155_v30 = vpack.c.bf16 %v6281_v42, %v6260_v2  ;;  %v1157_v1 = vpack.c.bf16 %v6284_v62, %v6269_v24  ;;  %v4973_v18 = vld [vmem:[%s8400_s3 + $0x148] ss:$40 sps:$4 sm:$0xff]   ;;  %v6327_v0 = vadd.f32 %v939_v38, %v6149_v57  ;;  %2563 = vmatpush1.bf16.msra.mxu1 %v4970_v28  ;;  %v4981_v39 = vld [vmem:[%s8400_s3 + $0x19c] ss:$40 sps:$4 sm:$0xff]  }
 0x1fa   :  { %v5117_v58 = vpop.eup %5116  ;;  %v1524_v29 = vmul.f32 %v5115_v35, %v6071_v45  ;;  %5136 = vrcp.f32 %v1396_v44  ;;  %v1301_v40 = vmul.bf16 1069105081, %v6305_v33  ;;  %2636 = vmatpush1.bf16.msra.mxu0 %v4973_v18  ;;  %v6336_v44 = vadd.f32 %v1012_v59, %v6158_v3 }
 0x1fb   :  { %v5119_v62 = vpop.eup %5118  ;;  %v1534_v24 = vmul.f32 %v5117_v58, %v6077_v47  ;;  %5138 = vrcp.f32 %v1385_v32  ;;  %v6330_v42 = vsub.bf16 0, %v1155_v30  ;;  %v6332_v2 = vsub.bf16 0, %v1157_v1  ;;  %v4978_v32 = vld [vmem:[%s8400_s3 + $0x194] ss:$40 sps:$4 sm:$0xff]   ;;  %v4976_v30 = vld [vmem:[%s8400_s3 + $0x190] ss:$40 sps:$4 sm:$0xff]   ;;  %2637 = vmatprep.subr.bf16.mxu0 %v4981_v39 }
 0x1fc   :  { %v5121_v41 = vpop.eup %5120  ;;  %v1526_v45 = vmul.f32 %v5119_v62, %v6074_v46  ;;  %5140 = vrcp.f32 %v1395_v37  ;;  %v6339_v38 = vadd.f32 %v941_v22, %v6203_v49  ;;  %v6341_v34 = vpop.f32.mrb[20].mxu1  ;;  %2564 = vmatprep.subr.bf16.mxu1 %v4978_v32  ;;  %v8468_v39 = vmul.bf16 1069105081, %v6224_v8 }
 0x1fd   :  { %v6343_v47 = vpop.f32.mrb[28].mxu0  ;;  %v5123_v46 = vpop.eup %5122  ;;  %v1604_v62 = vadd.f32 %v1534_v24, %v1524_v29  ;;  %v1536_v59 = vmul.f32 %v5121_v41, %v6080_v48  ;;  %5142 = vrcp.f32 %v1387_v60  ;;  %v1298_v22 = vmul.bf16 1069105081, %v6330_v42  ;;  %v4979_v24 = vld [vmem:[%s8400_s3 + $0x198] ss:$40 sps:$4 sm:$0xff]   ;;  %2565 = vmatpush1.bf16.msra.mxu1 %v4976_v30 }
 0x1fe   :  { %v6353_v37 = vpop.f32.mrb[21].mxu1  ;;  %v6355_v35 = vpop.f32.mrb[29].mxu0  ;;  %v1525_v28 = vmul.f32 %v5123_v46, %v6083_v51  ;;  %5144 = vrcp.f32 %v1397_v9  ;;  %v6364_v29 = vadd.f32 %v6293_v43, %v6220_v61  ;;  %v8467_v9 = vmul.bf16 1069105081, %v6222_v4  ;;  %2638 = vmatpush1.bf16.msra.mxu0 %v4979_v24  ;;  %v4982_v30 = vld [vmem:[%s8400_s3 + $0x1e0] ss:$40 sps:$4 sm:$0xff]  }
 0x1ff   :  { %v5125_v1 = vpop.eup %5124  ;;  %v6366_v48 = vpop.f32.mrb[22].mxu1  ;;  %v1630_v60 = vadd.f32 %v1536_v59, %v1526_v45  ;;  %v6378_v43 = vadd.f32 %v6295_v5, %v6149_v57  ;;  %v6393_v4 = vadd.f32 %v6301_v55, %v6203_v49  ;;  %v4984_v5 = vld [vmem:[%s8400_s3 + $0x1e4] ss:$40 sps:$4 sm:$0xff]  }
 0x200   :  { %8466 = vst [vmem:[#allocation19_spill] sm:$0xff] %v6364_v29  ;;  %v6368_v42 = vpop.f32.mrb[30].mxu0  ;;  %v5127_v41 = vpop.eup %5126  ;;  %v1535_v51 = vmul.f32 %v5125_v1, %v6089_v53  ;;  %5146 = vpow.bf16 %v8467_v9  ;;  %v6389_v53 = vadd.f32 %v6297_v50, %v6158_v3  ;;  %v8470_v50 = vmul.bf16 1069105081, %v6232_v23  ;;  %v4985_v1 = vld [vmem:[%s8400_s3 + $0x1e8] ss:$40 sps:$4 sm:$0xff]   ;;  %2566 = vmatprep.subr.bf16.mxu1 %v4984_v5 }
 0x201   :  { %v6380_v58 = vpop.f32.mrb[23].mxu1  ;;  %v6382_v46 = vpop.f32.mrb[31].mxu0  ;;  %v1527_v18 = vmul.f32 %v5127_v41, %v6086_v52  ;;  %5148 = vpow.bf16 %v8468_v39  ;;  %8469 = vst [vmem:[#allocation20_spill] sm:$0xff] %v6393_v4  ;;  %v4987_v52 = vld [vmem:[%s8400_s3 + $0x1ec] ss:$40 sps:$4 sm:$0xff]   ;;  %v1128_v55 = vpack.c.bf16 %v6378_v43, %v6327_v0  ;;  %v1129_v23 = vpack.c.bf16 %v6393_v4, %v6339_v38  ;;  %2567 = vmatpush1.bf16.msra.mxu1 %v4982_v30 }
 0x202   :  { %v5129_v32 = vpop.eup %5128  ;;  %v1617_v8 = vadd.f32 %v1535_v51, %v1525_v28  ;;  %5150 = vpow.bf16 %v8470_v50  ;;  %v8471_v28 = vmul.bf16 1069105081, %v6234_v31  ;;  %2639 = vmatprep.subr.bf16.mxu0 %v4987_v52  ;;  %v8472_v39 = vmul.bf16 1069105081, %v6299_v63 }
 0x203   :  { %v5131_v45 = vpop.eup %5130  ;;  %v1537_v59 = vmul.f32 %v5129_v32, %v6092_v54  ;;  %v1130_v54 = vpack.c.bf16 %v6389_v53, %v6336_v44  ;;  %v1168_v50 = vsub.bf16 0, %v1128_v55  ;;  %2640 = vmatpush1.bf16.msra.mxu0 %v4985_v1  ;;  %v1169_v52 = vsub.bf16 0, %v1129_v23 }
 0x204   :  { %v5133_v24 = vpop.eup %5132  ;;  %v1544_v41 = vmul.f32 %v5131_v45, %v6106_v10  ;;  %5152 = vpow.bf16 %v8471_v28  ;;  %v6425_v4 = vpop.f32.mrb[24].mxu1  ;;  %v8473_v1 = vmul.bf16 1069105081, %v6332_v2 }
 0x205   :  { %v5135_v51 = vpop.eup %5134  ;;  %v1643_v9 = vadd.f32 %v1537_v59, %v1527_v18  ;;  %v1554_v32 = vmul.f32 %v5133_v24, %v6115_v15  ;;  %5154 = vpow.bf16 %v8472_v39  ;;  %v1170_v28 = vsub.bf16 0, %v1130_v54  ;;  %v6427_v5 = vpop.f32.mrb[32].mxu0  ;;  %v4990_v15 = vld [vmem:[%s8400_s3 + $0x234] ss:$40 sps:$4 sm:$0xff]  }
 0x206   :  { %v5137_v10 = vpop.eup %5136  ;;  %v1605_v31 = vadd.f32 %v1604_v62, %v1544_v41  ;;  %v1546_v45 = vmul.f32 %v5135_v51, %v6109_v11  ;;  %5156 = vpow.bf16 %v1301_v40  ;;  %v1217_v62 = vmul.bf16 1069105081, %v1168_v50  ;;  %v6433_v11 = vpop.f32.mrb[25].mxu1  ;;  %2568 = vmatprep.subr.bf16.mxu1 %v4990_v15 }
 0x207   :  { %v5139_v63 = vpop.eup %5138  ;;  %v1556_v18 = vmul.f32 %v5137_v10, %v6118_v16  ;;  %5158 = vpow.bf16 %v1298_v22  ;;  %v6435_v33 = vpop.f32.mrb[33].mxu0  ;;  %v4988_v16 = vld [vmem:[%s8400_s3 + $0x230] ss:$40 sps:$4 sm:$0xff]   ;;  %v1220_v2 = vmul.bf16 1069105081, %v1169_v52 }
 0x208   :  { %v5141_v40 = vpop.eup %5140  ;;  %v6437_v59 = vadd.f32 %v1605_v31, %v1554_v32  ;;  %v1631_v55 = vadd.f32 %v1630_v60, %v1546_v45  ;;  %v1545_v30 = vmul.f32 %v5139_v63, %v6112_v14  ;;  %5160 = vpow.bf16 %v8473_v1  ;;  %v6442_v24 = vpop.f32.mrb[26].mxu1  ;;  %v4991_v22 = vld [vmem:[%s8400_s3 + $0x238] ss:$40 sps:$4 sm:$0xff]   ;;  %2569 = vmatpush1.bf16.msra.mxu1 %v4988_v16  ;;  %v4996_v45 = vld [vmem:[%s8400_s3 + $0x14] ss:$40 sps:$4 sm:$0xff]  }
 0x209   :  { %v6444_v41 = vpop.f32.mrb[34].mxu0  ;;  %v5143_v54 = vpop.eup %5142  ;;  %v1555_v60 = vmul.f32 %v5141_v40, %v6124_v20  ;;  %5162 = vpow.bf16 %v1217_v62  ;;  %v1223_v14 = vmul.bf16 1069105081, %v1170_v28  ;;  %v6462_v31 = vadd.f32 %v6303_v26, %v6220_v61  ;;  %v4993_v20 = vld [vmem:[%s8400_s3 + $0x23c] ss:$40 sps:$4 sm:$0xff]   ;;  %2700 = vmatprep.subr.bf16.mxu1 %v4996_v45 }
 0x20a   :  { %v6453_v23 = vpop.f32.mrb[27].mxu1  ;;  %v6455_v51 = vpop.f32.mrb[35].mxu0  ;;  %v6457_v39 = vadd.f32 %v1631_v55, %v1556_v18  ;;  %v1618_v50 = vadd.f32 %v1617_v8, %v1545_v30  ;;  %v1547_v10 = vmul.f32 %v5143_v54, %v6121_v19  ;;  %v4999_v28 = vld [vmem:[%s8400_s3 + $0x1c] ss:$40 sps:$4 sm:$0xff]   ;;  %v6476_v19 = vadd.f32 %v6341_v34, %v6149_v57  ;;  %2641 = vmatprep.subr.bf16.mxu0 %v4993_v20 }
 0x20b   :  { %v5145_v32 = vpop.eup %5144  ;;  %8474 = vst [vmem:[#allocation21_spill] sm:$0xff] %v6462_v31  ;;  %5164 = vpow.bf16 %v1223_v14  ;;  %v6480_v26 = vadd.f32 %v6343_v47, %v6158_v3  ;;  %v1131_v62 = vpack.c.bf16 %v6462_v31, %v6364_v29  ;;  %v6488_v34 = vadd.f32 %v6353_v37, %v6203_v49  ;;  %2642 = vmatpush1.bf16.msra.mxu0 %v4991_v22 }
 0x20c   :  { %v1557_v8 = vmul.f32 %v5145_v32, %v6127_v21  ;;  %8475 = vst [vmem:[#allocation22_spill] sm:$0xff] %v6476_v19  ;;  %v5147_v15 = vpop.eup %5146  ;;  %v6482_v63 = vadd.f32 %v1618_v50, %v1555_v60  ;;  %v1644_v18 = vadd.f32 %v1643_v9, %v1547_v10  ;;  %5166 = vpow.bf16 %v1220_v2  ;;  %v6506_v37 = vpop.f32.mrb[28].mxu1  ;;  %2773 = vmatprep.subr.bf16.mxu0 %v4999_v28 }
 0x20d   :  { %v5149_v21 = vpop.eup %5148  ;;  %v1344_v52 = vadd.bf16 1065369472, %v5147_v15  ;;  %v6492_v47 = vadd.f32 %v6355_v35, %v6220_v61  ;;  %v6496_v40 = vadd.f32 %v6366_v48, %v6149_v57  ;;  %v6500_v1 = vsub.bf16 0, %v1131_v62  ;;  %v6508_v54 = vpop.f32.mrb[36].mxu0 }
 0x20e   :  { %v5151_v9 = vpop.eup %5150  ;;  %v6498_v55 = vadd.f32 %v1644_v18, %v1557_v8  ;;  %v1346_v30 = vadd.bf16 1065369472, %v5149_v21  ;;  %v6504_v16 = vadd.f32 %v6368_v42, %v6158_v3  ;;  %8477 = vst [vmem:[#allocation24_spill] sm:$0xff] %v6508_v54  ;;  %v6512_v2 = vpop.f32.mrb[29].mxu1 }
 0x20f   :  { %8476 = vst [vmem:[#allocation23_spill] sm:$0xff] %v6496_v40  ;;  %v5153_v35 = vpop.eup %5152  ;;  %v1404_v60 = vunpack.c.l.bf16 %v1344_v52  ;;  %v1414_v48 = vunpack.c.h.bf16 %v1344_v52  ;;  %v1345_v14 = vadd.bf16 1065369472, %v5151_v9  ;;  %v1138_v22 = vpack.c.bf16 %v6496_v40, %v6476_v19  ;;  %8478 = vst [vmem:[#allocation25_spill] sm:$0xff] %v6512_v2  ;;  %v6514_v32 = vpop.f32.mrb[37].mxu0 }
 0x210   :  { %8479 = vst [vmem:[#allocation26_spill] sm:$0xff] %v6514_v32  ;;  %v5155_v50 = vpop.eup %5154  ;;  %v1406_v10 = vunpack.c.l.bf16 %v1346_v30  ;;  %v1416_v42 = vunpack.c.h.bf16 %v1346_v30  ;;  %v1347_v20 = vadd.bf16 1065369472, %v5153_v35  ;;  %v6517_v8 = vpop.f32.mrb[30].mxu1 }
 0x211   :  { %8480 = vst [vmem:[#allocation27_spill] sm:$0xff] %v6517_v8  ;;  %v6519_v28 = vpop.f32.mrb[38].mxu0  ;;  %v5157_v15 = vpop.eup %5156  ;;  %5168 = vrcp.f32 %v1404_v60  ;;  %v1405_v18 = vunpack.c.l.bf16 %v1345_v14  ;;  %v1415_v62 = vunpack.c.h.bf16 %v1345_v14  ;;  %v1354_v21 = vadd.bf16 1065369472, %v5155_v50 }
 0x212   :  { %8481 = vst [vmem:[#allocation28_spill] sm:$0xff] %v6519_v28  ;;  %v6521_v52 = vpop.f32.mrb[31].mxu1  ;;  %v6523_v9 = vpop.f32.mrb[39].mxu0  ;;  %5170 = vrcp.f32 %v1414_v48  ;;  %v1407_v19 = vunpack.c.l.bf16 %v1347_v20  ;;  %v1417_v30 = vunpack.c.h.bf16 %v1347_v20  ;;  %v1356_v35 = vadd.bf16 1065369472, %v5157_v15 }
 0x213   :  { %8482 = vst [vmem:[#allocation29_spill] sm:$0xff] %v6521_v52  ;;  %8483 = vst [vmem:[#allocation30_spill] sm:$0xff] %v6523_v9  ;;  %v5159_v40 = vpop.eup %5158  ;;  %5172 = vrcp.f32 %v1406_v10  ;;  %v1424_v45 = vunpack.c.l.bf16 %v1354_v21  ;;  %v1434_v32 = vunpack.c.h.bf16 %v1354_v21  ;;  %v6525_v20 = vsub.bf16 0, %v1138_v22 }
 0x214   :  { %v5161_v31 = vpop.eup %5160  ;;  %v1355_v29 = vadd.bf16 1065369472, %v5159_v40  ;;  %5174 = vrcp.f32 %v1416_v42  ;;  %v1426_v60 = vunpack.c.l.bf16 %v1356_v35  ;;  %v1436_v8 = vunpack.c.h.bf16 %v1356_v35  ;;  %v6527_v15 = vpop.f32.mrb[32].mxu1 }
 0x215   :  { %v5163_v28 = vpop.eup %5162  ;;  %v1357_v14 = vadd.bf16 1065369472, %v5161_v31  ;;  %5176 = vrcp.f32 %v1405_v18  ;;  %v6529_v10 = vpop.f32.mrb[40].mxu0  ;;  %v1140_v22 = vpack.c.bf16 %v6504_v16, %v6480_v26 }
 0x216   :  { %v1425_v50 = vunpack.c.l.bf16 %v1355_v29  ;;  %v1435_v52 = vunpack.c.h.bf16 %v1355_v29  ;;  %v1328_v2 = vadd.bf16 1065369472, %v5163_v28  ;;  %v5165_v9 = vpop.eup %5164  ;;  %5178 = vrcp.f32 %v1415_v62  ;;  %8484 = vst [vmem:[#allocation31_spill] sm:$0xff] %v6529_v10  ;;  %v6533_v18 = vpop.f32.mrb[33].mxu1 }
 0x217   :  { %v1427_v48 = vunpack.c.l.bf16 %v1357_v14  ;;  %v1437_v54 = vunpack.c.h.bf16 %v1357_v14  ;;  %v5167_v40 = vpop.eup %5166  ;;  %5180 = vrcp.f32 %v1407_v19  ;;  %v1330_v31 = vadd.bf16 1065369472, %v5165_v9  ;;  %8485 = vst [vmem:[#allocation32_spill] sm:$0xff] %v6533_v18  ;;  %v6535_v29 = vpop.f32.mrb[41].mxu0 }
 0x218   :  { %v1368_v42 = vunpack.c.l.bf16 %v1328_v2  ;;  %v6531_v21 = vunpack.c.h.bf16 %v1328_v2  ;;  %8486 = vst [vmem:[#allocation33_spill] sm:$0xff] %v6535_v29  ;;  %5182 = vrcp.f32 %v1417_v30  ;;  %v1329_v28 = vadd.bf16 1065369472, %v5167_v40  ;;  %v6540_v35 = vpop.f32.mrb[34].mxu1  ;;  %v6542_v14 = vpop.f32.mrb[42].mxu0 }
 0x219   :  { %8487 = vst [vmem:[#allocation34_spill] sm:$0xff] %v6540_v35  ;;  %8488 = vst [vmem:[#allocation35_spill] sm:$0xff] %v6542_v14  ;;  %5184 = vrcp.f32 %v1424_v45  ;;  %v1370_v19 = vunpack.c.l.bf16 %v1330_v31  ;;  %v6544_v2 = vunpack.c.h.bf16 %v1330_v31  ;;  %v6548_v9 = vadd.f32 %v6380_v58, %v6203_v49  ;;  %v6550_v29 = vpop.f32.mrb[35].mxu1  ;;  %v6552_v30 = vpop.f32.mrb[43].mxu0 }
 0x21a   :  { %8489 = vst [vmem:[#allocation36_spill] sm:$0xff] %v6550_v29  ;;  %8490 = vst [vmem:[#allocation37_spill] sm:$0xff] %v6552_v30  ;;  %5186 = vrcp.f32 %v1434_v32  ;;  %v6554_v40 = vunpack.c.l.bf16 %v1329_v28  ;;  %v6556_v62 = vunpack.c.h.bf16 %v1329_v28  ;;  %v6558_v35 = vsub.bf16 0, %v1140_v22 }
 0x21b   :  { %v5169_v14 = vpop.eup %5168  ;;  %5188 = vrcp.f32 %v1426_v60  ;;  %v1139_v45 = vpack.c.bf16 %v6548_v9, %v6488_v34  ;;  %v6564_v58 = vadd.f32 %v6382_v46, %v6220_v61  ;;  %v6568_v31 = vadd.f32 %v6425_v4, %v6149_v57 }
 0x21c   :  { %v5171_v32 = vpop.eup %5170  ;;  %v1564_v30 = vmul.f32 %v5169_v14, %v6161_v6  ;;  %5190 = vrcp.f32 %v1436_v8  ;;  %v6574_v60 = vadd.f32 %v6427_v5, %v6158_v3  ;;  %v6585_v8 = vadd.f32 %v6433_v11, %v6203_v49  ;;  %v6587_v5 = vpop.f32.mrb[36].mxu1 }
 0x21d   :  { %v5173_v22 = vpop.eup %5172  ;;  %v1574_v29 = vmul.f32 %v5171_v32, %v6170_v13  ;;  %5192 = vrcp.f32 %v1425_v50  ;;  %v6577_v46 = vsub.bf16 0, %v1139_v45  ;;  %v1141_v4 = vpack.c.bf16 %v6564_v58, %v6492_v47  ;;  %8491 = vst [vmem:[#allocation38_spill] sm:$0xff] %v6587_v5  ;;  %v6589_v14 = vpop.f32.mrb[44].mxu0 }
 0x21e   :  { %v5175_v18 = vpop.eup %5174  ;;  %v1607_v10 = vadd.f32 %v6437_v59, %v1564_v30  ;;  %v1566_v6 = vmul.f32 %v5173_v22, %v6164_v7  ;;  %5194 = vrcp.f32 %v1435_v52  ;;  %v6595_v59 = vpop.f32.mrb[37].mxu1 }
 0x21f   :  { %v5177_v13 = vpop.eup %5176  ;;  %v1576_v50 = vmul.f32 %v5175_v18, %v6173_v17  ;;  %5196 = vrcp.f32 %v1427_v48  ;;  %v1250_v45 = vmul.bf16 1069105081, %v6577_v46  ;;  %v6593_v32 = vsub.bf16 0, %v1141_v4  ;;  %v6597_v7 = vpop.f32.mrb[45].mxu0 }
 0x220   :  { %v5179_v52 = vpop.eup %5178  ;;  %v1608_v30 = vadd.f32 %v1607_v10, %v1574_v29  ;;  %v1633_v11 = vadd.f32 %v6457_v39, %v1566_v6  ;;  %v1565_v22 = vmul.f32 %v5177_v13, %v6167_v12  ;;  %5198 = vrcp.f32 %v1437_v54  ;;  %v6601_v28 = vpop.f32.mrb[38].mxu1 }
 0x221   :  { %v6603_v5 = vpop.f32.mrb[46].mxu0  ;;  %v5181_v17 = vpop.eup %5180  ;;  %v1575_v48 = vmul.f32 %v5179_v52, %v6185_v27  ;;  %5200 = vrcp.f32 %v1368_v42  ;;  %v6609_v4 = vadd.f32 %v6435_v33, %v6220_v61  ;;  %v6621_v33 = vadd.f32 %v6442_v24, %v6149_v57 }
 0x222   :  { %v6611_v10 = vpop.f32.mrb[39].mxu1  ;;  %v6613_v39 = vpop.f32.mrb[47].mxu0  ;;  %v1634_v54 = vadd.f32 %v1633_v11, %v1576_v50  ;;  %v1620_v29 = vadd.f32 %v6482_v63, %v1565_v22  ;;  %v1567_v6 = vmul.f32 %v5181_v17, %v6182_v25  ;;  %5202 = vrcp.f32 %v6531_v21  ;;  %v8492_v11 = vld [vmem:[#allocation15_spill] sm:$0xff] }
 0x223   :  { %v5183_v12 = vpop.eup %5182  ;;  %5204 = vrcp.f32 %v1370_v19  ;;  %v6625_v13 = vadd.f32 %v6444_v41, %v6158_v3  ;;  %v1148_v24 = vpack.c.bf16 %v6621_v33, %v6568_v31  ;;  %v8503_v46 = vmul.bf16 1069105081, %v6593_v32 }
 0x224   :  { %v5185_v27 = vpop.eup %5184  ;;  %v1577_v42 = vmul.f32 %v5183_v12, %v6188_v36  ;;  %v1621_v50 = vadd.f32 %v1620_v29, %v1575_v48  ;;  %v1646_v63 = vadd.f32 %v6498_v55, %v1567_v6  ;;  %5206 = vrcp.f32 %v6544_v2  ;;  %v8493_v48 = vld [vmem:[#allocation12_spill] sm:$0xff] }
 0x225   :  { %v5187_v52 = vpop.eup %5186  ;;  %v1584_v25 = vmul.f32 %v5185_v27, %v6254_v56  ;;  %5208 = vrcp.f32 %v6554_v40  ;;  %v1150_v41 = vpack.c.bf16 %v6625_v13, %v6574_v60  ;;  %v6638_v56 = vpop.f32.mrb[40].mxu1  ;;  %v8494_v12 = vld [vmem:[#allocation16_spill] sm:$0xff]  ;;  %v8495_v40 = vmul.bf16 1069105081, %v6500_v1 }
 0x226   :  { %v5189_v21 = vpop.eup %5188  ;;  %v1594_v36 = vmul.f32 %v5187_v52, %v8492_v11  ;;  %v1647_v22 = vadd.f32 %v1646_v63, %v1577_v42  ;;  %5210 = vrcp.f32 %v6556_v62  ;;  %v1188_v6 = vsub.bf16 0, %v1148_v24  ;;  %v6643_v52 = vpop.f32.mrb[41].mxu1 }
 0x227   :  { %v5191_v19 = vpop.eup %5190  ;;  %v1609_v17 = vadd.f32 %v1608_v30, %v1584_v25  ;;  %v1586_v55 = vmul.f32 %v5189_v21, %v8493_v48  ;;  %5212 = vpow.bf16 %v8495_v40  ;;  %v1190_v27 = vsub.bf16 0, %v1150_v41  ;;  %8496 = vst [vmem:[#allocation15_spill] sm:$0xff] %v6643_v52  ;;  %v8497_v30 = vld [vmem:[#allocation13_spill] sm:$0xff]  ;;  %v6648_v62 = vpop.f32.mrb[42].mxu1 }
 0x228   :  { %v5193_v2 = vpop.eup %5192  ;;  %v1596_v29 = vmul.f32 %v5191_v19, %v8494_v12  ;;  %v8498_v25 = vmul.bf16 1069105081, %v6525_v20  ;;  %v8499_v48 = vld [vmem:[#allocation17_spill] sm:$0xff]  ;;  %v8500_v1 = vmul.bf16 1069105081, %v6558_v35  ;;  %v6653_v12 = vpop.f32.mrb[43].mxu1  ;;  %v6661_v35 = vadd.f32 %v6453_v23, %v6203_v49 }
 0x229   :  { %v5195_v11 = vpop.eup %5194  ;;  %v1610_v18 = vadd.f32 %v1609_v17, %v1594_v36  ;;  %v1635_v42 = vadd.f32 %v1634_v54, %v1586_v55  ;;  %v1585_v63 = vmul.f32 %v5193_v2, %v8497_v30  ;;  %v1277_v24 = vmul.bf16 1069105081, %v1188_v6  ;;  %v8501_v55 = vld [vmem:[#allocation14_spill] sm:$0xff] }
 0x22a   :  { %5214 = vpow.bf16 %v8498_v25  ;;  %v5197_v21 = vpop.eup %5196  ;;  %v1595_v19 = vmul.f32 %v5195_v11, %v8499_v48  ;;  %v1283_v41 = vmul.bf16 1069105081, %v1190_v27  ;;  %v8502_v30 = vld [vmem:[#allocation18_spill] sm:$0xff]  ;;  %v6665_v6 = vadd.f32 %v6455_v51, %v6220_v61 }
 0x22b   :  { %5216 = vpow.bf16 %v8500_v1  ;;  %v5199_v40 = vpop.eup %5198  ;;  %v1611_v36 = vrot.slane %v1610_v18, 4  ;;  %v1636_v54 = vadd.f32 %v1635_v42, %v1596_v29  ;;  %v1622_v17 = vadd.f32 %v1621_v50, %v1585_v63 }
 0x22c   :  { %v1587_v2 = vmul.f32 %v5197_v21, %v8501_v55  ;;  %v5201_v20 = vpop.eup %5200  ;;  %v1597_v25 = vmul.f32 %v5199_v40, %v8502_v30  ;;  %5218 = vpow.bf16 %v1250_v45  ;;  %v1149_v23 = vpack.c.bf16 %v6661_v35, %v6585_v8 }
 0x22d   :  { %v5203_v27 = vpop.eup %5202  ;;  %v1612_v11 = vadd.f32 %v1611_v36, %v1610_v18  ;;  %v1637_v29 = vrot.slane %v1636_v54, 4  ;;  %v1623_v50 = vadd.f32 %v1622_v17, %v1595_v19  ;;  %v1528_v21 = vmul.f32 %v5201_v20, %v6327_v0  ;;  %v6673_v18 = vpop.f32.mrb[44].mxu1 }
 0x22e   :  { %v1648_v42 = vadd.f32 %v1647_v22, %v1587_v2  ;;  %v5205_v63 = vpop.eup %5204  ;;  %v1538_v48 = vmul.f32 %v5203_v27, %v6378_v43  ;;  %5220 = vpow.bf16 %v8503_v46  ;;  %8504 = vst [vmem:[#allocation12_spill] sm:$0xff] %v6673_v18  ;;  %v6679_v32 = vpop.f32.mrb[45].mxu1 }
 0x22f   :  { %v5207_v45 = vpop.eup %5206  ;;  %v1613_v1 = vrot.slane %v1612_v11, 2  ;;  %v1638_v51 = vadd.f32 %v1637_v29, %v1636_v54  ;;  %v1624_v40 = vrot.slane %v1623_v50, 4  ;;  %v1530_v0 = vmul.f32 %v5205_v63, %v6336_v44  ;;  %8505 = vst [vmem:[#allocation16_spill] sm:$0xff] %v6679_v32  ;;  %v6681_v54 = vpop.f32.mrb[46].mxu1  ;;  %v8507_v29 = vld [vmem:[#allocation20_spill] sm:$0xff] }
 0x230   :  { %v1649_v55 = vadd.f32 %v1648_v42, %v1597_v25  ;;  %v5209_v19 = vpop.eup %5208  ;;  %v6675_v22 = vadd.f32 %v1538_v48, %v1528_v21  ;;  %v1540_v43 = vmul.f32 %v5207_v45, %v6389_v53  ;;  %5222 = vpow.bf16 %v1277_v24  ;;  %8506 = vst [vmem:[#allocation13_spill] sm:$0xff] %v6681_v54  ;;  %v6687_v44 = vpop.f32.mrb[47].mxu1 }
 0x231   :  { %v5211_v36 = vpop.eup %5210  ;;  %v1614_v17 = vadd.f32 %v1613_v1, %v1612_v11  ;;  %v1639_v2 = vrot.slane %v1638_v51, 2  ;;  %v1625_v20 = vadd.f32 %v1624_v40, %v1623_v50  ;;  %v1529_v27 = vmul.f32 %v5209_v19, %v6339_v38  ;;  %8508 = vst [vmem:[#allocation17_spill] sm:$0xff] %v6687_v44  ;;  %v8509_v1 = vld [vmem:[#allocation8_spill] sm:$0xff]  ;;  %v8510_v40 = vld [vmem:[#allocation9_spill] sm:$0xff] }
 0x232   :  { %v1650_v30 = vrot.slane %v1649_v55, 4  ;;  %v6683_v25 = vadd.f32 %v1540_v43, %v1530_v0  ;;  %v1539_v42 = vmul.f32 %v5211_v36, %v8507_v29  ;;  %5224 = vpow.bf16 %v1283_v41  ;;  %v5213_v53 = vpop.eup %5212 }
 0x233   :  { %v1615_v24 = vrot.slane %v1614_v17, 1  ;;  %v1640_v63 = vadd.f32 %v1639_v2, %v1638_v51  ;;  %v1626_v21 = vrot.slane %v1625_v20, 2  ;;  %v1331_v50 = vadd.bf16 1065369472, %v5213_v53 }
 0x234   :  { %v1651_v48 = vadd.f32 %v1650_v30, %v1649_v55  ;;  %v6689_v46 = vadd.f32 %v1539_v42, %v1529_v27  ;;  %v1151_v45 = vpack.c.bf16 %v6665_v6, %v6609_v4  ;;  %v6695_v38 = vrot.slane %v8510_v40, %v8509_v1 }
 0x235   :  { %v5215_v11 = vpop.eup %5214  ;;  %v1641_v41 = vrot.slane %v1640_v63, 1  ;;  %v1627_v0 = vadd.f32 %v1626_v21, %v1625_v20  ;;  %v6697_v36 = vsub.bf16 0, %v1149_v23  ;;  %v1371_v51 = vunpack.c.l.bf16 %v1331_v50 }
 0x236   :  { %v5217_v19 = vpop.eup %5216  ;;  %v1652_v43 = vrot.slane %v1651_v48, 2  ;;  %v1381_v2 = vunpack.c.h.bf16 %v1331_v50  ;;  %v1338_v55 = vadd.bf16 1065369472, %v5215_v11  ;;  %v1616_v29 = vadd.f32 %v1615_v24, %v1614_v17 }
 0x237   :  { %v1340_v30 = vadd.bf16 1065369472, %v5217_v19  ;;  %v5219_v27 = vpop.eup %5218  ;;  %v1642_v42 = vadd.f32 %v1641_v41, %v1640_v63  ;;  %v1628_v53 = vrot.slane %v1627_v0, 1  ;;  %5226 = vrcp.f32 %v1371_v51  ;;  %v8511_v51 = vld [vmem:[#allocation10_spill] sm:$0xff] }
 0x238   :  { %v1653_v44 = vadd.f32 %v1652_v43, %v1651_v48  ;;  %v1388_v32 = vunpack.c.l.bf16 %v1338_v55  ;;  %v1398_v54 = vunpack.c.h.bf16 %v1338_v55  ;;  %5228 = vrcp.f32 %v1381_v2 }
 0x239   :  { %v1390_v40 = vunpack.c.l.bf16 %v1340_v30  ;;  %v5221_v1 = vpop.eup %5220  ;;  %v1629_v18 = vadd.f32 %v1628_v53, %v1627_v0  ;;  %v1400_v20 = vunpack.c.h.bf16 %v1340_v30  ;;  %v1339_v23 = vadd.bf16 1065369472, %v5219_v27 }
 0x23a   :  { %v1654_v52 = vrot.slane %v1653_v44, 1  ;;  %5230 = vrcp.f32 %v1388_v32  ;;  %v1341_v21 = vadd.bf16 1065369472, %v5221_v1  ;;  %v1280_v11 = vmul.bf16 1069105081, %v6697_v36 }
 0x23b   :  { %v5223_v50 = vpop.eup %5222  ;;  %v1757_v19 = vcombine.low %v1616_v29, %v1629_v18  ;;  %5232 = vrcp.f32 %v1398_v54  ;;  %v1191_v24 = vsub.bf16 0, %v1151_v45  ;;  %v1389_v63 = vunpack.c.l.bf16 %v1339_v23 }
 0x23c   :  { %v1655_v17 = vadd.f32 %v1654_v52, %v1653_v44  ;;  %5234 = vrcp.f32 %v1390_v40  ;;  %v1399_v48 = vunpack.c.h.bf16 %v1339_v23  ;;  %v1391_v41 = vunpack.c.l.bf16 %v1341_v21  ;;  %v8512_v44 = vld [vmem:[#allocation24_spill] sm:$0xff] }
 0x23d   :  { %v5225_v43 = vpop.eup %5224  ;;  %v6701_v0 = vrot.slane %v1757_v19, %v8511_v51  ;;  %5236 = vrcp.f32 %v1400_v20  ;;  %v1401_v32 = vunpack.c.h.bf16 %v1341_v21  ;;  %v1348_v1 = vadd.bf16 1065369472, %v5223_v50  ;;  %v8514_v20 = vld [vmem:[#allocation27_spill] sm:$0xff]  ;;  %v8515_v21 = vld [vmem:[#allocation28_spill] sm:$0xff]  ;;  %v8516_v19 = vld [vmem:[#allocation29_spill] sm:$0xff] }
 0x23e   :  { %v1758_v2 = vcombine.low %v1642_v42, %v1655_v17  ;;  %5238 = vrcp.f32 %v1389_v63  ;;  %v1350_v55 = vadd.bf16 1065369472, %v5225_v43  ;;  %v6705_v18 = vadd.f32 %v6506_v37, %v6149_v57  ;;  %v8513_v37 = vld [vmem:[#allocation25_spill] sm:$0xff]  ;;  %v8517_v63 = vld [vmem:[#allocation19_spill] sm:$0xff] }
 0x23f   :  { %5240 = vrcp.f32 %v1399_v48  ;;  %v1286_v54 = vmul.bf16 1069105081, %v1191_v24  ;;  %v6712_v45 = vadd.f32 %v8512_v44, %v6158_v3  ;;  %v1408_v36 = vunpack.c.l.bf16 %v1348_v1  ;;  %v8520_v44 = vld [vmem:[#allocation22_spill] sm:$0xff] }
 0x240   :  { %v6708_v52 = vrot.slane %v1758_v2, %v8511_v51  ;;  %5242 = vrcp.f32 %v1391_v41  ;;  %v1418_v30 = vunpack.c.h.bf16 %v1348_v1  ;;  %v1410_v27 = vunpack.c.l.bf16 %v1350_v55  ;;  %v8518_v41 = vld [vmem:[#allocation26_spill] sm:$0xff] }
 0x241   :  { %5244 = vrcp.f32 %v1401_v32  ;;  %v1420_v42 = vunpack.c.h.bf16 %v1350_v55  ;;  %v6718_v53 = vadd.f32 %v8513_v37, %v6203_v49  ;;  %v5227_v40 = vpop.eup %5226  ;;  %v6722_v23 = vadd.f32 %v8514_v20, %v6149_v57  ;;  %v8519_v32 = vld [vmem:[#allocation21_spill] sm:$0xff]  ;;  %v8521_v37 = vld [vmem:[#allocation30_spill] sm:$0xff] }
 0x242   :  { %5246 = vrcp.f32 %v1408_v36  ;;  %v6726_v50 = vadd.f32 %v8515_v21, %v6158_v3  ;;  %v6730_v17 = vadd.f32 %v8516_v19, %v6203_v49  ;;  %v5229_v24 = vpop.eup %5228  ;;  %v1531_v48 = vmul.f32 %v5227_v40, %v8517_v63  ;;  %v8522_v21 = vld [vmem:[#allocation23_spill] sm:$0xff] }
 0x243   :  { %5248 = vrcp.f32 %v1418_v30  ;;  %v6735_v43 = vadd.f32 %v8518_v41, %v6220_v61  ;;  %v1541_v57 = vmul.f32 %v5229_v24, %v8519_v32  ;;  %v1158_v3 = vpack.c.bf16 %v6722_v23, %v6705_v18 }
 0x244   :  { %v5231_v2 = vpop.eup %5230  ;;  %5250 = vrcp.f32 %v1410_v27  ;;  %v1160_v1 = vpack.c.bf16 %v6726_v50, %v6712_v45  ;;  %v5640_v49 = vmov 0.0   ;;  %v1159_v30 = vpack.c.bf16 %v6730_v17, %v6718_v53 }
 0x245   :  { %33 = vst [vmem:[#allocation2] sm:$0xff] %v5640_v49  ;;  %34 = vst [vmem:[#allocation2 + $0x8] sm:$0xff] %v5640_v49  ;;  %v5233_v55 = vpop.eup %5232  ;;  %v1548_v36 = vmul.f32 %v5231_v2, %v8520_v44  ;;  %5252 = vrcp.f32 %v1420_v42  ;;  %v6747_v27 = vadd.f32 %v8521_v37, %v6220_v61  ;;  %v1695_v20 = vadd.f32 %v1541_v57, %v1531_v48 }
 0x246   :  { %35 = vst [vmem:[#allocation2 + $0x10] sm:$0xf] %v5640_v49  ;;  %v5235_v40 = vpop.eup %5234  ;;  %v1558_v19 = vmul.f32 %v5233_v55, %v8522_v21  ;;  %5254 = vpow.bf16 %v1280_v11  ;;  %v1198_v24 = vsub.bf16 0, %v1158_v3  ;;  %v1200_v42 = vsub.bf16 0, %v1160_v1  ;;  %v8523_v21 = vld [vmem:[#allocation11_spill] sm:$0xff] }
 0x247   :  { %v5237_v63 = vpop.eup %5236  ;;  %v1657_v41 = vadd.f32 %v6675_v22, %v1548_v36  ;;  %v1550_v32 = vmul.f32 %v5235_v40, %v6480_v26  ;;  %5256 = vpow.bf16 %v1286_v54  ;;  %v1199_v29 = vsub.bf16 0, %v1159_v30 }
 0x248   :  { %v5239_v2 = vpop.eup %5238  ;;  %v1560_v49 = vmul.f32 %v5237_v63, %v6504_v16  ;;  %v1307_v44 = vmul.bf16 1069105081, %v1198_v24  ;;  %v1161_v61 = vpack.c.bf16 %v6747_v27, %v6735_v43  ;;  %v1313_v55 = vmul.bf16 1069105081, %v1200_v42  ;;  %v6761_v16 = vld [vmem:[%s8399_s2] ss:$0 sm:$0xff] }
 0x249   :  { %v5241_v48 = vpop.eup %5240  ;;  %v1658_v57 = vadd.f32 %v1657_v41, %v1558_v19  ;;  %v1683_v11 = vadd.f32 %v6683_v25, %v1550_v32  ;;  %v1549_v3 = vmul.f32 %v5239_v2, %v6488_v34  ;;  %v1310_v54 = vmul.bf16 1069105081, %v1199_v29 }
 0x24a   :  { %v5243_v22 = vpop.eup %5242  ;;  %v1559_v26 = vmul.f32 %v5241_v48, %v6548_v9  ;;  %5258 = vpow.bf16 %v1307_v44  ;;  %v1201_v1 = vsub.bf16 0, %v1161_v61  ;;  %v6768_v29 = vadd.f32 %v6527_v15, %v8523_v21  ;;  %v8526_v15 = vld [vmem:[#allocation33_spill] sm:$0xff] }
 0x24b   :  { %v5245_v36 = vpop.eup %5244  ;;  %v1684_v30 = vadd.f32 %v1683_v11, %v1560_v49  ;;  %v1670_v37 = vadd.f32 %v6689_v46, %v1549_v3  ;;  %v1551_v25 = vmul.f32 %v5243_v22, %v6492_v47  ;;  %5260 = vpow.bf16 %v1313_v55  ;;  %v8524_v46 = vld [vmem:[#allocation31_spill] sm:$0xff]  ;;  %v8527_v3 = vld [vmem:[#allocation34_spill] sm:$0xff] }
 0x24c   :  { %v5247_v34 = vpop.eup %5246  ;;  %v1561_v40 = vmul.f32 %v5245_v36, %v6564_v58  ;;  %5262 = vpow.bf16 %v1310_v54  ;;  %v1316_v9 = vmul.bf16 1069105081, %v1201_v1  ;;  %v6775_v32 = vadd.f32 %v8524_v46, %v6761_v16  ;;  %v8525_v58 = vld [vmem:[#allocation32_spill] sm:$0xff]  ;;  %v8528_v22 = vld [vmem:[#allocation35_spill] sm:$0xff] }
 0x24d   :  { %v5249_v19 = vpop.eup %5248  ;;  %v6770_v24 = vadd.f32 %v1670_v37, %v1559_v26  ;;  %v1696_v63 = vadd.f32 %v1695_v20, %v1551_v25  ;;  %v1568_v41 = vmul.f32 %v5247_v34, %v6568_v31  ;;  %v6780_v2 = vadd.f32 %v8525_v58, %v6695_v38 }
 0x24e   :  { %v5251_v47 = vpop.eup %5250  ;;  %v1578_v42 = vmul.f32 %v5249_v19, %v6621_v33  ;;  %5264 = vpow.bf16 %v1316_v9  ;;  %v6784_v49 = vadd.f32 %v6761_v16, %v8526_v15  ;;  %v4351_v48 = vmul.f32 -1.442695, %v6775_v32 }
 0x24f   :  { %v5253_v44 = vpop.eup %5252  ;;  %v6786_v20 = vadd.f32 %v1696_v63, %v1561_v40  ;;  %v1659_v31 = vadd.f32 %v1658_v57, %v1568_v41  ;;  %v1570_v61 = vmul.f32 %v5251_v47, %v6574_v60  ;;  %v6794_v55 = vadd.f32 %v8527_v3, %v8523_v21  ;;  %v8529_v60 = vld [vmem:[#allocation36_spill] sm:$0xff] }
 0x250   :  { %v1580_v11 = vmul.f32 %v5253_v44, %v6625_v13  ;;  %v4349_v33 = vmul.f32 -1.442695, %v6784_v49  ;;  %v6798_v26 = vadd.f32 %v8528_v22, %v6761_v16  ;;  %5266 = vpow2.f32 %v4351_v48 }
 0x251   :  { %v5255_v54 = vpop.eup %5254  ;;  %v6800_v1 = vadd.f32 %v1659_v31, %v1578_v42  ;;  %v1685_v57 = vadd.f32 %v1684_v30, %v1570_v61  ;;  %v6804_v36 = vadd.f32 %v8529_v60, %v6695_v38  ;;  %v1132_v25 = vpack.c.bf16 %v6794_v55, %v6768_v29  ;;  %v8530_v30 = vld [vmem:[#allocation37_spill] sm:$0xff] }
 0x252   :  { %v5257_v13 = vpop.eup %5256  ;;  %v1349_v37 = vadd.bf16 1065369472, %v5255_v54  ;;  %5268 = vpow2.f32 %v4349_v33  ;;  %v4352_v34 = vmul.f32 -1.442695, %v6798_v26  ;;  %v6815_v63 = vadd.f32 %v6761_v16, %v8530_v30 }
 0x253   :  { %v6809_v40 = vadd.f32 %v1685_v57, %v1580_v11  ;;  %v1351_v9 = vadd.bf16 1065369472, %v5257_v13  ;;  %v1133_v19 = vpack.c.bf16 %v6804_v36, %v6780_v2  ;;  %v6817_v31 = vsub.bf16 0, %v1132_v25 }
 0x254   :  { %v1409_v41 = vunpack.c.l.bf16 %v1349_v37  ;;  %v1419_v46 = vunpack.c.h.bf16 %v1349_v37  ;;  %5270 = vpow2.f32 %v4352_v34  ;;  %v6822_v33 = vmul.f32 -1.442695, %v6815_v63 }
 0x255   :  { %v5259_v47 = vpop.eup %5258  ;;  %v1411_v42 = vunpack.c.l.bf16 %v1351_v9  ;;  %v1421_v58 = vunpack.c.h.bf16 %v1351_v9  ;;  %v6819_v11 = vsub.bf16 0, %v1133_v19  ;;  %v6826_v37 = vadd.f32 %v6589_v14, %v6761_v16  ;;  %v8531_v9 = vld [vmem:[#allocation38_spill] sm:$0xff] }
 0x256   :  { %v5261_v15 = vpop.eup %5260  ;;  %5272 = vrcp.f32 %v1409_v41  ;;  %v1358_v44 = vadd.bf16 1065369472, %v5259_v47  ;;  %v6830_v19 = vadd.f32 %v8531_v9, %v8523_v21  ;;  %v6838_v47 = vadd.f32 %v6601_v28, %v8523_v21 }
 0x257   :  { %v5263_v61 = vpop.eup %5262  ;;  %5274 = vrcp.f32 %v1419_v46  ;;  %v1360_v48 = vadd.bf16 1065369472, %v5261_v15  ;;  %v6834_v46 = vadd.f32 %v6761_v16, %v6597_v7  ;;  %v1232_v15 = vmul.bf16 1069105081, %v6819_v11 }
 0x258   :  { %5276 = vrcp.f32 %v1411_v42  ;;  %v1428_v3 = vunpack.c.l.bf16 %v1358_v44  ;;  %v1438_v22 = vunpack.c.h.bf16 %v1358_v44  ;;  %v1359_v54 = vadd.bf16 1065369472, %v5263_v61 }
 0x259   :  { %v5265_v57 = vpop.eup %5264  ;;  %5278 = vrcp.f32 %v1421_v58  ;;  %v1430_v60 = vunpack.c.l.bf16 %v1360_v48  ;;  %v1440_v13 = vunpack.c.h.bf16 %v1360_v48  ;;  %v1229_v58 = vmul.bf16 1069105081, %v6817_v31 }
 0x25a   :  { %5280 = vrcp.f32 %v1428_v3  ;;  %v1429_v25 = vunpack.c.l.bf16 %v1359_v54  ;;  %v1361_v34 = vadd.bf16 1065369472, %v5265_v57  ;;  %v5267_v30 = vpop.eup %5266  ;;  %v1439_v41 = vunpack.c.h.bf16 %v1359_v54 }
 0x25b   :  { %5282 = vrcp.f32 %v1438_v22  ;;  %v4355_v61 = vmul.f32 -1.442695, %v6826_v37  ;;  %v1142_v48 = vpack.c.bf16 %v6838_v47, %v6830_v19  ;;  %v1986_v3 = vadd.f32 1.0, %v5267_v30 }
 0x25c   :  { %v5269_v14 = vpop.eup %5268  ;;  %5284 = vrcp.f32 %v1430_v60  ;;  %v1431_v42 = vunpack.c.l.bf16 %v1361_v34  ;;  %v1441_v44 = vunpack.c.h.bf16 %v1361_v34  ;;  %v6847_v28 = vadd.f32 %v6595_v59, %v6695_v38 }
 0x25d   :  { %5286 = vrcp.f32 %v1440_v13  ;;  %v6851_v22 = vadd.f32 %v6611_v10, %v6695_v38  ;;  %v1984_v31 = vadd.f32 1.0, %v5269_v14  ;;  %v4353_v11 = vmul.f32 -1.442695, %v6834_v46 }
 0x25e   :  { %v5271_v7 = vpop.eup %5270  ;;  %5288 = vrcp.f32 %v1429_v25  ;;  %v1182_v54 = vsub.bf16 0, %v1142_v48  ;;  %v6856_v60 = vadd.f32 %v6603_v5, %v6761_v16  ;;  %v6862_v59 = vadd.f32 %v6761_v16, %v6613_v39 }
 0x25f   :  { %5290 = vrcp.f32 %v1439_v41  ;;  %v1143_v13 = vpack.c.bf16 %v6851_v22, %v6847_v28  ;;  %v1987_v34 = vadd.f32 1.0, %v5271_v7  ;;  %v6867_v9 = vadd.f32 %v6638_v56, %v8523_v21 }
 0x260   :  { %v5273_v57 = vpop.eup %5272  ;;  %5292 = vrcp.f32 %v1431_v42  ;;  %v1259_v41 = vmul.bf16 1069105081, %v1182_v54  ;;  %v6872_v14 = vadd.f32 %v6648_v62, %v8523_v21  ;;  %v6878_v42 = vadd.f32 %v6653_v12, %v6695_v38 }
 0x261   :  { %v5275_v10 = vpop.eup %5274  ;;  %v1569_v25 = vmul.f32 %v5273_v57, %v6585_v8  ;;  %5294 = vrcp.f32 %v1441_v44 }
 0x262   :  { %v5277_v30 = vpop.eup %5276  ;;  %v1579_v5 = vmul.f32 %v5275_v10, %v6661_v35  ;;  %5296 = vrcp.f32 %v1986_v3  ;;  %v8532_v35 = vld [vmem:[#allocation15_spill] sm:$0xff]  ;;  %v1152_v62 = vpack.c.bf16 %v6872_v14, %v6867_v9 }
 0x263   :  { %v5279_v39 = vpop.eup %5278  ;;  %v1672_v16 = vadd.f32 %v6770_v24, %v1569_v25  ;;  %v1571_v8 = vmul.f32 %v5277_v30, %v6609_v4  ;;  %5298 = vrcp.f32 %v1984_v31  ;;  %v6883_v48 = vadd.f32 %v8532_v35, %v6695_v38 }
 0x264   :  { %v5281_v56 = vpop.eup %5280  ;;  %v1581_v44 = vmul.f32 %v5279_v39, %v6665_v6  ;;  %5300 = vpow.bf16 %v1229_v58  ;;  %v1183_v6 = vsub.bf16 0, %v1143_v13 }
 0x265   :  { %v5283_v7 = vpop.eup %5282  ;;  %v1673_v24 = vadd.f32 %v1672_v16, %v1579_v5  ;;  %v1698_v4 = vadd.f32 %v6786_v20, %v1571_v8  ;;  %v1588_v3 = vmul.f32 %v5281_v56, %v6705_v18  ;;  %5302 = vrcp.f32 %v1987_v34 }
 0x266   :  { %v5285_v12 = vpop.eup %5284  ;;  %v1598_v31 = vmul.f32 %v5283_v7, %v6722_v23  ;;  %5304 = vpow.bf16 %v1232_v15  ;;  %v1153_v58 = vpack.c.bf16 %v6878_v42, %v6883_v48  ;;  %v4356_v34 = vmul.f32 -1.442695, %v6856_v60 }
 0x267   :  { %v5287_v54 = vpop.eup %5286  ;;  %v1699_v57 = vadd.f32 %v1698_v4, %v1581_v44  ;;  %v1661_v10 = vadd.f32 %v6800_v1, %v1588_v3  ;;  %v1590_v25 = vmul.f32 %v5285_v12, %v6712_v45  ;;  %5306 = vpow2.f32 %v6822_v33 }
 0x268   :  { %v5289_v20 = vpop.eup %5288  ;;  %v1600_v18 = vmul.f32 %v5287_v54, %v6726_v50  ;;  %5308 = vpow2.f32 %v4355_v61  ;;  %v1262_v45 = vmul.bf16 1069105081, %v1183_v6  ;;  %v4354_v33 = vmul.f32 -1.442695, %v6862_v59 }
 0x269   :  { %v5291_v23 = vpop.eup %5290  ;;  %v1662_v15 = vadd.f32 %v1661_v10, %v1598_v31  ;;  %v1687_v13 = vadd.f32 %v6809_v40, %v1590_v25  ;;  %v1589_v30 = vmul.f32 %v5289_v20, %v6718_v53  ;;  %5310 = vpow2.f32 %v4353_v11  ;;  %v8533_v53 = vld [vmem:[#allocation12_spill] sm:$0xff] }
 0x26a   :  { %v5293_v5 = vpop.eup %5292  ;;  %v1599_v1 = vmul.f32 %v5291_v23, %v6730_v17  ;;  %5312 = vpow.bf16 %v1259_v41  ;;  %v6905_v40 = vadd.f32 %v8533_v53, %v8523_v21  ;;  %v8534_v17 = vld [vmem:[#allocation13_spill] sm:$0xff] }
 0x26b   :  { %v5295_v39 = vpop.eup %5294  ;;  %v1663_v16 = vrot.slane %v1662_v15, 4  ;;  %v1688_v50 = vadd.f32 %v1687_v13, %v1600_v18  ;;  %v1674_v61 = vadd.f32 %v1673_v24, %v1589_v30  ;;  %v1591_v8 = vmul.f32 %v5293_v5, %v6735_v43 }
 0x26c   :  { %v5297_v56 = vpop.eup %5296  ;;  %v1601_v44 = vmul.f32 %v5295_v39, %v6747_v27  ;;  %5314 = vpow2.f32 %v4356_v34  ;;  %v6909_v11 = vadd.f32 %v8534_v17, %v8523_v21  ;;  %v6913_v43 = vsub.bf16 0, %v1152_v62 }
 0x26d   :  { %v6911_v41 = vpop.eup %5298  ;;  %v1664_v35 = vadd.f32 %v1663_v16, %v1662_v15  ;;  %v1689_v7 = vrot.slane %v1688_v50, 4  ;;  %v1675_v4 = vadd.f32 %v1674_v61, %v1599_v1  ;;  %v1700_v24 = vadd.f32 %v1699_v57, %v1591_v8 }
 0x26e   :  { %5316 = vpow.bf16 %v1262_v45  ;;  %v1162_v27 = vpack.c.bf16 %v6909_v11, %v6905_v40  ;;  %v2010_v21 = vmul.f32 %v5297_v56, %v6775_v32  ;;  %v6924_v8 = vsub.bf16 0, %v1153_v58  ;;  %v8535_v58 = vld [vmem:[#allocation16_spill] sm:$0xff] }
 0x26f   :  { %v5301_v3 = vpop.eup %5300  ;;  %v1665_v31 = vrot.slane %v1664_v35, 2  ;;  %v1690_v6 = vadd.f32 %v1689_v7, %v1688_v50  ;;  %v1676_v54 = vrot.slane %v1675_v4, 4  ;;  %v1701_v10 = vadd.f32 %v1700_v24, %v1601_v44 }
 0x270   :  { %v5303_v12 = vpop.eup %5302  ;;  %v1332_v25 = vadd.bf16 1065369472, %v5301_v3  ;;  %5318 = vpow2.f32 %v4354_v33 }
 0x271   :  { %v2011_v20 = vmul.f32 %v5303_v12, %v6798_v26  ;;  %v5305_v18 = vpop.eup %5304  ;;  %v1666_v34 = vadd.f32 %v1665_v31, %v1664_v35  ;;  %v1691_v62 = vrot.slane %v1690_v6, 2  ;;  %v1677_v23 = vadd.f32 %v1676_v54, %v1675_v4 }
 0x272   :  { %v5307_v57 = vpop.eup %5306  ;;  %v1702_v15 = vrot.slane %v1701_v10, 4  ;;  %v1372_v30 = vunpack.c.l.bf16 %v1332_v25  ;;  %v1382_v5 = vunpack.c.h.bf16 %v1332_v25  ;;  %v1333_v45 = vadd.bf16 1065369472, %v5305_v18 }
 0x273   :  { %v5309_v13 = vpop.eup %5308  ;;  %v6919_v1 = vpack.c.bf16 %v2011_v20, %v2010_v21  ;;  %v1667_v16 = vrot.slane %v1666_v34, 1  ;;  %v1692_v50 = vadd.f32 %v1691_v62, %v1690_v6  ;;  %v1678_v32 = vrot.slane %v1677_v23, 2 }
 0x274   :  { %v5311_v39 = vpop.eup %5310  ;;  %v1703_v61 = vadd.f32 %v1702_v15, %v1701_v10  ;;  %5320 = vrcp.f32 %v1372_v30  ;;  %v1373_v26 = vunpack.c.l.bf16 %v1333_v45  ;;  %v1383_v33 = vunpack.c.h.bf16 %v1333_v45  ;;  %v8536_v15 = vld [vmem:[#allocation17_spill] sm:$0xff] }
 0x275   :  { %v5313_v56 = vpop.eup %5312  ;;  %v1693_v44 = vrot.slane %v1692_v50, 1  ;;  %v1679_v53 = vadd.f32 %v1678_v32, %v1677_v23  ;;  %v1985_v35 = vadd.f32 1.0, %v5307_v57  ;;  %v1668_v4 = vadd.f32 %v1667_v16, %v1666_v34 }
 0x276   :  { %v1704_v17 = vrot.slane %v1703_v61, 2  ;;  %v5315_v7 = vpop.eup %5314  ;;  %5322 = vrcp.f32 %v1382_v5  ;;  %v1990_v24 = vadd.f32 1.0, %v5309_v13  ;;  %v1342_v3 = vadd.bf16 1065369472, %v5313_v56 }
 0x277   :  { %v1680_v12 = vrot.slane %v1679_v53, 1  ;;  %5324 = vrcp.f32 %v1373_v26  ;;  %v1988_v6 = vadd.f32 1.0, %v5311_v39  ;;  %v1694_v54 = vadd.f32 %v1693_v44, %v1692_v50 }
 0x278   :  { %v1705_v31 = vadd.f32 %v1704_v17, %v1703_v61  ;;  %5326 = vrcp.f32 %v1383_v33  ;;  %v1392_v10 = vunpack.c.l.bf16 %v1342_v3  ;;  %v6928_v21 = vadd.f32 %v8535_v58, %v6695_v38 }
 0x279   :  { %v5317_v25 = vpop.eup %5316  ;;  %v1681_v20 = vadd.f32 %v1680_v12, %v1679_v53  ;;  %5328 = vrcp.f32 %v1985_v35  ;;  %v1402_v57 = vunpack.c.h.bf16 %v1342_v3  ;;  %v1991_v62 = vadd.f32 1.0, %v5315_v7 }
 0x27a   :  { %v1706_v18 = vrot.slane %v1705_v31, 1  ;;  %v5319_v34 = vpop.eup %5318  ;;  %5330 = vrcp.f32 %v1990_v24  ;;  %v1343_v23 = vadd.bf16 1065369472, %v5317_v25  ;;  %v6932_v13 = vadd.f32 %v8536_v15, %v6695_v38 }
 0x27b   :  { %v1759_v30 = vcombine.low %v1668_v4, %v1681_v20  ;;  %5332 = vrcp.f32 %v1988_v6  ;;  %v1202_v45 = vsub.bf16 0, %v1162_v27  ;;  %v1989_v26 = vadd.f32 1.0, %v5319_v34 }
 0x27c   :  { %v1707_v5 = vadd.f32 %v1706_v18, %v1705_v31  ;;  %5334 = vrcp.f32 %v1392_v10  ;;  %v1393_v39 = vunpack.c.l.bf16 %v1343_v23  ;;  %v1403_v16 = vunpack.c.h.bf16 %v1343_v23 }
 0x27d   :  { %v1163_v50 = vpack.c.bf16 %v6932_v13, %v6928_v21  ;;  %v1781_v32 = vrot.slane %v1759_v30, %v8511_v51  ;;  %5336 = vrcp.f32 %v1402_v57  ;;  %v1289_v38 = vmul.bf16 1069105081, %v6913_v43 }
 0x27e   :  { %v1760_v61 = vcombine.low %v1694_v54, %v1707_v5  ;;  %v5321_v33 = vpop.eup %5320  ;;  %5338 = vrcp.f32 %v1991_v62  ;;  %v1292_v53 = vmul.bf16 1069105081, %v6924_v8  ;;  %v1319_v35 = vmul.bf16 1069105081, %v1202_v45 }
 0x27f   :  { %v1203_v56 = vsub.bf16 0, %v1163_v50  ;;  %v1532_v27 = vmul.f32 %v5321_v33, %v6768_v29  ;;  %5340 = vrcp.f32 %v1393_v39  ;;  %v8537_v43 = vcombine.low %v6701_v0, %v6708_v52 }
 0x280   :  { %v1788_v44 = vrot.slane %v1760_v61, %v8511_v51  ;;  %v5323_v17 = vpop.eup %5322  ;;  %5342 = vrcp.f32 %v1403_v16  ;;  %v2008_v25 = vmul.f32 %v6911_v41, %v6784_v49  ;;  %v5002_v49 = vld [vmem:[%s8400_s3 + $0x64] ss:$40 sps:$4 sm:$0xff]  }
 0x281   :  { %v5325_v7 = vpop.eup %5324  ;;  %v1542_v24 = vmul.f32 %v5323_v17, %v6794_v55  ;;  %5344 = vrcp.f32 %v1989_v26  ;;  %v1322_v3 = vmul.bf16 1069105081, %v1203_v56  ;;  %v1797_v31 = vrot.slane %v8537_v43, %v8511_v51  ;;  %v1744_v55 = vld [vmem:[#allocation2] ss:$2 sm:$0xff]  ;;  %v5006_v17 = vld [vmem:[%s8400_s3 + $0xb0] ss:$40 sps:$4 sm:$0xff]  }
 0x282   :  { %v1790_v4 = vcombine.low %v1781_v32, %v1788_v44  ;;  %v5327_v12 = vpop.eup %5326  ;;  %v1533_v29 = vmul.f32 %v5325_v7, %v6780_v2  ;;  %5346 = vpow.bf16 %v1289_v38  ;;  %v4994_v2 = vld [vmem:[%s8400_s3 + $0x10] ss:$40 sps:$4 sm:$0xff]   ;;  %v8538_v56 = vmov 0  }
 0x283   :  { %v5329_v6 = vpop.eup %5328  ;;  %v1708_v54 = vadd.f32 %v1542_v24, %v1532_v27  ;;  %v1543_v10 = vmul.f32 %v5327_v12, %v6804_v36  ;;  %5348 = vpow.bf16 %v1292_v53  ;;  %v4997_v36 = vld [vmem:[%s8400_s3 + $0x18] ss:$40 sps:$4 sm:$0xff]   ;;  %v5017_v24 = vld [vmem:[%s8400_s3 + $0x10c] ss:$40 sps:$4 sm:$0xff]  }
 0x284   :  { %v1804_v8 = vrot.slane %v1790_v4, %v8511_v51  ;;  %v5331_v58 = vpop.eup %5330  ;;  %v2009_v20 = vmul.f32 %v5329_v6, %v6815_v63  ;;  %5350 = vpow.bf16 %v1319_v35  ;;  %v5005_v63 = vld [vmem:[%s8400_s3 + $0x6c] ss:$40 sps:$4 sm:$0xff]  }
 0x285   :  { %v5333_v0 = vpop.eup %5332  ;;  %v1721_v18 = vadd.f32 %v1543_v10, %v1533_v29  ;;  %5352 = vpow.bf16 %v1322_v3  ;;  %v2014_v45 = vmul.f32 %v5331_v58, %v6826_v37  ;;  %v5008_v37 = vld [vmem:[%s8400_s3 + $0xb4] ss:$40 sps:$4 sm:$0xff]   ;;  %v5012_v58 = vld [vmem:[%s8400_s3 + $0x100] ss:$40 sps:$4 sm:$0xff]  }
 0x286   :  { %v1805_v52 = vcombine.low %v1797_v31, %v1804_v8  ;;  %v5335_v57 = vpop.eup %5334  ;;  %v6958_v34 = vpack.c.bf16 %v2009_v20, %v2008_v25  ;;  %v5020_v20 = vld [vmem:[%s8400_s3 + $0x154] ss:$40 sps:$4 sm:$0xff]  }
 0x287   :  { %v5337_v41 = vpop.eup %5336  ;;  %v1552_v23 = vmul.f32 %v5335_v57, %v6830_v19  ;;  %v5000_v19 = vld [vmem:[%s8400_s3 + $0x60] ss:$40 sps:$4 sm:$0xff]  }
 0x288   :  { %v1823_v62 = vadd.f32 %v1805_v52, %v1744_v55  ;;  %v5339_v15 = vpop.eup %5338  ;;  %v1562_v30 = vmul.f32 %v5337_v41, %v6838_v47  ;;  %2587 = vmatmul.mubr.bf16.vlgmr.msra.gmra.mrb[48].mxu1 %v6958_v34  ;;  %2660 = vmatmul.mubr.bf16.vlgmr.msra.gmra.mrb[48].mxu0 %v6958_v34  ;;  %v5003_v47 = vld [vmem:[%s8400_s3 + $0x68] ss:$40 sps:$4 sm:$0xff]   ;;  %v5021_v57 = vld [vmem:[%s8400_s3 + $0x158] ss:$40 sps:$4 sm:$0xff]  }
 0x289   :  { %v5341_v5 = vpop.eup %5340  ;;  %v1709_v39 = vadd.f32 %v1708_v54, %v1552_v23  ;;  %v2015_v16 = vmul.f32 %v5339_v15, %v6856_v60  ;;  %2701 = vmatpush1.bf16.msra.mxu1 %v4994_v2  ;;  %2774 = vmatpush1.bf16.msra.mxu0 %v4997_v36  ;;  %v5011_v60 = vld [vmem:[%s8400_s3 + $0xbc] ss:$40 sps:$4 sm:$0xff]   ;;  %v5015_v55 = vld [vmem:[%s8400_s3 + $0x108] ss:$40 sps:$4 sm:$0xff]  }
 0x28a   :  { %1825 = vst [vmem:[#allocation2] ss:$2 sm:$0xff] %v1823_v62  ;;  %v5343_v50 = vpop.eup %5342  ;;  %v1553_v32 = vmul.f32 %v5341_v5, %v6847_v28  ;;  %2702 = vmatprep.subr.bf16.mxu1 %v5002_v49  ;;  %2775 = vmatprep.subr.bf16.mxu0 %v5005_v63  ;;  %v2012_v28 = vmul.f32 %v5333_v0, %v6834_v46  ;;  %v5023_v0 = vld [vmem:[%s8400_s3 + $0x15c] ss:$40 sps:$4 sm:$0xff]   ;;  %v5018_v36 = vld [vmem:[%s8400_s3 + $0x150] ss:$40 sps:$4 sm:$0xff]  }
 0x28b   :  { %v5345_v61 = vpop.eup %5344  ;;  %v6985_v26 = vadd.f32 %v1709_v39, %v1562_v30  ;;  %v6987_v33 = vpack.c.bf16 %v2015_v16, %v2014_v45  ;;  %v1563_v38 = vmul.f32 %v5343_v50, %v6851_v22  ;;  %2596 = vmatprep.mubr.bf16.mxu1 %v8538_v56  ;;  %2669 = vmatprep.mubr.bf16.mxu0 %v8538_v56  ;;  %v5009_v22 = vld [vmem:[%s8400_s3 + $0xb8] ss:$40 sps:$4 sm:$0xff]   ;;  %v5026_v49 = vld [vmem:[%s8400_s3 + $0x1a4] ss:$40 sps:$4 sm:$0xff]   ;;  %v5027_v62 = vld [vmem:[%s8400_s3 + $0x1a8] ss:$40 sps:$4 sm:$0xff]  }
 0x28c   :  { %v1722_v44 = vadd.f32 %v1721_v18, %v1553_v32  ;;  %v2013_v27 = vmul.f32 %v5345_v61, %v6862_v59  ;;  %v5014_v59 = vld [vmem:[%s8400_s3 + $0x104] ss:$40 sps:$4 sm:$0xff]   ;;  %v5024_v41 = vld [vmem:[%s8400_s3 + $0x1a0] ss:$40 sps:$4 sm:$0xff]   ;;  %v5032_v23 = vld [vmem:[%s8400_s3 + $0x1f4] ss:$40 sps:$4 sm:$0xff]  }
 0x28d   :  { %v5347_v53 = vpop.eup %5346  ;;  %2703 = vmatpush1.bf16.msra.mxu1 %v5000_v19  ;;  %2776 = vmatpush1.bf16.msra.mxu0 %v5003_v47  ;;  %v5029_v63 = vld [vmem:[%s8400_s3 + $0x1ac] ss:$40 sps:$4 sm:$0xff]   ;;  %v5035_v15 = vld [vmem:[%s8400_s3 + $0x1fc] ss:$40 sps:$4 sm:$0xff]   ;;  %v5030_v39 = vld [vmem:[%s8400_s3 + $0x1f0] ss:$40 sps:$4 sm:$0xff]  }
 0x28e   :  { %v5349_v35 = vpop.eup %5348  ;;  %v7000_v7 = vadd.f32 %v1722_v44, %v1563_v38  ;;  %v7002_v4 = vpack.c.bf16 %v2013_v27, %v2012_v28  ;;  %v1352_v46 = vadd.bf16 1065369472, %v5347_v53  ;;  %2704 = vmatprep.subr.bf16.mxu1 %v5008_v37  ;;  %2777 = vmatprep.subr.bf16.mxu0 %v5011_v60  ;;  %v5033_v16 = vld [vmem:[%s8400_s3 + $0x1f8] ss:$40 sps:$4 sm:$0xff]   ;;  %v5038_v50 = vld [vmem:[%s8400_s3 + $0x244] ss:$40 sps:$4 sm:$0xff]  }
 0x28f   :  { %v5351_v3 = vpop.eup %5350  ;;  %v1353_v12 = vadd.bf16 1065369472, %v5349_v35 }
 0x290   :  { %v5353_v43 = vpop.eup %5352  ;;  %v1412_v31 = vunpack.c.l.bf16 %v1352_v46  ;;  %v1422_v29 = vunpack.c.h.bf16 %v1352_v46  ;;  %v1362_v6 = vadd.bf16 1065369472, %v5351_v3  ;;  %2597 = vmatmul.mubr.bf16.gmra.mrb[52].mxu1 %v6919_v1  ;;  %2670 = vmatmul.mubr.bf16.gmra.mrb[52].mxu0 %v6919_v1  ;;  %v5047_v3 = vld [vmem:[%s8400_s3 + $0x74] ss:$40 sps:$4 sm:$0xff]  }
 0x291   :  { %v1413_v8 = vunpack.c.l.bf16 %v1353_v12  ;;  %v1423_v54 = vunpack.c.h.bf16 %v1353_v12  ;;  %v1363_v10 = vadd.bf16 1065369472, %v5353_v43  ;;  %2705 = vmatpush1.bf16.msra.mxu1 %v5006_v17  ;;  %2778 = vmatpush1.bf16.msra.mxu0 %v5009_v22  ;;  %v5044_v17 = vld [vmem:[%s8400_s3 + $0x24] ss:$40 sps:$4 sm:$0xff]  }
 0x292   :  { %5354 = vrcp.f32 %v1412_v31  ;;  %v1432_v25 = vunpack.c.l.bf16 %v1362_v6  ;;  %2706 = vmatprep.subr.bf16.mxu1 %v5014_v59  ;;  %2779 = vmatprep.subr.bf16.mxu0 %v5017_v24  ;;  %v1442_v52 = vunpack.c.h.bf16 %v1362_v6  ;;  %v5045_v31 = vld [vmem:[%s8400_s3 + $0x70] ss:$40 sps:$4 sm:$0xff]  }
 0x293   :  { %5356 = vrcp.f32 %v1422_v29  ;;  %2606 = vmatprep.mubr.bf16.mxu1 %v8538_v56  ;;  %2679 = vmatprep.mubr.bf16.mxu0 %v8538_v56  ;;  %v1433_v18 = vunpack.c.l.bf16 %v1363_v10  ;;  %v1443_v2 = vunpack.c.h.bf16 %v1363_v10  ;;  %v5050_v29 = vld [vmem:[%s8400_s3 + $0xc4] ss:$40 sps:$4 sm:$0xff]  }
 0x294   :  { %5358 = vrcp.f32 %v1413_v8 }
 0x295   :  { %5360 = vrcp.f32 %v1423_v54  ;;  %2707 = vmatpush1.bf16.msra.mxu1 %v5012_v58  ;;  %2780 = vmatpush1.bf16.msra.mxu0 %v5015_v55  ;;  %v5048_v58 = vld [vmem:[%s8400_s3 + $0xc0] ss:$40 sps:$4 sm:$0xff]   ;;  %v5053_v55 = vld [vmem:[%s8400_s3 + $0x114] ss:$40 sps:$4 sm:$0xff]  }
 0x296   :  { %5362 = vrcp.f32 %v1432_v25  ;;  %2708 = vmatprep.subr.bf16.mxu1 %v5020_v20  ;;  %2781 = vmatprep.subr.bf16.mxu0 %v5023_v0 }
 0x297   :  { %5364 = vrcp.f32 %v1442_v52 }
 0x298   :  { %5366 = vrcp.f32 %v1433_v18  ;;  %2607 = vmatmul.mubr.bf16.gmra.mrb[56].mxu1 %v7002_v4  ;;  %2680 = vmatmul.mubr.bf16.gmra.mrb[56].mxu0 %v7002_v4  ;;  %v5051_v18 = vld [vmem:[%s8400_s3 + $0x110] ss:$40 sps:$4 sm:$0xff]  }
 0x299   :  { %5368 = vrcp.f32 %v1443_v2  ;;  %2709 = vmatpush1.bf16.msra.mxu1 %v5018_v36  ;;  %2782 = vmatpush1.bf16.msra.mxu0 %v5021_v57  ;;  %v5056_v2 = vld [vmem:[%s8400_s3 + $0x164] ss:$40 sps:$4 sm:$0xff]  }
 0x29a   :  { %2710 = vmatprep.subr.bf16.mxu1 %v5026_v49  ;;  %2783 = vmatprep.subr.bf16.mxu0 %v5029_v63  ;;  %v5054_v49 = vld [vmem:[%s8400_s3 + $0x160] ss:$40 sps:$4 sm:$0xff]   ;;  %v5059_v63 = vld [vmem:[%s8400_s3 + $0x1b4] ss:$40 sps:$4 sm:$0xff]  }
 0x29b   :  { %2616 = vmatprep.mubr.bf16.mxu1 %v8538_v56  ;;  %2689 = vmatprep.mubr.bf16.mxu0 %v8538_v56 }
 0x29c   :  { %v5355_v30 = vpop.eup %5354 }
 0x29d   :  { %v5357_v5 = vpop.eup %5356  ;;  %v1572_v45 = vmul.f32 %v5355_v30, %v6867_v9  ;;  %2711 = vmatpush1.bf16.msra.mxu1 %v5024_v41  ;;  %2784 = vmatpush1.bf16.msra.mxu0 %v5027_v62  ;;  %v5041_v9 = vld [vmem:[%s8400_s3 + $0x24c] ss:$40 sps:$4 sm:$0xff]   ;;  %v1746_v62 = vld [vmem:[#allocation2 + $0x10] ss:$2 sm:$0x3]  ;;  %v8539_v30 = vlaneseq }
 0x29e   :  { %v5359_v19 = vpop.eup %5358  ;;  %v1582_v47 = vmul.f32 %v5357_v5, %v6872_v14  ;;  %2712 = vmatprep.subr.bf16.mxu1 %v5032_v23  ;;  %2785 = vmatprep.subr.bf16.mxu0 %v5035_v15  ;;  %v5057_v15 = vld [vmem:[%s8400_s3 + $0x1b0] ss:$40 sps:$4 sm:$0xff]   ;;  %v8540_v5 = vmov 0 }
 0x29f   :  { %v5361_v32 = vpop.eup %5360  ;;  %v1711_v37 = vadd.f32 %v6985_v26, %v1572_v45  ;;  %v1573_v60 = vmul.f32 %v5359_v19, %v6883_v48  ;;  %v5036_v26 = vld [vmem:[%s8400_s3 + $0x240] ss:$40 sps:$4 sm:$0xff]   ;;  %vm7136_vm1 = vcmp.lt.s32.totalorder %v8539_v30, 256  ;;  %v5062_v45 = vld [vmem:[%s8400_s3 + $0x204] ss:$40 sps:$4 sm:$0xff]  }
 0x2a0   :  { %v5363_v61 = vpop.eup %5362  ;;  %v1583_v38 = vmul.f32 %v5361_v32, %v6878_v42  ;;  %2617 = vmatmul.mubr.bf16.gmra.mrb[60].mxu1 %v6987_v33  ;;  %2690 = vmatmul.mubr.bf16.gmra.mrb[60].mxu0 %v6987_v33  ;;  %v5039_v42 = vld [vmem:[%s8400_s3 + $0x248] ss:$40 sps:$4 sm:$0xff]   ;;  %v8541_v5 = vsel %vm7136_vm1, 4294967295, %v8540_v5  ;;  %v5065_v19 = vld [vmem:[%s8400_s3 + $0x254] ss:$40 sps:$4 sm:$0xff]  }
 0x2a1   :  { %v5365_v14 = vpop.eup %5364  ;;  %v1712_v28 = vadd.f32 %v1711_v37, %v1582_v47  ;;  %v1724_v44 = vadd.f32 %v7000_v7, %v1573_v60  ;;  %v1592_v27 = vmul.f32 %v5363_v61, %v6905_v40  ;;  %2713 = vmatpush1.bf16.msra.mxu1 %v5030_v39  ;;  %2786 = vmatpush1.bf16.msra.mxu0 %v5033_v16  ;;  %v5060_v16 = vld [vmem:[%s8400_s3 + $0x200] ss:$40 sps:$4 sm:$0xff]   ;;  %v5063_v47 = vld [vmem:[%s8400_s3 + $0x250] ss:$40 sps:$4 sm:$0xff]  }
 0x2a2   :  { %v5367_v48 = vpop.eup %5366  ;;  %v1602_v53 = vmul.f32 %v5365_v14, %v6909_v11  ;;  %2714 = vmatprep.subr.bf16.mxu1 %v5038_v50  ;;  %2787 = vmatprep.subr.bf16.mxu0 %v5041_v9  ;;  %v5042_v11 = vld [vmem:[%s8400_s3 + $0x20] ss:$40 sps:$4 sm:$0xff]   ;;  %8542 = vst [vmem:[#allocation14_spill] sm:$0xff] %v8541_v5  ;;  %v8544_v32 = vld [vmem:[#allocation6_spill] sm:$0xff] }
 0x2a3   :  { %v5369_v40 = vpop.eup %5368  ;;  %v1725_v22 = vadd.f32 %v1724_v44, %v1583_v38  ;;  %v1713_v35 = vadd.f32 %v1712_v28, %v1592_v27  ;;  %v1593_v7 = vmul.f32 %v5367_v48, %v6928_v21  ;;  %2732 = vmatprep.mubr.bf16.mxu1 %v8538_v56  ;;  %2805 = vmatprep.mubr.bf16.mxu0 %v8538_v56  ;;  %v7168_v50 = vld [vmem:[%s8401_s4] sm:$0xff]  ;;  %v8545_v37 = vsub.s32 2, %v8544_v32 }
 0x2a4   :  { %v1603_v46 = vmul.f32 %v5369_v40, %v6932_v13  ;;  %v8543_v9 = vld [vmem:[#allocation7_spill] sm:$0xff]  ;;  %v8546_v61 = vld [vmem:[#allocation8_spill] sm:$0xff] }
 0x2a5   :  { %v1714_v59 = vadd.f32 %v1713_v35, %v1602_v53  ;;  %v1726_v24 = vadd.f32 %v1725_v22, %v1593_v7  ;;  %2715 = vmatpush1.bf16.msra.mxu1 %v5036_v26  ;;  %2788 = vmatpush1.bf16.msra.mxu0 %v5039_v42 }
 0x2a6   :  { %2846 = vmatprep.subr.bf16.mxu1 %v5044_v17 }
 0x2a7   :  { %v1715_v21 = vrot.slane %v1714_v59, 4  ;;  %v1727_v12 = vadd.f32 %v1726_v24, %v1603_v46 }
 0x2a8   :  { %2733 = vmatmul.mubr.bf16.vlgmr.msra.gmra.mrb[64].mxu1 %v6958_v34  ;;  %2806 = vmatmul.mubr.bf16.vlgmr.msra.gmra.mrb[64].mxu0 %v6958_v34 }
 0x2a9   :  { %v1716_v13 = vadd.f32 %v1715_v21, %v1714_v59  ;;  %v1728_v43 = vrot.slane %v1727_v12, 4  ;;  %2847 = vmatpush1.bf16.msra.mxu1 %v5042_v11  ;;  %2742 = vmatprep.mubr.bf16.mxu1 %v8538_v56 }
 0x2aa   :  { %2848 = vmatprep.subr.bf16.mxu1 %v5047_v3  ;;  %2815 = vmatprep.mubr.bf16.mxu0 %v8538_v56 }
 0x2ab   :  { %v1717_v6 = vrot.slane %v1716_v13, 2  ;;  %v1729_v8 = vadd.f32 %v1728_v43, %v1727_v12 }
 0x2ad   :  { %v1718_v54 = vadd.f32 %v1717_v6, %v1716_v13  ;;  %v1730_v10 = vrot.slane %v1729_v8, 2  ;;  %2849 = vmatpush1.bf16.msra.mxu1 %v5045_v31 }
 0x2ae   :  { %2850 = vmatprep.subr.bf16.mxu1 %v5050_v29 }
 0x2af   :  { %v1719_v25 = vrot.slane %v1718_v54, 1  ;;  %v1731_v20 = vadd.f32 %v1730_v10, %v1729_v8 }
 0x2b0   :  { %2743 = vmatmul.mubr.bf16.gmra.mrb[68].mxu1 %v6919_v1  ;;  %2816 = vmatmul.mubr.bf16.gmra.mrb[68].mxu0 %v6919_v1 }
 0x2b1   :  { %v1720_v0 = vadd.f32 %v1719_v25, %v1718_v54  ;;  %v1732_v52 = vrot.slane %v1731_v20, 1  ;;  %2851 = vmatpush1.bf16.msra.mxu1 %v5048_v58  ;;  %2752 = vmatprep.mubr.bf16.mxu1 %v8538_v56 }
 0x2b2   :  { %2852 = vmatprep.subr.bf16.mxu1 %v5053_v55  ;;  %2825 = vmatprep.mubr.bf16.mxu0 %v8538_v56 }
 0x2b3   :  { %v1733_v36 = vadd.f32 %v1732_v52, %v1731_v20 }
 0x2b5   :  { %v1806_v57 = vcombine.low %v1720_v0, %v1733_v36  ;;  %2853 = vmatpush1.bf16.msra.mxu1 %v5051_v18 }
 0x2b6   :  { %2854 = vmatprep.subr.bf16.mxu1 %v5056_v2 }
 0x2b7   :  { %v1813_v41 = vrot.slane %v1806_v57, %v8511_v51 }
 0x2b8   :  { %2753 = vmatmul.mubr.bf16.gmra.mrb[72].mxu1 %v7002_v4  ;;  %2826 = vmatmul.mubr.bf16.gmra.mrb[72].mxu0 %v7002_v4 }
 0x2b9   :  { %v1820_v23 = vrot.slane %v1813_v41, %v8511_v51  ;;  %2855 = vmatpush1.bf16.msra.mxu1 %v5054_v49  ;;  %2762 = vmatprep.mubr.bf16.mxu1 %v8538_v56 }
 0x2ba   :  { %2856 = vmatprep.subr.bf16.mxu1 %v5059_v63  ;;  %2835 = vmatprep.mubr.bf16.mxu0 %v8538_v56 }
 0x2bb   :  { %v1824_v39 = vadd.f32 %v1820_v23, %v1746_v62 }
 0x2bd   :  { %1830 = vst.msk [vmem:[#allocation2 + $0x10] ss:$2 sm:$0x3] %vm7136_vm1, %v1824_v39  ;;  %2857 = vmatpush1.bf16.msra.mxu1 %v5057_v15 }
 0x2be   :  { %2858 = vmatprep.subr.bf16.mxu1 %v5062_v45 }
 0x2c0   :  { %2763 = vmatmul.mubr.bf16.gmra.mrb[76].mxu1 %v6987_v33  ;;  %2836 = vmatmul.mubr.bf16.gmra.mrb[76].mxu0 %v6987_v33 }
 0x2c1   :  { %2859 = vmatpush1.bf16.msra.mxu1 %v5060_v16  ;;  %2878 = vmatprep.mubr.bf16.mxu1 %v8538_v56 }
 0x2c2   :  { %2860 = vmatprep.subr.bf16.mxu1 %v5065_v19 }
 0x2c5   :  { %2861 = vmatpush1.bf16.msra.mxu1 %v5063_v47 }
 0x2c8   :  { %2879 = vmatmul.mubr.bf16.vlgmr.msra.gmra.mrb[80].mxu1 %v6958_v34  ;;  %v7172_v34 = vrot.slane %v7168_v50, %v8543_v9 }
 0x2c9   :  { %2888 = vmatprep.mubr.bf16.mxu1 %v8538_v56 }
 0x2d0   :  { %2889 = vmatmul.mubr.bf16.gmra.mrb[84].mxu1 %v6919_v1  ;;  %v7177_v1 = vrot.slane %v7168_v50, %v8545_v37 }
 0x2d1   :  { %2898 = vmatprep.mubr.bf16.mxu1 %v8538_v56 }
 0x2d8   :  { %2899 = vmatmul.mubr.bf16.gmra.mrb[88].mxu1 %v7002_v4 }
 0x2d9   :  { %2908 = vmatprep.mubr.bf16.mxu1 %v8538_v56  ;;  %v7181_v56 = vrot.slane %v7168_v50, %v8546_v61 }
 0x2e0   :  { %2909 = vmatmul.mubr.bf16.gmra.mrb[92].mxu1 %v6987_v33  ;;  %v8547_v33 = vsub.s32 3, %v8544_v32 }
 0x2e2   :  { %v7186_v38 = vrot.slane %v7168_v50, %v8547_v33 }
 0x35b   :  { %v2588_v60 = vpop.f32.mrb[48].mxu1  ;;  %v2661_v4 = vpop.f32.mrb[48].mxu0 }
 0x35c   :  { %v2590_v14 = vpop.f32.mrb[49].mxu1  ;;  %v2663_v28 = vpop.f32.mrb[49].mxu0  ;;  %v7189_v26 = vadd.f32 %v2588_v60, %v7172_v34  ;;  %v7192_v42 = vadd.f32 %v2661_v4, %v7177_v1 }
 0x35d   :  { %v2592_v44 = vpop.f32.mrb[50].mxu1  ;;  %v2665_v27 = vpop.f32.mrb[50].mxu0  ;;  %v7201_v22 = vadd.f32 %v2590_v14, %v7181_v56  ;;  %v7204_v35 = vadd.f32 %v2663_v28, %v7186_v38 }
 0x35e   :  { %v7195_v48 = vadd.f32 %v2592_v44, %v7172_v34  ;;  %v7198_v53 = vadd.f32 %v2665_v27, %v7177_v1  ;;  %v2594_v17 = vpop.f32.mrb[51].mxu1  ;;  %v2667_v40 = vpop.f32.mrb[51].mxu0  ;;  %v8548_v44 = vsub.s32 4, %v8544_v32 }
 0x35f   :  { %v7207_v7 = vadd.f32 %v2594_v17, %v7181_v56  ;;  %v7210_v46 = vadd.f32 %v2667_v40, %v7186_v38  ;;  %v8549_v17 = vsub.s32 6, %v8544_v32 }
 0x360   :  { %v2919_v59 = vpack.c.bf16 %v7195_v48, %v7189_v26  ;;  %v2921_v24 = vpack.c.bf16 %v7198_v53, %v7192_v42  ;;  %v7255_v27 = vrot.slane %v7168_v50, %v8548_v44 }
 0x361   :  { %v2920_v11 = vpack.c.bf16 %v7207_v7, %v7201_v22  ;;  %v2922_v3 = vpack.c.bf16 %v7210_v46, %v7204_v35  ;;  %v7260_v40 = vrot.slane %v7168_v50, %v8549_v17 }
 0x362   :  { %v2959_v21 = vsub.bf16 0, %v2919_v59  ;;  %v2961_v12 = vsub.bf16 0, %v2921_v24 }
 0x363   :  { %v2960_v13 = vsub.bf16 0, %v2920_v11  ;;  %v2962_v43 = vsub.bf16 0, %v2922_v3  ;;  %v2598_v31 = vpop.f32.mrb[52].mxu1  ;;  %v2671_v29 = vpop.f32.mrb[52].mxu0 }
 0x364   :  { %v3000_v6 = vmul.bf16 1069105081, %v2959_v21  ;;  %v3006_v8 = vmul.bf16 1069105081, %v2961_v12  ;;  %v2600_v54 = vpop.f32.mrb[53].mxu1  ;;  %v2673_v10 = vpop.f32.mrb[53].mxu0  ;;  %v7221_v25 = vadd.f32 %v2598_v31, %v7172_v34  ;;  %v7224_v20 = vadd.f32 %v2671_v29, %v7177_v1 }
 0x365   :  { %v3003_v58 = vmul.bf16 1069105081, %v2960_v13  ;;  %v3009_v55 = vmul.bf16 1069105081, %v2962_v43  ;;  %v2602_v0 = vpop.f32.mrb[54].mxu1  ;;  %v2675_v52 = vpop.f32.mrb[54].mxu0  ;;  %v7227_v18 = vadd.f32 %v2600_v54, %v7181_v56  ;;  %v7236_v63 = vadd.f32 %v2673_v10, %v7186_v38 }
 0x366   :  { %5370 = vpow.bf16 %v3000_v6  ;;  %v7230_v2 = vadd.f32 %v2602_v0, %v7172_v34  ;;  %v7233_v36 = vadd.f32 %v2675_v52, %v7177_v1  ;;  %v2604_v57 = vpop.f32.mrb[55].mxu1  ;;  %v2677_v49 = vpop.f32.mrb[55].mxu0  ;;  %v8550_v52 = vsub.s32 5, %v8544_v32 }
 0x367   :  { %5372 = vpow.bf16 %v3006_v8  ;;  %v7239_v41 = vadd.f32 %v2604_v57, %v7181_v56  ;;  %v7242_v62 = vadd.f32 %v2677_v49, %v7186_v38 }
 0x368   :  { %5374 = vpow.bf16 %v3003_v58  ;;  %v2929_v23 = vpack.c.bf16 %v7230_v2, %v7221_v25  ;;  %v2931_v15 = vpack.c.bf16 %v7233_v36, %v7224_v20  ;;  %v2101_v58 = vld [vmem:[%s8401_s4 + $0x8] sm:$0x3]  ;;  %v7296_v57 = vrot.slane %v7168_v50, %v8550_v52 }
 0x369   :  { %5376 = vpow.bf16 %v3009_v55  ;;  %v2930_v30 = vpack.c.bf16 %v7239_v41, %v7227_v18  ;;  %v2932_v45 = vpack.c.bf16 %v7242_v62, %v7236_v63 }
 0x36a   :  { %v2969_v39 = vsub.bf16 0, %v2929_v23  ;;  %v2971_v16 = vsub.bf16 0, %v2931_v15 }
 0x36b   :  { %v2970_v19 = vsub.bf16 0, %v2930_v30  ;;  %v2972_v47 = vsub.bf16 0, %v2932_v45  ;;  %v2608_v37 = vpop.f32.mrb[56].mxu1  ;;  %v2681_v60 = vpop.f32.mrb[56].mxu0  ;;  %v8551_v30 = vsub.s32 7, %v8544_v32 }
 0x36c   :  { %v3030_v4 = vmul.bf16 1069105081, %v2969_v39  ;;  %v3036_v33 = vmul.bf16 1069105081, %v2971_v16  ;;  %v2610_v14 = vpop.f32.mrb[57].mxu1  ;;  %v2683_v28 = vpop.f32.mrb[57].mxu0  ;;  %v7263_v11 = vadd.f32 %v2608_v37, %v7172_v34  ;;  %v7266_v3 = vadd.f32 %v2681_v60, %v7177_v1 }
 0x36d   :  { %v3033_v59 = vmul.bf16 1069105081, %v2970_v19  ;;  %v3039_v24 = vmul.bf16 1069105081, %v2972_v47  ;;  %v2612_v21 = vpop.f32.mrb[58].mxu1  ;;  %v2685_v12 = vpop.f32.mrb[58].mxu0  ;;  %v7269_v13 = vadd.f32 %v2610_v14, %v7181_v56  ;;  %v7278_v8 = vadd.f32 %v2683_v28, %v7186_v38 }
 0x36e   :  { %5378 = vpow.bf16 %v3030_v4  ;;  %v7272_v43 = vadd.f32 %v2612_v21, %v7172_v34  ;;  %v7275_v31 = vadd.f32 %v2685_v12, %v7177_v1  ;;  %v2614_v29 = vpop.f32.mrb[59].mxu1  ;;  %v2687_v6 = vpop.f32.mrb[59].mxu0  ;;  %v7305_v45 = vrot.slane %v7168_v50, %v8551_v30 }
 0x36f   :  { %5380 = vpow.bf16 %v3036_v33  ;;  %v7281_v54 = vadd.f32 %v2614_v29, %v7181_v56  ;;  %v7284_v10 = vadd.f32 %v2687_v6, %v7186_v38  ;;  %v7312_v37 = vrot.slane %v2101_v58, %v8543_v9 }
 0x370   :  { %5382 = vpow.bf16 %v3033_v59  ;;  %v2939_v55 = vpack.c.bf16 %v7272_v43, %v7263_v11  ;;  %v2941_v0 = vpack.c.bf16 %v7275_v31, %v7266_v3  ;;  %v7319_v50 = vrot.slane %v2101_v58, %v8546_v61 }
 0x371   :  { %v5371_v49 = vpop.eup %5370  ;;  %5384 = vpow.bf16 %v3039_v24  ;;  %v2940_v23 = vpack.c.bf16 %v7281_v54, %v7269_v13  ;;  %v2942_v15 = vpack.c.bf16 %v7284_v10, %v7278_v8  ;;  %8552 = vst [vmem:[#allocation18_spill] sm:$0xff] %v7312_v37 }
 0x372   :  { %v5373_v39 = vpop.eup %5372  ;;  %v3119_v16 = vadd.bf16 1065369472, %v5371_v49  ;;  %v7307_v19 = vsub.bf16 0, %v2939_v55  ;;  %v7309_v47 = vsub.bf16 0, %v2941_v0  ;;  %8553 = vst [vmem:[#allocation20_spill] sm:$0xff] %v7319_v50 }
 0x373   :  { %v5375_v60 = vpop.eup %5374  ;;  %v3121_v4 = vadd.bf16 1065369472, %v5373_v39  ;;  %v7314_v33 = vsub.bf16 0, %v2940_v23  ;;  %v7316_v14 = vsub.bf16 0, %v2942_v15  ;;  %v2618_v28 = vpop.f32.mrb[60].mxu1 }
 0x374   :  { %v2691_v44 = vpop.f32.mrb[60].mxu0  ;;  %v5377_v17 = vpop.eup %5376  ;;  %v3159_v59 = vunpack.c.l.bf16 %v3119_v16  ;;  %v3169_v24 = vunpack.c.h.bf16 %v3119_v16  ;;  %v3120_v21 = vadd.bf16 1065369472, %v5375_v60 }
 0x375   :  { %v2620_v29 = vpop.f32.mrb[61].mxu1  ;;  %v2693_v9 = vpop.f32.mrb[61].mxu0  ;;  %v3161_v6 = vunpack.c.l.bf16 %v3121_v4  ;;  %v3171_v55 = vunpack.c.h.bf16 %v3121_v4  ;;  %v3122_v0 = vadd.bf16 1065369472, %v5377_v17  ;;  %v7326_v4 = vadd.f32 %v2618_v28, %v7172_v34 }
 0x376   :  { %v2622_v49 = vpop.f32.mrb[62].mxu1  ;;  %v2695_v23 = vpop.f32.mrb[62].mxu0  ;;  %5386 = vrcp.f32 %v3159_v59  ;;  %v3160_v15 = vunpack.c.l.bf16 %v3120_v21  ;;  %v3170_v30 = vunpack.c.h.bf16 %v3120_v21  ;;  %v7329_v17 = vadd.f32 %v2691_v44, %v7177_v1 }
 0x377   :  { %v2624_v58 = vpop.f32.mrb[63].mxu1  ;;  %v2697_v39 = vpop.f32.mrb[63].mxu0  ;;  %5388 = vrcp.f32 %v3169_v24  ;;  %v3162_v16 = vunpack.c.l.bf16 %v3122_v0  ;;  %v3172_v60 = vunpack.c.h.bf16 %v3122_v0  ;;  %v7332_v59 = vadd.f32 %v2620_v29, %v7181_v56 }
 0x378   :  { %5390 = vrcp.f32 %v3161_v6  ;;  %8554 = vst [vmem:[#allocation9_spill] sm:$0xff] %v7329_v17  ;;  %v7335_v61 = vadd.f32 %v2693_v9, %v7186_v38  ;;  %v7338_v24 = vadd.f32 %v2622_v49, %v7172_v34  ;;  %v7341_v0 = vadd.f32 %v2695_v23, %v7177_v1 }
 0x379   :  { %8555 = vst [vmem:[#allocation24_spill] sm:$0xff] %v7332_v59  ;;  %v5379_v21 = vpop.eup %5378  ;;  %5392 = vrcp.f32 %v3171_v55  ;;  %v7344_v44 = vadd.f32 %v2624_v58, %v7181_v56  ;;  %v7347_v29 = vadd.f32 %v2697_v39, %v7186_v38 }
 0x37a   :  { %8556 = vst [vmem:[#allocation25_spill] sm:$0xff] %v7341_v0  ;;  %v5381_v6 = vpop.eup %5380  ;;  %5394 = vrcp.f32 %v3160_v15  ;;  %v3129_v28 = vadd.bf16 1065369472, %v5379_v21  ;;  %v2949_v9 = vpack.c.bf16 %v7338_v24, %v7326_v4  ;;  %v2951_v34 = vpack.c.bf16 %v7341_v0, %v7329_v17 }
 0x37b   :  { %8557 = vst [vmem:[#allocation27_spill] sm:$0xff] %v7344_v44  ;;  %8558 = vst [vmem:[#allocation28_spill] sm:$0xff] %v7347_v29  ;;  %v5383_v12 = vpop.eup %5382  ;;  %5396 = vrcp.f32 %v3170_v30  ;;  %v3131_v55 = vadd.bf16 1065369472, %v5381_v6  ;;  %v2734_v1 = vpop.f32.mrb[64].mxu1 }
 0x37c   :  { %v2807_v49 = vpop.f32.mrb[64].mxu0  ;;  %v5385_v23 = vpop.eup %5384  ;;  %5398 = vrcp.f32 %v3162_v16  ;;  %v3179_v15 = vunpack.c.l.bf16 %v3129_v28  ;;  %v3189_v21 = vunpack.c.h.bf16 %v3129_v28  ;;  %v3130_v56 = vadd.bf16 1065369472, %v5383_v12 }
 0x37d   :  { %v2736_v58 = vpop.f32.mrb[65].mxu1  ;;  %v2809_v52 = vpop.f32.mrb[65].mxu0  ;;  %5400 = vrcp.f32 %v3172_v60  ;;  %v3181_v38 = vunpack.c.l.bf16 %v3131_v55  ;;  %v3191_v39 = vunpack.c.h.bf16 %v3131_v55  ;;  %v3132_v30 = vadd.bf16 1065369472, %v5385_v23 }
 0x37e   :  { %v2738_v6 = vpop.f32.mrb[66].mxu1  ;;  %v2811_v5 = vpop.f32.mrb[66].mxu0  ;;  %5402 = vrcp.f32 %v3179_v15  ;;  %v3180_v32 = vunpack.c.l.bf16 %v3130_v56  ;;  %v3190_v50 = vunpack.c.h.bf16 %v3130_v56  ;;  %v7353_v37 = vsub.bf16 0, %v2949_v9 }
 0x37f   :  { %v2740_v51 = vpop.f32.mrb[67].mxu1  ;;  %v7355_v0 = vpop.f32.mrb[67].mxu0  ;;  %5404 = vrcp.f32 %v3189_v21  ;;  %v3182_v16 = vunpack.c.l.bf16 %v3132_v30  ;;  %v3192_v28 = vunpack.c.h.bf16 %v3132_v30  ;;  %v7357_v12 = vsub.bf16 0, %v2951_v34 }
 0x380   :  { %v5387_v17 = vpop.eup %5386  ;;  %5406 = vrcp.f32 %v3181_v38  ;;  %v3090_v60 = vmul.bf16 1069105081, %v7353_v37  ;;  %v2950_v55 = vpack.c.bf16 %v7344_v44, %v7332_v59  ;;  %v2952_v23 = vpack.c.bf16 %v7347_v29, %v7335_v61 }
 0x381   :  { %v5389_v9 = vpop.eup %5388  ;;  %v3319_v15 = vmul.f32 %v5387_v17, %v7189_v26  ;;  %5408 = vrcp.f32 %v3191_v39  ;;  %v3096_v21 = vmul.bf16 1069105081, %v7357_v12  ;;  %v7367_v56 = vadd.f32 %v2734_v1, %v7255_v27 }
 0x382   :  { %v5391_v34 = vpop.eup %5390  ;;  %v3329_v38 = vmul.f32 %v5389_v9, %v7195_v48  ;;  %5410 = vrcp.f32 %v3180_v32  ;;  %v2990_v37 = vsub.bf16 0, %v2950_v55  ;;  %v7370_v30 = vsub.bf16 0, %v2952_v23 }
 0x383   :  { %v5393_v44 = vpop.eup %5392  ;;  %v3321_v59 = vmul.f32 %v5391_v34, %v7192_v42  ;;  %5412 = vrcp.f32 %v3190_v50  ;;  %v7374_v29 = vadd.f32 %v2807_v49, %v7260_v40  ;;  %v7377_v26 = vadd.f32 %v2736_v58, %v7296_v57  ;;  %v7379_v17 = vpop.f32.mrb[68].mxu1 }
 0x384   :  { %v7381_v1 = vpop.f32.mrb[68].mxu0  ;;  %v5395_v39 = vpop.eup %5394  ;;  %v3399_v48 = vadd.f32 %v3329_v38, %v3319_v15  ;;  %v3331_v32 = vmul.f32 %v5393_v44, %v7198_v53  ;;  %5414 = vrcp.f32 %v3182_v16  ;;  %v3093_v12 = vmul.bf16 1069105081, %v2990_v37 }
 0x385   :  { %8559 = vst [vmem:[#allocation29_spill] sm:$0xff] %v7377_v26  ;;  %v7384_v55 = vpop.f32.mrb[69].mxu1  ;;  %v7386_v42 = vpop.f32.mrb[69].mxu0  ;;  %v3320_v49 = vmul.f32 %v5395_v39, %v7201_v22  ;;  %5416 = vrcp.f32 %v3192_v28  ;;  %v3099_v58 = vmul.bf16 1069105081, %v7370_v30  ;;  %v7391_v23 = vadd.f32 %v2809_v52, %v7305_v45 }
 0x386   :  { %v5397_v50 = vpop.eup %5396  ;;  %v7393_v9 = vpop.f32.mrb[70].mxu1  ;;  %v3425_v44 = vadd.f32 %v3331_v32, %v3321_v59  ;;  %v8561_v34 = vmul.bf16 1069105081, %v7307_v19  ;;  %v7401_v38 = vadd.f32 %v2738_v6, %v7255_v27  ;;  %v8562_v30 = vmul.bf16 1069105081, %v7309_v47 }
 0x387   :  { %8560 = vst [vmem:[#allocation19_spill] sm:$0xff] %v7391_v23  ;;  %v7395_v15 = vpop.f32.mrb[70].mxu0  ;;  %v5399_v53 = vpop.eup %5398  ;;  %v3330_v16 = vmul.f32 %v5397_v50, %v7207_v7  ;;  %v7411_v59 = vadd.f32 %v2811_v5, %v7260_v40  ;;  %v7414_v7 = vadd.f32 %v2740_v51, %v7296_v57  ;;  %v8565_v32 = vmul.bf16 1069105081, %v7314_v33 }
 0x388   :  { %5418 = vpow.bf16 %v8561_v34  ;;  %v7403_v22 = vpop.f32.mrb[71].mxu1  ;;  %v7405_v28 = vpop.f32.mrb[71].mxu0  ;;  %v3322_v37 = vmul.f32 %v5399_v53, %v7204_v35  ;;  %v2923_v50 = vpack.c.bf16 %v7401_v38, %v7367_v56  ;;  %v8566_v53 = vmul.bf16 1069105081, %v7316_v14 }
 0x389   :  { %v5401_v52 = vpop.eup %5400  ;;  %5420 = vpow.bf16 %v8562_v30  ;;  %8563 = vst [vmem:[#allocation26_spill] sm:$0xff] %v7411_v59  ;;  %8564 = vst [vmem:[#allocation21_spill] sm:$0xff] %v7414_v7  ;;  %v3412_v39 = vadd.f32 %v3330_v16, %v3320_v49  ;;  %v2925_v51 = vpack.c.bf16 %v7411_v59, %v7374_v29  ;;  %v2924_v5 = vpack.c.bf16 %v7414_v7, %v7377_v26 }
 0x38a   :  { %v5403_v19 = vpop.eup %5402  ;;  %v3332_v6 = vmul.f32 %v5401_v52, %v7210_v46  ;;  %5422 = vpow.bf16 %v8565_v32  ;;  %v2963_v16 = vsub.bf16 0, %v2923_v50 }
 0x38b   :  { %v5405_v35 = vpop.eup %5404  ;;  %v3339_v47 = vmul.f32 %v5403_v19, %v7221_v25  ;;  %5424 = vpow.bf16 %v8566_v53  ;;  %v2965_v25 = vsub.bf16 0, %v2925_v51  ;;  %v7430_v14 = vpop.f32.mrb[72].mxu1 }
 0x38c   :  { %v5407_v49 = vpop.eup %5406  ;;  %v3438_v46 = vadd.f32 %v3332_v6, %v3322_v37  ;;  %v3349_v33 = vmul.f32 %v5405_v35, %v7230_v2  ;;  %5426 = vpow.bf16 %v3090_v60  ;;  %v7432_v19 = vpop.f32.mrb[72].mxu0  ;;  %v3012_v7 = vmul.bf16 1069105081, %v2963_v16 }
 0x38d   :  { %v5409_v34 = vpop.eup %5408  ;;  %v3400_v52 = vadd.f32 %v3399_v48, %v3339_v47  ;;  %v3341_v30 = vmul.f32 %v5407_v49, %v7224_v20  ;;  %5428 = vpow.bf16 %v3096_v21  ;;  %v2964_v37 = vsub.bf16 0, %v2924_v5  ;;  %v7435_v6 = vpop.f32.mrb[73].mxu1 }
 0x38e   :  { %v5411_v32 = vpop.eup %5410  ;;  %v3351_v53 = vmul.f32 %v5409_v34, %v7233_v36  ;;  %5430 = vpow.bf16 %v3093_v12  ;;  %v7437_v2 = vpop.f32.mrb[73].mxu0  ;;  %v3018_v12 = vmul.bf16 1069105081, %v2965_v25 }
 0x38f   :  { %v5413_v60 = vpop.eup %5412  ;;  %v7439_v48 = vadd.f32 %v3400_v52, %v3349_v33  ;;  %v3426_v20 = vadd.f32 %v3425_v44, %v3341_v30  ;;  %v3340_v21 = vmul.f32 %v5411_v32, %v7227_v18  ;;  %5432 = vpow.bf16 %v3099_v58  ;;  %v7442_v50 = vpop.f32.mrb[74].mxu1 }
 0x390   :  { %v7444_v35 = vpop.f32.mrb[74].mxu0  ;;  %v5415_v47 = vpop.eup %5414  ;;  %v3350_v36 = vmul.f32 %v5413_v60, %v7239_v41  ;;  %5434 = vpow.bf16 %v3012_v7  ;;  %v3015_v51 = vmul.bf16 1069105081, %v2964_v37  ;;  %v7456_v58 = vadd.f32 %v7355_v0, %v7305_v45 }
 0x391   :  { %v7447_v5 = vpop.f32.mrb[75].mxu1  ;;  %v7449_v49 = vpop.f32.mrb[75].mxu0  ;;  %v7451_v16 = vadd.f32 %v3426_v20, %v3351_v53  ;;  %v3413_v44 = vadd.f32 %v3412_v39, %v3340_v21  ;;  %v3342_v18 = vmul.f32 %v5415_v47, %v7236_v63  ;;  %5436 = vpow.bf16 %v3018_v12 }
 0x392   :  { %v5417_v33 = vpop.eup %5416  ;;  %8567 = vst [vmem:[#allocation22_spill] sm:$0xff] %v7456_v58  ;;  %v7461_v41 = vadd.f32 %v7379_v17, %v7255_v27  ;;  %v7465_v7 = vadd.f32 %v7381_v1, %v7260_v40  ;;  %5438 = vpow.bf16 %v3015_v51  ;;  %v2926_v63 = vpack.c.bf16 %v7456_v58, %v7391_v23 }
 0x393   :  { %v3352_v34 = vmul.f32 %v5417_v33, %v7242_v62  ;;  %v5419_v52 = vpop.eup %5418  ;;  %v7467_v30 = vadd.f32 %v3413_v44, %v3350_v36  ;;  %v3439_v39 = vadd.f32 %v3438_v46, %v3342_v18  ;;  %v7473_v62 = vadd.f32 %v7384_v55, %v7296_v57  ;;  %v7491_v55 = vpop.f32.mrb[76].mxu1 }
 0x394   :  { %8568 = vst [vmem:[#allocation30_spill] sm:$0xff] %v7461_v41  ;;  %v5421_v0 = vpop.eup %5420  ;;  %v3139_v25 = vadd.bf16 1065369472, %v5419_v52  ;;  %v7477_v17 = vadd.f32 %v7386_v42, %v7305_v45  ;;  %v7481_v1 = vadd.f32 %v7393_v9, %v7255_v27  ;;  %v7485_v37 = vsub.bf16 0, %v2926_v63  ;;  %8570 = vst [vmem:[#allocation11_spill] sm:$0xff] %v7491_v55  ;;  %v7493_v20 = vpop.f32.mrb[76].mxu0 }
 0x395   :  { %v5423_v32 = vpop.eup %5422  ;;  %v7483_v46 = vadd.f32 %v3439_v39, %v3352_v34  ;;  %v3141_v53 = vadd.bf16 1065369472, %v5421_v0  ;;  %v7489_v60 = vadd.f32 %v7395_v15, %v7260_v40  ;;  %8571 = vst [vmem:[#allocation31_spill] sm:$0xff] %v7493_v20  ;;  %v7497_v12 = vpop.f32.mrb[77].mxu1 }
 0x396   :  { %8569 = vst [vmem:[#allocation23_spill] sm:$0xff] %v7481_v1  ;;  %v5425_v42 = vpop.eup %5424  ;;  %v3199_v21 = vunpack.c.l.bf16 %v3139_v25  ;;  %v3209_v47 = vunpack.c.h.bf16 %v3139_v25  ;;  %v3140_v36 = vadd.bf16 1065369472, %v5423_v32  ;;  %v2933_v9 = vpack.c.bf16 %v7481_v1, %v7461_v41  ;;  %8572 = vst [vmem:[#allocation32_spill] sm:$0xff] %v7497_v12  ;;  %v7499_v51 = vpop.f32.mrb[77].mxu0 }
 0x397   :  { %8573 = vst [vmem:[#allocation33_spill] sm:$0xff] %v7499_v51  ;;  %v5427_v33 = vpop.eup %5426  ;;  %v3201_v44 = vunpack.c.l.bf16 %v3141_v53  ;;  %v3211_v18 = vunpack.c.h.bf16 %v3141_v53  ;;  %v3142_v15 = vadd.bf16 1065369472, %v5425_v42  ;;  %v7502_v52 = vpop.f32.mrb[78].mxu1 }
 0x398   :  { %8574 = vst [vmem:[#allocation34_spill] sm:$0xff] %v7502_v52  ;;  %v7504_v39 = vpop.f32.mrb[78].mxu0  ;;  %v5429_v63 = vpop.eup %5428  ;;  %5440 = vrcp.f32 %v3199_v21  ;;  %v3200_v0 = vunpack.c.l.bf16 %v3140_v36  ;;  %v3210_v25 = vunpack.c.h.bf16 %v3140_v36  ;;  %v3149_v32 = vadd.bf16 1065369472, %v5427_v33 }
 0x399   :  { %8575 = vst [vmem:[#allocation35_spill] sm:$0xff] %v7504_v39  ;;  %v7506_v1 = vpop.f32.mrb[79].mxu1  ;;  %v7508_v41 = vpop.f32.mrb[79].mxu0  ;;  %5442 = vrcp.f32 %v3209_v47  ;;  %v3202_v23 = vunpack.c.l.bf16 %v3142_v15  ;;  %v3212_v53 = vunpack.c.h.bf16 %v3142_v15  ;;  %v3151_v42 = vadd.bf16 1065369472, %v5429_v63 }
 0x39a   :  { %8576 = vst [vmem:[#allocation36_spill] sm:$0xff] %v7506_v1  ;;  %8577 = vst [vmem:[#allocation37_spill] sm:$0xff] %v7508_v41  ;;  %v5431_v58 = vpop.eup %5430  ;;  %5444 = vrcp.f32 %v3201_v44  ;;  %v3219_v34 = vunpack.c.l.bf16 %v3149_v32  ;;  %v3229_v52 = vunpack.c.h.bf16 %v3149_v32  ;;  %v7510_v15 = vsub.bf16 0, %v2933_v9 }
 0x39b   :  { %v5433_v51 = vpop.eup %5432  ;;  %v3150_v12 = vadd.bf16 1065369472, %v5431_v58  ;;  %5446 = vrcp.f32 %v3211_v18  ;;  %v3221_v21 = vunpack.c.l.bf16 %v3151_v42  ;;  %v3231_v20 = vunpack.c.h.bf16 %v3151_v42  ;;  %v7512_v63 = vpop.f32.mrb[80].mxu1 }
 0x39c   :  { %v5435_v39 = vpop.eup %5434  ;;  %v3152_v36 = vadd.bf16 1065369472, %v5433_v51  ;;  %5448 = vrcp.f32 %v3200_v0  ;;  %v7514_v59 = vpop.f32.mrb[81].mxu1 }
 0x39d   :  { %v3220_v33 = vunpack.c.l.bf16 %v3150_v12  ;;  %v3230_v1 = vunpack.c.h.bf16 %v3150_v12  ;;  %v3123_v55 = vadd.bf16 1065369472, %v5435_v39  ;;  %v5437_v41 = vpop.eup %5436  ;;  %5450 = vrcp.f32 %v3210_v25  ;;  %v7519_v0 = vpop.f32.mrb[82].mxu1 }
 0x39e   :  { %v3222_v47 = vunpack.c.l.bf16 %v3152_v36  ;;  %v3232_v26 = vunpack.c.h.bf16 %v3152_v36  ;;  %v5439_v44 = vpop.eup %5438  ;;  %5452 = vrcp.f32 %v3202_v23  ;;  %v3125_v18 = vadd.bf16 1065369472, %v5437_v41  ;;  %8578 = vst [vmem:[#allocation38_spill] sm:$0xff] %v7519_v0 }
 0x39f   :  { %v3163_v58 = vunpack.c.l.bf16 %v3123_v55  ;;  %v3173_v32 = vunpack.c.h.bf16 %v3123_v55  ;;  %5454 = vrcp.f32 %v3212_v53  ;;  %v3124_v51 = vadd.bf16 1065369472, %v5439_v44  ;;  %v7525_v55 = vpop.f32.mrb[83].mxu1 }
 0x3a0   :  { %v2935_v39 = vpack.c.bf16 %v7489_v60, %v7465_v7  ;;  %5456 = vrcp.f32 %v3219_v34  ;;  %v3165_v9 = vunpack.c.l.bf16 %v3125_v18  ;;  %v3175_v25 = vunpack.c.h.bf16 %v3125_v18  ;;  %8579 = vst [vmem:[#allocation15_spill] sm:$0xff] %v7525_v55 }
 0x3a1   :  { %v7523_v23 = vadd.f32 %v7403_v22, %v7296_v57  ;;  %5458 = vrcp.f32 %v3229_v52  ;;  %v3164_v41 = vunpack.c.l.bf16 %v3124_v51  ;;  %v7527_v53 = vunpack.c.h.bf16 %v3124_v51 }
 0x3a2   :  { %v7529_v42 = vsub.bf16 0, %v2935_v39  ;;  %v5441_v36 = vpop.eup %5440  ;;  %5460 = vrcp.f32 %v3221_v21  ;;  %v7535_v34 = vadd.f32 %v7405_v28, %v7305_v45  ;;  %v7539_v22 = vadd.f32 %v7430_v14, %v7255_v27 }
 0x3a3   :  { %v2934_v44 = vpack.c.bf16 %v7523_v23, %v7473_v62  ;;  %v5443_v18 = vpop.eup %5442  ;;  %v3359_v52 = vmul.f32 %v5441_v36, %v7263_v11  ;;  %5462 = vrcp.f32 %v3231_v20  ;;  %v7545_v21 = vadd.f32 %v7432_v19, %v7260_v40  ;;  %v7558_v19 = vpop.f32.mrb[84].mxu1 }
 0x3a4   :  { %v5445_v39 = vpop.eup %5444  ;;  %v3369_v12 = vmul.f32 %v5443_v18, %v7272_v43  ;;  %5464 = vrcp.f32 %v3220_v33  ;;  %v2936_v14 = vpack.c.bf16 %v7535_v34, %v7477_v17  ;;  %v7556_v20 = vadd.f32 %v7435_v6, %v7296_v57  ;;  %v7564_v18 = vpop.f32.mrb[85].mxu1 }
 0x3a5   :  { %v7548_v28 = vsub.bf16 0, %v2934_v44  ;;  %v5447_v55 = vpop.eup %5446  ;;  %v3402_v0 = vadd.f32 %v7439_v48, %v3359_v52  ;;  %v3361_v11 = vmul.f32 %v5445_v39, %v7266_v3  ;;  %5466 = vrcp.f32 %v3230_v1  ;;  %v7568_v6 = vpop.f32.mrb[86].mxu1 }
 0x3a6   :  { %v5449_v36 = vpop.eup %5448  ;;  %v3371_v43 = vmul.f32 %v5447_v55, %v7275_v31  ;;  %5468 = vrcp.f32 %v3222_v47  ;;  %v7562_v44 = vsub.bf16 0, %v2936_v14  ;;  %v7574_v47 = vadd.f32 %v7437_v2, %v7305_v45  ;;  %v7576_v55 = vpop.f32.mrb[87].mxu1 }
 0x3a7   :  { %v3045_v33 = vmul.bf16 1069105081, %v7548_v28  ;;  %v5451_v48 = vpop.eup %5450  ;;  %v3403_v52 = vadd.f32 %v3402_v0, %v3369_v12  ;;  %v3428_v3 = vadd.f32 %v7451_v16, %v3361_v11  ;;  %v3360_v1 = vmul.f32 %v5449_v36, %v7269_v13 }
 0x3a8   :  { %5470 = vrcp.f32 %v3232_v26  ;;  %v5453_v39 = vpop.eup %5452  ;;  %v3370_v51 = vmul.f32 %v5451_v48, %v7281_v54  ;;  %v3051_v31 = vmul.bf16 1069105081, %v7562_v44  ;;  %v7583_v54 = vadd.f32 %v7442_v50, %v7255_v27  ;;  %v8580_v48 = vld [vmem:[#allocation9_spill] sm:$0xff] }
 0x3a9   :  { %5472 = vrcp.f32 %v3163_v58  ;;  %v5455_v12 = vpop.eup %5454  ;;  %v3429_v0 = vadd.f32 %v3428_v3, %v3371_v43  ;;  %v3415_v16 = vadd.f32 %v7467_v30, %v3360_v1  ;;  %v3362_v13 = vmul.f32 %v5453_v39, %v7278_v8 }
 0x3aa   :  { %5474 = vrcp.f32 %v3173_v32  ;;  %v5457_v26 = vpop.eup %5456  ;;  %v3372_v14 = vmul.f32 %v5455_v12, %v7284_v10  ;;  %v7587_v2 = vadd.f32 %v7444_v35, %v7260_v40  ;;  %v2943_v10 = vpack.c.bf16 %v7583_v54, %v7539_v22 }
 0x3ab   :  { %5476 = vrcp.f32 %v3165_v9  ;;  %v5459_v58 = vpop.eup %5458  ;;  %v3416_v11 = vadd.f32 %v3415_v16, %v3370_v51  ;;  %v3441_v36 = vadd.f32 %v7483_v46, %v3362_v13  ;;  %v3379_v30 = vmul.f32 %v5457_v26, %v7326_v4  ;;  %v7598_v46 = vpop.f32.mrb[88].mxu1 }
 0x3ac   :  { %5478 = vrcp.f32 %v3175_v25  ;;  %v5461_v8 = vpop.eup %5460  ;;  %v3389_v32 = vmul.f32 %v5459_v58, %v7338_v24  ;;  %v2945_v50 = vpack.c.bf16 %v7587_v2, %v7545_v21  ;;  %v8581_v25 = vld [vmem:[#allocation25_spill] sm:$0xff]  ;;  %v8582_v24 = vmul.bf16 1069105081, %v7485_v37  ;;  %v7603_v39 = vpop.f32.mrb[89].mxu1 }
 0x3ad   :  { %5480 = vrcp.f32 %v3164_v41  ;;  %v5463_v9 = vpop.eup %5462  ;;  %v3442_v35 = vadd.f32 %v3441_v36, %v3372_v14  ;;  %v3404_v43 = vadd.f32 %v3403_v52, %v3379_v30  ;;  %v3381_v51 = vmul.f32 %v5461_v8, %v8580_v48  ;;  %v8583_v52 = vld [vmem:[#allocation24_spill] sm:$0xff]  ;;  %v8585_v36 = vld [vmem:[#allocation27_spill] sm:$0xff] }
 0x3ae   :  { %5482 = vrcp.f32 %v7527_v53  ;;  %v5465_v4 = vpop.eup %5464  ;;  %v3391_v3 = vmul.f32 %v5463_v9, %v8581_v25  ;;  %v2983_v41 = vsub.bf16 0, %v2943_v10  ;;  %v2985_v1 = vsub.bf16 0, %v2945_v50  ;;  %v7608_v53 = vpop.f32.mrb[90].mxu1 }
 0x3af   :  { %5484 = vpow.bf16 %v8582_v24  ;;  %v5467_v12 = vpop.eup %5466  ;;  %v3405_v16 = vadd.f32 %v3404_v43, %v3389_v32  ;;  %v3430_v13 = vadd.f32 %v3429_v0, %v3381_v51  ;;  %v3380_v26 = vmul.f32 %v5465_v4, %v8583_v52  ;;  %v7613_v50 = vpop.f32.mrb[91].mxu1  ;;  %v8587_v51 = vld [vmem:[#allocation28_spill] sm:$0xff] }
 0x3b0   :  { %v8584_v14 = vmul.bf16 1069105081, %v7510_v15  ;;  %v5469_v58 = vpop.eup %5468  ;;  %v3390_v30 = vmul.f32 %v5467_v12, %v8585_v36  ;;  %v8586_v37 = vmul.bf16 1069105081, %v7529_v42  ;;  %v3072_v8 = vmul.bf16 1069105081, %v2983_v41 }
 0x3b1   :  { %v3078_v10 = vmul.bf16 1069105081, %v2985_v1  ;;  %v3406_v32 = vrot.slane %v3405_v16, 4  ;;  %v3431_v0 = vadd.f32 %v3430_v13, %v3391_v3  ;;  %v3417_v43 = vadd.f32 %v3416_v11, %v3380_v26 }
 0x3b2   :  { %5486 = vpow.bf16 %v8584_v14  ;;  %v5471_v9 = vpop.eup %5470  ;;  %v3382_v48 = vmul.f32 %v5469_v58, %v7335_v61  ;;  %v7621_v42 = vadd.f32 %v7447_v5, %v7296_v57  ;;  %v7625_v25 = vadd.f32 %v7449_v49, %v7305_v45  ;;  %v8588_v58 = vld [vmem:[#allocation26_spill] sm:$0xff] }
 0x3b3   :  { %5488 = vpow.bf16 %v8586_v37  ;;  %v5473_v15 = vpop.eup %5472  ;;  %v3392_v4 = vmul.f32 %v5471_v9, %v8587_v51  ;;  %v3407_v41 = vadd.f32 %v3406_v32, %v3405_v16  ;;  %v3432_v3 = vrot.slane %v3431_v0, 4  ;;  %v7633_v16 = vpop.f32.mrb[92].mxu1 }
 0x3b4   :  { %5490 = vpow.bf16 %v3045_v33  ;;  %v5475_v24 = vpop.eup %5474  ;;  %v3418_v11 = vadd.f32 %v3417_v43, %v3390_v30  ;;  %v3443_v1 = vadd.f32 %v3442_v35, %v3382_v48  ;;  %v3323_v12 = vmul.f32 %v5473_v15, %v7367_v56  ;;  %v7639_v44 = vpop.f32.mrb[93].mxu1  ;;  %v8589_v43 = vld [vmem:[#allocation29_spill] sm:$0xff] }
 0x3b5   :  { %v5477_v61 = vpop.eup %5476  ;;  %v3333_v13 = vmul.f32 %v5475_v24, %v7401_v38  ;;  %5492 = vpow.bf16 %v3051_v31  ;;  %v2944_v5 = vpack.c.bf16 %v7621_v42, %v7556_v20  ;;  %v3408_v33 = vrot.slane %v3407_v41, 2  ;;  %v7641_v32 = vpop.f32.mrb[94].mxu1  ;;  %v8590_v15 = vld [vmem:[#allocation21_spill] sm:$0xff] }
 0x3b6   :  { %v5479_v28 = vpop.eup %5478  ;;  %v3433_v49 = vadd.f32 %v3432_v3, %v3431_v0  ;;  %v3419_v52 = vrot.slane %v3418_v11, 4  ;;  %v3444_v26 = vadd.f32 %v3443_v1, %v3392_v4  ;;  %v3325_v56 = vmul.f32 %v5477_v61, %v7374_v29  ;;  %v7647_v29 = vpop.f32.mrb[95].mxu1 }
 0x3b7   :  { %v5481_v14 = vpop.eup %5480  ;;  %v7635_v35 = vadd.f32 %v3333_v13, %v3323_v12  ;;  %v3335_v38 = vmul.f32 %v5479_v28, %v8588_v58  ;;  %5494 = vpow.bf16 %v3072_v8  ;;  %v3409_v36 = vadd.f32 %v3408_v33, %v3407_v41 }
 0x3b8   :  { %v5483_v31 = vpop.eup %5482  ;;  %v3434_v30 = vrot.slane %v3433_v49, 2  ;;  %v3420_v37 = vadd.f32 %v3419_v52, %v3418_v11  ;;  %v3445_v9 = vrot.slane %v3444_v26, 4  ;;  %v3324_v48 = vmul.f32 %v5481_v14, %v8589_v43 }
 0x3b9   :  { %v7643_v0 = vadd.f32 %v3335_v38, %v3325_v56  ;;  %v3334_v51 = vmul.f32 %v5483_v31, %v8590_v15  ;;  %5496 = vpow.bf16 %v3078_v10  ;;  %v3410_v8 = vrot.slane %v3409_v36, 1 }
 0x3ba   :  { %v5485_v4 = vpop.eup %5484  ;;  %v3435_v24 = vadd.f32 %v3434_v30, %v3433_v49  ;;  %v3421_v3 = vrot.slane %v3420_v37, 2  ;;  %v3446_v1 = vadd.f32 %v3445_v9, %v3444_v26  ;;  %v7651_v12 = vsub.bf16 0, %v2944_v5 }
 0x3bb   :  { %v7649_v61 = vadd.f32 %v3334_v51, %v3324_v48  ;;  %v3126_v11 = vadd.bf16 1065369472, %v5485_v4  ;;  %v2946_v13 = vpack.c.bf16 %v7625_v25, %v7574_v47  ;;  %v3411_v33 = vadd.f32 %v3410_v8, %v3409_v36 }
 0x3bc   :  { %v3436_v52 = vrot.slane %v3435_v24, 1  ;;  %v3422_v10 = vadd.f32 %v3421_v3, %v3420_v37  ;;  %v3447_v14 = vrot.slane %v3446_v1, 2  ;;  %v3075_v43 = vmul.bf16 1069105081, %v7651_v12 }
 0x3bd   :  { %v5487_v41 = vpop.eup %5486  ;;  %v3166_v56 = vunpack.c.l.bf16 %v3126_v11  ;;  %v3176_v58 = vunpack.c.h.bf16 %v3126_v11 }
 0x3be   :  { %v5489_v28 = vpop.eup %5488  ;;  %v3133_v38 = vadd.bf16 1065369472, %v5487_v41  ;;  %v3437_v26 = vadd.f32 %v3436_v52, %v3435_v24  ;;  %v3423_v30 = vrot.slane %v3422_v10, 1  ;;  %v3448_v9 = vadd.f32 %v3447_v14, %v3446_v1  ;;  %v8591_v1 = vld [vmem:[#allocation11_spill] sm:$0xff] }
 0x3bf   :  { %v3135_v49 = vadd.bf16 1065369472, %v5489_v28  ;;  %v5491_v31 = vpop.eup %5490  ;;  %5498 = vrcp.f32 %v3166_v56  ;;  %v2986_v41 = vsub.bf16 0, %v2946_v13  ;;  %v7658_v52 = vadd.f32 %v8591_v1, %v7255_v27 }
 0x3c0   :  { %v3183_v5 = vunpack.c.l.bf16 %v3133_v38  ;;  %v3193_v48 = vunpack.c.h.bf16 %v3133_v38  ;;  %v5493_v51 = vpop.eup %5492  ;;  %v3424_v4 = vadd.f32 %v3423_v30, %v3422_v10  ;;  %v3449_v36 = vrot.slane %v3448_v9, 1  ;;  %v8592_v30 = vld [vmem:[#allocation10_spill] sm:$0xff] }
 0x3c1   :  { %v3185_v15 = vunpack.c.l.bf16 %v3135_v49  ;;  %5500 = vrcp.f32 %v3176_v58  ;;  %v3195_v37 = vunpack.c.h.bf16 %v3135_v49  ;;  %v3134_v8 = vadd.bf16 1065369472, %v5491_v31 }
 0x3c2   :  { %5502 = vrcp.f32 %v3183_v5  ;;  %v3136_v3 = vadd.bf16 1065369472, %v5493_v51  ;;  %v5495_v11 = vpop.eup %5494  ;;  %v3553_v28 = vcombine.low %v3411_v33, %v3424_v4  ;;  %v3450_v24 = vadd.f32 %v3449_v36, %v3448_v9 }
 0x3c3   :  { %5504 = vrcp.f32 %v3193_v48  ;;  %v3184_v14 = vunpack.c.l.bf16 %v3134_v8  ;;  %v3194_v56 = vunpack.c.h.bf16 %v3134_v8  ;;  %v3143_v13 = vadd.bf16 1065369472, %v5495_v11  ;;  %v8593_v48 = vld [vmem:[#allocation31_spill] sm:$0xff] }
 0x3c4   :  { %5506 = vrcp.f32 %v3185_v15  ;;  %v3186_v38 = vunpack.c.l.bf16 %v3136_v3  ;;  %v5497_v10 = vpop.eup %5496  ;;  %v3563_v58 = vrot.slane %v3553_v28, %v8592_v30  ;;  %v3554_v49 = vcombine.low %v3437_v26, %v3450_v24  ;;  %v8594_v15 = vld [vmem:[#allocation32_spill] sm:$0xff]  ;;  %v8596_v24 = vld [vmem:[#allocation34_spill] sm:$0xff] }
 0x3c5   :  { %5508 = vrcp.f32 %v3195_v37  ;;  %v3196_v31 = vunpack.c.h.bf16 %v3136_v3  ;;  %v3145_v5 = vadd.bf16 1065369472, %v5497_v10  ;;  %v3081_v33 = vmul.bf16 1069105081, %v2986_v41  ;;  %v8595_v41 = vld [vmem:[#allocation33_spill] sm:$0xff] }
 0x3c6   :  { %5510 = vrcp.f32 %v3184_v14  ;;  %v3570_v9 = vrot.slane %v3554_v49, %v8592_v30  ;;  %v7664_v51 = vadd.f32 %v8593_v48, %v7260_v40  ;;  %v7668_v4 = vadd.f32 %v8594_v15, %v7296_v57  ;;  %v8597_v14 = vld [vmem:[#allocation35_spill] sm:$0xff]  ;;  %v8602_v48 = vld [vmem:[#allocation22_spill] sm:$0xff] }
 0x3c7   :  { %5512 = vrcp.f32 %v3194_v56  ;;  %v3203_v36 = vunpack.c.l.bf16 %v3143_v13  ;;  %v3213_v26 = vunpack.c.h.bf16 %v3143_v13  ;;  %v3205_v37 = vunpack.c.l.bf16 %v3145_v5 }
 0x3c8   :  { %5514 = vrcp.f32 %v3186_v38  ;;  %v3585_v8 = vcombine.low %v3563_v58, %v3570_v9  ;;  %v3215_v3 = vunpack.c.h.bf16 %v3145_v5  ;;  %v7672_v11 = vadd.f32 %v8595_v41, %v7305_v45  ;;  %v8598_v38 = vld [vmem:[#allocation36_spill] sm:$0xff]  ;;  %v8601_v5 = vld [vmem:[#allocation37_spill] sm:$0xff] }
 0x3c9   :  { %5516 = vrcp.f32 %v3196_v31  ;;  %v5499_v28 = vpop.eup %5498  ;;  %v7676_v1 = vadd.f32 %v8596_v24, %v7255_v27  ;;  %v7680_v56 = vadd.f32 %v8597_v14, %v7260_v40  ;;  %v7684_v10 = vadd.f32 %v8598_v38, %v7296_v57  ;;  %v8600_v31 = vld [vmem:[#allocation19_spill] sm:$0xff] }
 0x3ca   :  { %5518 = vrcp.f32 %v3203_v36  ;;  %v7687_v49 = vrot.slane %v3585_v8, %v8592_v30  ;;  %v3326_v13 = vmul.f32 %v5499_v28, %v8600_v31  ;;  %v7692_v9 = vadd.f32 %v8601_v5, %v7305_v45  ;;  %v8603_v8 = vld [vmem:[#allocation30_spill] sm:$0xff]  ;;  %v8604_v14 = vld [vmem:[#allocation23_spill] sm:$0xff] }
 0x3cb   :  { %v5501_v58 = vpop.eup %5500  ;;  %5520 = vrcp.f32 %v3213_v26  ;;  %v2953_v40 = vpack.c.bf16 %v7676_v1, %v7658_v52  ;;  %v2955_v57 = vpack.c.bf16 %v7680_v56, %v7664_v51  ;;  %v2954_v26 = vpack.c.bf16 %v7684_v10, %v7668_v4 }
 0x3cc   :  { %8599 = vst [vmem:[#allocation12_spill] sm:$0xff] %v7687_v49  ;;  %v5503_v27 = vpop.eup %5502  ;;  %v3336_v15 = vmul.f32 %v5501_v58, %v8602_v48  ;;  %5522 = vrcp.f32 %v3205_v37  ;;  %v2956_v45 = vpack.c.bf16 %v7692_v9, %v7672_v11 }
 0x3cd   :  { %v5505_v36 = vpop.eup %5504  ;;  %v3343_v41 = vmul.f32 %v5503_v27, %v8603_v8  ;;  %5524 = vrcp.f32 %v3215_v3  ;;  %v2993_v38 = vsub.bf16 0, %v2953_v40  ;;  %v2995_v3 = vsub.bf16 0, %v2955_v57 }
 0x3ce   :  { %v5507_v28 = vpop.eup %5506  ;;  %v3490_v24 = vadd.f32 %v3336_v15, %v3326_v13  ;;  %v3353_v37 = vmul.f32 %v5505_v36, %v8604_v14  ;;  %5526 = vpow.bf16 %v3075_v43  ;;  %v2994_v49 = vsub.bf16 0, %v2954_v26  ;;  %v8606_v14 = vld [vmem:[#allocation20_spill] sm:$0xff] }
 0x3cf   :  { %v5509_v58 = vpop.eup %5508  ;;  %v3452_v31 = vadd.f32 %v7635_v35, %v3343_v41  ;;  %v3345_v5 = vmul.f32 %v5507_v28, %v7465_v7  ;;  %5528 = vpow.bf16 %v3081_v33  ;;  %v3102_v8 = vmul.bf16 1069105081, %v2993_v38 }
 0x3d0   :  { %v5511_v27 = vpop.eup %5510  ;;  %v3355_v48 = vmul.f32 %v5509_v58, %v7489_v60  ;;  %v2996_v30 = vsub.bf16 0, %v2956_v45  ;;  %v3108_v43 = vmul.bf16 1069105081, %v2995_v3  ;;  %v3105_v7 = vmul.bf16 1069105081, %v2994_v49 }
 0x3d1   :  { %v5513_v13 = vpop.eup %5512  ;;  %v3453_v15 = vadd.f32 %v3452_v31, %v3353_v37  ;;  %v3478_v36 = vadd.f32 %v7643_v0, %v3345_v5  ;;  %v3344_v12 = vmul.f32 %v5511_v27, %v7473_v62  ;;  %5530 = vpow.bf16 %v3102_v8  ;;  %v8605_v0 = vld [vmem:[#allocation18_spill] sm:$0xff] }
 0x3d2   :  { %v5515_v40 = vpop.eup %5514  ;;  %v3354_v35 = vmul.f32 %v5513_v13, %v7523_v23  ;;  %v3111_v33 = vmul.bf16 1069105081, %v2996_v30  ;;  %5532 = vpow.bf16 %v3108_v43  ;;  %v7718_v62 = vadd.f32 %v7512_v63, %v8605_v0  ;;  %v8608_v63 = vld [vmem:[#allocation15_spill] sm:$0xff] }
 0x3d3   :  { %v5517_v57 = vpop.eup %5516  ;;  %v3479_v41 = vadd.f32 %v3478_v36, %v3355_v48  ;;  %v3465_v60 = vadd.f32 %v7649_v61, %v3344_v12  ;;  %v3346_v26 = vmul.f32 %v5515_v40, %v7477_v17  ;;  %5534 = vpow.bf16 %v3105_v7 }
 0x3d4   :  { %v5519_v45 = vpop.eup %5518  ;;  %v3356_v28 = vmul.f32 %v5517_v57, %v7535_v34  ;;  %v7722_v23 = vadd.f32 %v7514_v59, %v8606_v14  ;;  %5536 = vpow.bf16 %v3111_v33  ;;  %v8607_v34 = vld [vmem:[#allocation38_spill] sm:$0xff]  ;;  %v7734_v31 = vadd.f32 %v8608_v63, %v8606_v14 }
 0x3d5   :  { %v5521_v30 = vpop.eup %5520  ;;  %v7724_v49 = vadd.f32 %v3465_v60, %v3354_v35  ;;  %v3491_v37 = vadd.f32 %v3490_v24, %v3346_v26  ;;  %v3363_v61 = vmul.f32 %v5519_v45, %v7539_v22  ;;  %v7730_v58 = vadd.f32 %v8607_v34, %v8605_v0  ;;  %v3666_v60 = vld [vmem:[%s8402_s5 + $0x110] sm:$0xff] }
 0x3d6   :  { %v5523_v17 = vpop.eup %5522  ;;  %v3373_v38 = vmul.f32 %v5521_v30, %v7583_v54  ;;  %v7738_v59 = vadd.f32 %v7558_v19, %v8605_v0  ;;  %v7745_v54 = vadd.f32 %v7564_v18, %v8606_v14  ;;  %v2928_v8 = vpack.c.bf16 %v7734_v31, %v7722_v23 }
 0x3d7   :  { %v5525_v5 = vpop.eup %5524  ;;  %v7740_v24 = vadd.f32 %v3491_v37, %v3356_v28  ;;  %v3454_v22 = vadd.f32 %v3453_v15, %v3363_v61  ;;  %v3365_v3 = vmul.f32 %v5523_v17, %v7545_v21  ;;  %v2927_v48 = vpack.c.bf16 %v7730_v58, %v7718_v62 }
 0x3d8   :  { %v3375_v27 = vmul.f32 %v5525_v5, %v7587_v2  ;;  %v7754_v19 = vadd.f32 %v7568_v6, %v8605_v0  ;;  %v7760_v18 = vadd.f32 %v7576_v55, %v8606_v14  ;;  %v7764_v2 = vadd.f32 %v7598_v46, %v8605_v0 }
 0x3d9   :  { %v5527_v13 = vpop.eup %5526  ;;  %v7756_v15 = vadd.f32 %v3454_v22, %v3373_v38  ;;  %v3480_v21 = vadd.f32 %v3479_v41, %v3365_v3  ;;  %v7766_v43 = vsub.bf16 0, %v2927_v48  ;;  %v7768_v40 = vsub.bf16 0, %v2928_v8 }
 0x3da   :  { %v5529_v36 = vpop.eup %5528  ;;  %v3144_v12 = vadd.bf16 1065369472, %v5527_v13  ;;  %v2937_v6 = vpack.c.bf16 %v7754_v19, %v7738_v59  ;;  %v2938_v55 = vpack.c.bf16 %v7760_v18, %v7745_v54  ;;  %v7778_v33 = vadd.f32 %v7603_v39, %v8606_v14 }
 0x3db   :  { %v7772_v35 = vadd.f32 %v3480_v21, %v3375_v27  ;;  %v3146_v7 = vadd.bf16 1065369472, %v5529_v36  ;;  %v3024_v41 = vmul.bf16 1069105081, %v7766_v43  ;;  %v7788_v39 = vadd.f32 %v7608_v53, %v8605_v0  ;;  %v3653_v43 = vld [vmem:[%s8402_s5 + $0xa8] sm:$0xff] }
 0x3dc   :  { %v3204_v46 = vunpack.c.l.bf16 %v3144_v12  ;;  %v3214_v57 = vunpack.c.h.bf16 %v3144_v12  ;;  %v5531_v26 = vpop.eup %5530  ;;  %v7782_v30 = vsub.bf16 0, %v2937_v6  ;;  %v7784_v37 = vsub.bf16 0, %v2938_v55  ;;  %v3648_v6 = vld [vmem:[%s8402_s5 + $0x80] sm:$0xff] }
 0x3dd   :  { %v3206_v45 = vunpack.c.l.bf16 %v3146_v7  ;;  %v3216_v28 = vunpack.c.h.bf16 %v3146_v7  ;;  %v5533_v61 = vpop.eup %5532  ;;  %v3153_v17 = vadd.bf16 1065369472, %v5531_v26  ;;  %v7792_v38 = vadd.f32 %v7613_v50, %v8606_v14  ;;  %v3632_v26 = vld [vmem:[%s8402_s5] sm:$0xff] }
 0x3de   :  { %5538 = vrcp.f32 %v3204_v46  ;;  %v5535_v34 = vpop.eup %5534  ;;  %v3155_v63 = vadd.bf16 1065369472, %v5533_v61  ;;  %v2947_v12 = vpack.c.bf16 %v7788_v39, %v7764_v2  ;;  %v7816_v61 = vadd.f32 %v7633_v16, %v8605_v0 }
 0x3df   :  { %5540 = vrcp.f32 %v3214_v57  ;;  %v5537_v3 = vpop.eup %5536  ;;  %v3223_v27 = vunpack.c.l.bf16 %v3153_v17  ;;  %v3233_v48 = vunpack.c.h.bf16 %v3153_v17  ;;  %v3154_v8 = vadd.bf16 1065369472, %v5535_v34  ;;  %v3649_v57 = vld [vmem:[%s8402_s5 + $0x88] sm:$0xff]  ;;  %v3680_v34 = vld [vmem:[%s8402_s5 + $0x180] sm:$0xff] }
 0x3e0   :  { %5542 = vrcp.f32 %v3206_v45  ;;  %v3225_v13 = vunpack.c.l.bf16 %v3155_v63  ;;  %v3235_v53 = vunpack.c.h.bf16 %v3155_v63  ;;  %v3156_v21 = vadd.bf16 1065369472, %v5537_v3  ;;  %v3633_v45 = vld [vmem:[%s8402_s5 + $0x8] sm:$0xff]  ;;  %v3664_v3 = vld [vmem:[%s8402_s5 + $0x100] sm:$0xff] }
 0x3e1   :  { %5544 = vrcp.f32 %v3216_v28  ;;  %v3224_v36 = vunpack.c.l.bf16 %v3154_v8  ;;  %v3234_v50 = vunpack.c.h.bf16 %v3154_v8  ;;  %v2948_v46 = vpack.c.bf16 %v7792_v38, %v7778_v33  ;;  %v3681_v63 = vld [vmem:[%s8402_s5 + $0x188] sm:$0xff]  ;;  %v3650_v8 = vld [vmem:[%s8402_s5 + $0x90] sm:$0xff] }
 0x3e2   :  { %5546 = vrcp.f32 %v3223_v27  ;;  %v3226_v7 = vunpack.c.l.bf16 %v3156_v21  ;;  %v3236_v55 = vunpack.c.h.bf16 %v3156_v21  ;;  %v7812_v28 = vsub.bf16 0, %v2947_v12 }
 0x3e3   :  { %5548 = vrcp.f32 %v3233_v48  ;;  %v7820_v17 = vadd.f32 %v7639_v44, %v8606_v14  ;;  %v7831_v27 = vsub.bf16 0, %v2948_v46  ;;  %v7835_v16 = vadd.f32 %v7641_v32, %v8605_v0  ;;  %v3665_v48 = vld [vmem:[%s8402_s5 + $0x108] sm:$0xff] }
 0x3e4   :  { %5550 = vrcp.f32 %v3225_v13  ;;  %v7839_v44 = vadd.f32 %v7647_v29, %v8606_v14  ;;  %v3651_v13 = vld [vmem:[%s8402_s5 + $0x98] sm:$0xff]  ;;  %v3084_v32 = vmul.bf16 1069105081, %v7812_v28  ;;  %v4649_v0 = vpack.c.bf16 %v3649_v57, %v3648_v6  ;;  %v3634_v29 = vld [vmem:[%s8402_s5 + $0x10] sm:$0xff] }
 0x3e5   :  { %5552 = vrcp.f32 %v3235_v53  ;;  %v4651_v53 = vpack.c.bf16 %v3633_v45, %v3632_v26  ;;  %v2957_v21 = vpack.c.bf16 %v7835_v16, %v7816_v61  ;;  %v3682_v6 = vld [vmem:[%s8402_s5 + $0x190] sm:$0xff]  ;;  %v4681_v57 = vpack.c.bf16 %v3681_v63, %v3680_v34  ;;  %v3652_v63 = vld [vmem:[%s8402_s5 + $0xa0] sm:$0xff] }
 0x3e6   :  { %5554 = vrcp.f32 %v3224_v36  ;;  %v2958_v12 = vpack.c.bf16 %v7839_v44, %v7820_v17  ;;  %v3635_v36 = vld [vmem:[%s8402_s5 + $0x18] sm:$0xff]  ;;  %4650 = vmatprep.subr.bf16.mxu0 %v4649_v0  ;;  %v4683_v26 = vpack.c.bf16 %v3665_v48, %v3664_v3  ;;  %v4653_v45 = vpack.c.bf16 %v3651_v13, %v3650_v8 }
 0x3e7   :  { %5556 = vrcp.f32 %v3234_v50  ;;  %v3683_v50 = vld [vmem:[%s8402_s5 + $0x198] sm:$0xff]  ;;  %v2997_v22 = vsub.bf16 0, %v2957_v21  ;;  %4652 = vmatpush3.bf16.msra.mxu0 %v4651_v53  ;;  %4682 = vmatprep.subr.bf16.mxu1 %v4681_v57  ;;  %v8609_v13 = vmul.bf16 1069105081, %v7768_v40  ;;  %v3637_v53 = vld [vmem:[%s8402_s5 + $0x28] sm:$0xff] }
 0x3e8   :  { %v5539_v46 = vpop.eup %5538  ;;  %5558 = vrcp.f32 %v3226_v7  ;;  %v7869_v5 = vsub.bf16 0, %v2958_v12  ;;  %v3667_v7 = vld [vmem:[%s8402_s5 + $0x118] sm:$0xff]  ;;  %4654 = vmatprep.subr.bf16.mxu0 %v4653_v45  ;;  %4684 = vmatpush3.bf16.msra.mxu1 %v4683_v26  ;;  %v8610_v40 = vmul.bf16 1069105081, %v7782_v30  ;;  %v3669_v30 = vld [vmem:[%s8402_s5 + $0x128] sm:$0xff]  ;;  %v3638_v26 = vld [vmem:[%s8402_s5 + $0x30] sm:$0xff] }
 0x3e9   :  { %v5541_v28 = vpop.eup %5540  ;;  %v3364_v14 = vmul.f32 %v5539_v46, %v7556_v20  ;;  %5560 = vrcp.f32 %v3236_v55  ;;  %v4655_v20 = vpack.c.bf16 %v3635_v36, %v3634_v29  ;;  %v4685_v55 = vpack.c.bf16 %v3683_v50, %v3682_v6  ;;  %v3654_v46 = vld [vmem:[%s8402_s5 + $0xb0] sm:$0xff]  ;;  %v3655_v57 = vld [vmem:[%s8402_s5 + $0xb8] sm:$0xff] }
 0x3ea   :  { %v5543_v0 = vpop.eup %5542  ;;  %v3374_v34 = vmul.f32 %v5541_v28, %v7621_v42  ;;  %5562 = vpow.bf16 %v3024_v41  ;;  %v3114_v42 = vmul.bf16 1069105081, %v2997_v22  ;;  %v3636_v41 = vld [vmem:[%s8402_s5 + $0x20] sm:$0xff]  ;;  %v3117_v22 = vmul.bf16 1069105081, %v7869_v5 }
 0x3eb   :  { %v5545_v3 = vpop.eup %5544  ;;  %v3467_v48 = vadd.f32 %v7724_v49, %v3364_v14  ;;  %v3366_v8 = vmul.f32 %v5543_v0, %v7574_v47  ;;  %5564 = vpow.bf16 %v8609_v13  ;;  %4686 = vmatprep.subr.bf16.mxu1 %v4685_v55  ;;  %v4687_v29 = vpack.c.bf16 %v3667_v7, %v3666_v60  ;;  %v3684_v14 = vld [vmem:[%s8402_s5 + $0x1a0] sm:$0xff]  ;;  %4656 = vmatpush3.bf16.msra.mxu0 %v4655_v20  ;;  %v3639_v0 = vld [vmem:[%s8402_s5 + $0x38] sm:$0xff] }
 0x3ec   :  { %v5547_v49 = vpop.eup %5546  ;;  %v3376_v47 = vmul.f32 %v5545_v3, %v7625_v25  ;;  %5566 = vpow.bf16 %v8610_v40  ;;  %v8611_v50 = vmul.bf16 1069105081, %v7784_v37  ;;  %v3685_v25 = vld [vmem:[%s8402_s5 + $0x1a8] sm:$0xff]  ;;  %v3668_v60 = vld [vmem:[%s8402_s5 + $0x120] sm:$0xff]  ;;  %v4659_v37 = vpack.c.bf16 %v3637_v53, %v3636_v41  ;;  %v3687_v20 = vld [vmem:[%s8402_s5 + $0x1b8] sm:$0xff] }
 0x3ed   :  { %v5549_v21 = vpop.eup %5548  ;;  %v3468_v12 = vadd.f32 %v3467_v48, %v3374_v34  ;;  %v3493_v36 = vadd.f32 %v7740_v24, %v3366_v8  ;;  %v3383_v6 = vmul.f32 %v5547_v49, %v7658_v52  ;;  %v4657_v52 = vpack.c.bf16 %v3653_v43, %v3652_v63  ;;  %4688 = vmatpush3.bf16.msra.mxu1 %v4687_v29  ;;  %v3686_v34 = vld [vmem:[%s8402_s5 + $0x1b0] sm:$0xff]  ;;  %v3657_v43 = vld [vmem:[%s8402_s5 + $0xc8] sm:$0xff] }
 0x3ee   :  { %5568 = vpow.bf16 %v8611_v50  ;;  %v5551_v5 = vpop.eup %5550  ;;  %v3393_v24 = vmul.f32 %v5549_v21, %v7676_v1  ;;  %v3670_v63 = vld [vmem:[%s8402_s5 + $0x130] sm:$0xff]  ;;  %v4693_v49 = vpack.c.bf16 %v3687_v20, %v3686_v34  ;;  %v3641_v40 = vld [vmem:[%s8402_s5 + $0x48] sm:$0xff]  ;;  %v3672_v50 = vld [vmem:[%s8402_s5 + $0x140] sm:$0xff] }
 0x3ef   :  { %5570 = vpow.bf16 %v3084_v32  ;;  %v5553_v45 = vpop.eup %5552  ;;  %v3494_v28 = vadd.f32 %v3493_v36, %v3376_v47  ;;  %v3456_v7 = vadd.f32 %v7756_v15, %v3383_v6  ;;  %v3385_v1 = vmul.f32 %v5551_v5, %v7664_v51  ;;  %4658 = vmatprep.subr.bf16.mxu0 %v4657_v52  ;;  %v3640_v47 = vld [vmem:[%s8402_s5 + $0x40] sm:$0xff]  ;;  %v3689_v6 = vld [vmem:[%s8402_s5 + $0x1c8] sm:$0xff] }
 0x3f0   :  { %v8612_v32 = vmul.bf16 1069105081, %v7831_v27  ;;  %v5555_v55 = vpop.eup %5554  ;;  %v3395_v15 = vmul.f32 %v5553_v45, %v7680_v56  ;;  %v4689_v51 = vpack.c.bf16 %v3685_v25, %v3684_v14  ;;  %v4691_v27 = vpack.c.bf16 %v3669_v30, %v3668_v60  ;;  %4660 = vmatpush3.bf16.msra.mxu0 %v4659_v37  ;;  %v3671_v56 = vld [vmem:[%s8402_s5 + $0x138] sm:$0xff]  ;;  %v3673_v25 = vld [vmem:[%s8402_s5 + $0x148] sm:$0xff] }
 0x3f1   :  { %v5557_v3 = vpop.eup %5556  ;;  %v3457_v48 = vadd.f32 %v3456_v7, %v3393_v24  ;;  %v3482_v8 = vadd.f32 %v7772_v35, %v3385_v1  ;;  %v3384_v13 = vmul.f32 %v5555_v55, %v7668_v4  ;;  %v4661_v35 = vpack.c.bf16 %v3655_v57, %v3654_v46 }
 0x3f2   :  { %5572 = vpow.bf16 %v8612_v32  ;;  %v5559_v41 = vpop.eup %5558  ;;  %v3394_v53 = vmul.f32 %v5557_v3, %v7684_v10  ;;  %4690 = vmatprep.subr.bf16.mxu1 %v4689_v51  ;;  %v4663_v4 = vpack.c.bf16 %v3639_v0, %v3638_v26  ;;  %v4667_v26 = vpack.c.bf16 %v3641_v40, %v3640_v47 }
 0x3f3   :  { %5574 = vpow.bf16 %v3114_v42  ;;  %v3656_v42 = vld [vmem:[%s8402_s5 + $0xc0] sm:$0xff]  ;;  %v5561_v29 = vpop.eup %5560  ;;  %v3458_v14 = vrot.slane %v3457_v48, 4  ;;  %v3483_v21 = vadd.f32 %v3482_v8, %v3395_v15  ;;  %v3469_v10 = vadd.f32 %v3468_v12, %v3384_v13  ;;  %4692 = vmatpush3.bf16.msra.mxu1 %v4691_v27  ;;  %4662 = vmatprep.subr.bf16.mxu0 %v4661_v35 }
 0x3f4   :  { %5576 = vpow.bf16 %v3117_v22  ;;  %v3688_v22 = vld [vmem:[%s8402_s5 + $0x1c0] sm:$0xff]  ;;  %v3386_v36 = vmul.f32 %v5559_v41, %v7672_v11  ;;  %v3396_v60 = vmul.f32 %v5561_v29, %v7692_v9  ;;  %4694 = vmatprep.subr.bf16.mxu1 %v4693_v49  ;;  %v4695_v12 = vpack.c.bf16 %v3671_v56, %v3670_v63  ;;  %4664 = vmatpush3.bf16.msra.mxu0 %v4663_v4 }
 0x3f5   :  { %v4665_v30 = vpack.c.bf16 %v3657_v43, %v3656_v42  ;;  %v5563_v11 = vpop.eup %5562  ;;  %v3459_v5 = vadd.f32 %v3458_v14, %v3457_v48  ;;  %v3484_v24 = vrot.slane %v3483_v21, 4  ;;  %v3470_v52 = vadd.f32 %v3469_v10, %v3394_v53 }
 0x3f6   :  { %v3495_v37 = vadd.f32 %v3494_v28, %v3386_v36  ;;  %v5565_v46 = vpop.eup %5564  ;;  %v3127_v57 = vadd.bf16 1065369472, %v5563_v11  ;;  %v4697_v45 = vpack.c.bf16 %v3689_v6, %v3688_v22  ;;  %v4699_v7 = vpack.c.bf16 %v3673_v25, %v3672_v50 }
 0x3f7   :  { %4666 = vmatprep.subr.bf16.mxu0 %v4665_v30  ;;  %v5567_v1 = vpop.eup %5566  ;;  %v3460_v32 = vrot.slane %v3459_v5, 2  ;;  %v3485_v0 = vadd.f32 %v3484_v24, %v3483_v21  ;;  %v3471_v9 = vrot.slane %v3470_v52, 4  ;;  %4696 = vmatpush3.bf16.msra.mxu1 %v4695_v12  ;;  %v3128_v51 = vadd.bf16 1065369472, %v5565_v46 }
 0x3f8   :  { %v3496_v34 = vadd.f32 %v3495_v37, %v3396_v60  ;;  %v3167_v55 = vunpack.c.l.bf16 %v3127_v57  ;;  %v3177_v15 = vunpack.c.h.bf16 %v3127_v57  ;;  %v3137_v27 = vadd.bf16 1065369472, %v5567_v1  ;;  %4698 = vmatprep.subr.bf16.mxu1 %v4697_v45  ;;  %4668 = vmatpush3.bf16.msra.mxu0 %v4667_v26  ;;  %v3659_v26 = vld [vmem:[%s8402_s5 + $0xd8] sm:$0xff]  ;;  %v3642_v45 = vld [vmem:[%s8402_s5 + $0x50] sm:$0xff] }
 0x3f9   :  { %v5569_v20 = vpop.eup %5568  ;;  %v3461_v63 = vadd.f32 %v3460_v32, %v3459_v5  ;;  %v3486_v3 = vrot.slane %v3485_v0, 2  ;;  %v3472_v48 = vadd.f32 %v3471_v9, %v3470_v52  ;;  %v3168_v56 = vunpack.c.l.bf16 %v3128_v51  ;;  %v3658_v52 = vld [vmem:[%s8402_s5 + $0xd0] sm:$0xff] }
 0x3fa   :  { %v5571_v28 = vpop.eup %5570  ;;  %v3497_v8 = vrot.slane %v3496_v34, 4  ;;  %5578 = vrcp.f32 %v3167_v55  ;;  %v3178_v42 = vunpack.c.h.bf16 %v3128_v51  ;;  %v3187_v43 = vunpack.c.l.bf16 %v3137_v27  ;;  %v3690_v9 = vld [vmem:[%s8402_s5 + $0x1d0] sm:$0xff] }
 0x3fb   :  { %v3462_v53 = vrot.slane %v3461_v63, 1  ;;  %v3487_v35 = vadd.f32 %v3486_v3, %v3485_v0  ;;  %v3473_v4 = vrot.slane %v3472_v48, 2  ;;  %4700 = vmatpush3.bf16.msra.mxu1 %v4699_v7  ;;  %5580 = vrcp.f32 %v3177_v15  ;;  %v3643_v7 = vld [vmem:[%s8402_s5 + $0x58] sm:$0xff] }
 0x3fc   :  { %v3498_v49 = vadd.f32 %v3497_v8, %v3496_v34  ;;  %v3197_v40 = vunpack.c.h.bf16 %v3137_v27  ;;  %v3138_v22 = vadd.bf16 1065369472, %v5569_v20  ;;  %v3147_v29 = vadd.bf16 1065369472, %v5571_v28  ;;  %v3691_v34 = vld [vmem:[%s8402_s5 + $0x1d8] sm:$0xff]  ;;  %v3674_v20 = vld [vmem:[%s8402_s5 + $0x150] sm:$0xff] }
 0x3fd   :  { %v5573_v13 = vpop.eup %5572  ;;  %v3463_v14 = vadd.f32 %v3462_v53, %v3461_v63  ;;  %v3488_v21 = vrot.slane %v3487_v35, 1  ;;  %v3474_v10 = vadd.f32 %v3473_v4, %v3472_v48  ;;  %5582 = vrcp.f32 %v3168_v56  ;;  %v3675_v27 = vld [vmem:[%s8402_s5 + $0x158] sm:$0xff]  ;;  %v3660_v28 = vld [vmem:[%s8402_s5 + $0xe0] sm:$0xff]  ;;  %v3661_v63 = vld [vmem:[%s8402_s5 + $0xe8] sm:$0xff] }
 0x3fe   :  { %v5575_v41 = vpop.eup %5574  ;;  %v3499_v36 = vrot.slane %v3498_v49, 2  ;;  %v3188_v6 = vunpack.c.l.bf16 %v3138_v22  ;;  %v3198_v50 = vunpack.c.h.bf16 %v3138_v22  ;;  %v3207_v25 = vunpack.c.l.bf16 %v3147_v29  ;;  %v3644_v56 = vld [vmem:[%s8402_s5 + $0x60] sm:$0xff] }
 0x3ff   :  { %v5577_v47 = vpop.eup %5576  ;;  %v3489_v60 = vadd.f32 %v3488_v21, %v3487_v35  ;;  %v3475_v12 = vrot.slane %v3474_v10, 1  ;;  %5584 = vrcp.f32 %v3178_v42  ;;  %v3217_v11 = vunpack.c.h.bf16 %v3147_v29  ;;  %v3645_v42 = vld [vmem:[%s8402_s5 + $0x68] sm:$0xff] }
 0x400   :  { %v3500_v30 = vadd.f32 %v3499_v36, %v3498_v49  ;;  %5586 = vrcp.f32 %v3187_v43  ;;  %v3148_v5 = vadd.bf16 1065369472, %v5573_v13  ;;  %v3157_v24 = vadd.bf16 1065369472, %v5575_v41  ;;  %v3692_v43 = vld [vmem:[%s8402_s5 + $0x1e0] sm:$0xff]  ;;  %v8613_v41 = vld [vmem:[#allocation10_spill] sm:$0xff] }
 0x401   :  { %v3476_v37 = vadd.f32 %v3475_v12, %v3474_v10  ;;  %5588 = vrcp.f32 %v3197_v40  ;;  %v3158_v57 = vadd.bf16 1065369472, %v5577_v47  ;;  %v4669_v13 = vpack.c.bf16 %v3659_v26, %v3658_v52  ;;  %v3693_v49 = vld [vmem:[%s8402_s5 + $0x1e8] sm:$0xff]  ;;  %v3676_v47 = vld [vmem:[%s8402_s5 + $0x160] sm:$0xff]  ;;  %v3678_v26 = vld [vmem:[%s8402_s5 + $0x170] sm:$0xff] }
 0x402   :  { %v3501_v46 = vrot.slane %v3500_v30, 1  ;;  %5590 = vrcp.f32 %v3188_v6  ;;  %v3208_v1 = vunpack.c.l.bf16 %v3148_v5  ;;  %v3218_v32 = vunpack.c.h.bf16 %v3148_v5  ;;  %v3677_v40 = vld [vmem:[%s8402_s5 + $0x168] sm:$0xff]  ;;  %v3662_v6 = vld [vmem:[%s8402_s5 + $0xf0] sm:$0xff]  ;;  %v3695_v5 = vld [vmem:[%s8402_s5 + $0x1f8] sm:$0xff] }
 0x403   :  { %v3227_v0 = vunpack.c.l.bf16 %v3157_v24  ;;  %v3555_v55 = vcombine.low %v3463_v14, %v3476_v37  ;;  %5592 = vrcp.f32 %v3198_v50  ;;  %v3237_v51 = vunpack.c.h.bf16 %v3157_v24  ;;  %4670 = vmatprep.subr.bf16.mxu0 %v4669_v13  ;;  %v3663_v50 = vld [vmem:[%s8402_s5 + $0xf8] sm:$0xff] }
 0x404   :  { %v3502_v15 = vadd.f32 %v3501_v46, %v3500_v30  ;;  %v5579_v3 = vpop.eup %5578  ;;  %5594 = vrcp.f32 %v3207_v25  ;;  %v3228_v48 = vunpack.c.l.bf16 %v3158_v57  ;;  %v3238_v8 = vunpack.c.h.bf16 %v3158_v57  ;;  %v3647_v57 = vld [vmem:[%s8402_s5 + $0x78] sm:$0xff] }
 0x405   :  { %v3577_v53 = vrot.slane %v3555_v55, %v8613_v41  ;;  %v3327_v4 = vmul.f32 %v5579_v3, %v7718_v62  ;;  %5596 = vrcp.f32 %v3217_v11  ;;  %v5581_v22 = vpop.eup %5580  ;;  %v4671_v29 = vpack.c.bf16 %v3643_v7, %v3642_v45  ;;  %v3694_v11 = vld [vmem:[%s8402_s5 + $0x1f0] sm:$0xff]  ;;  %v3679_v45 = vld [vmem:[%s8402_s5 + $0x178] sm:$0xff]  ;;  %v3713_v55 = vld [vmem:[%s8402_s5 + $0x288] sm:$0xff] }
 0x406   :  { %v3556_v35 = vcombine.low %v3489_v60, %v3502_v15  ;;  %5598 = vrcp.f32 %v3208_v1  ;;  %v4701_v14 = vpack.c.bf16 %v3691_v34, %v3690_v9  ;;  %v4703_v21 = vpack.c.bf16 %v3675_v27, %v3674_v20  ;;  %v3712_v20 = vld [vmem:[%s8402_s5 + $0x280] sm:$0xff] }
 0x407   :  { %v3337_v10 = vmul.f32 %v5581_v22, %v7730_v58  ;;  %5600 = vrcp.f32 %v3218_v32  ;;  %v4673_v36 = vpack.c.bf16 %v3661_v63, %v3660_v28  ;;  %v5583_v25 = vpop.eup %5582  ;;  %4672 = vmatpush3.bf16.msra.mxu0 %v4671_v29  ;;  %v4675_v60 = vpack.c.bf16 %v3645_v42, %v3644_v56  ;;  %v3646_v58 = vld [vmem:[%s8402_s5 + $0x70] sm:$0xff]  ;;  %v3744_v56 = vld [vmem:[%s8402_s5 + $0x380] sm:$0xff]  ;;  %v3745_v42 = vld [vmem:[%s8402_s5 + $0x388] sm:$0xff] }
 0x408   :  { %v3584_v62 = vrot.slane %v3556_v35, %v8613_v41  ;;  %5602 = vrcp.f32 %v3227_v0  ;;  %4702 = vmatprep.subr.bf16.mxu1 %v4701_v14  ;;  %v4705_v12 = vpack.c.bf16 %v3693_v49, %v3692_v43  ;;  %v4707_v30 = vpack.c.bf16 %v3677_v40, %v3676_v47 }
 0x409   :  { %v5585_v24 = vpop.eup %5584  ;;  %v3503_v37 = vadd.f32 %v3337_v10, %v3327_v4  ;;  %v3328_v46 = vmul.f32 %v5583_v25, %v7722_v23  ;;  %5604 = vrcp.f32 %v3237_v51  ;;  %4704 = vmatpush3.bf16.msra.mxu1 %v4703_v21  ;;  %4674 = vmatprep.subr.bf16.mxu0 %v4673_v36  ;;  %v4677_v23 = vpack.c.bf16 %v3663_v50, %v3662_v6 }
 0x40a   :  { %v3586_v52 = vcombine.low %v3577_v53, %v3584_v62  ;;  %v5587_v7 = vpop.eup %5586  ;;  %v3338_v1 = vmul.f32 %v5585_v24, %v7734_v31  ;;  %5606 = vrcp.f32 %v3228_v48  ;;  %4706 = vmatprep.subr.bf16.mxu1 %v4705_v12  ;;  %v4709_v34 = vpack.c.bf16 %v3695_v5, %v3694_v11  ;;  %v3540_v31 = vld [vmem:[#allocation2 + $0x1] ss:$2 sm:$0xff] }
 0x40b   :  { %v5589_v32 = vpop.eup %5588  ;;  %v3347_v9 = vmul.f32 %v5587_v7, %v7738_v59  ;;  %5608 = vrcp.f32 %v3238_v8  ;;  %4676 = vmatpush3.bf16.msra.mxu0 %v4675_v60  ;;  %v4679_v28 = vpack.c.bf16 %v3647_v57, %v3646_v58  ;;  %v4711_v63 = vpack.c.bf16 %v3679_v45, %v3678_v26  ;;  %v8614_v59 = vld [vmem:[#allocation12_spill] sm:$0xff] }
 0x40c   :  { %v3600_v0 = vrot.slane %v3586_v52, %v8613_v41  ;;  %v5591_v15 = vpop.eup %5590  ;;  %v3516_v51 = vadd.f32 %v3338_v1, %v3328_v46  ;;  %v3357_v27 = vmul.f32 %v5589_v32, %v7754_v19  ;;  %4678 = vmatprep.subr.bf16.mxu0 %v4677_v23  ;;  %v5641_v53 = vmov 1983009808  }
 0x40d   :  { %v5593_v3 = vpop.eup %5592  ;;  %v3504_v8 = vadd.f32 %v3503_v37, %v3347_v9  ;;  %v3348_v13 = vmul.f32 %v5591_v15, %v7745_v54  ;;  %4708 = vmatpush3.bf16.msra.mxu1 %v4707_v30  ;;  %v3804_v35 = vunpack.c.l.s4 %v5641_v53  ;;  %v4713_v4 = vpack.c.bf16 %v3713_v55, %v3712_v20  ;;  %v3729_v20 = vld [vmem:[%s8402_s5 + $0x308] sm:$0xff] }
 0x40e   :  { %v3601_v48 = vcombine.low %v8614_v59, %v3600_v0  ;;  %v5595_v19 = vpop.eup %5594  ;;  %v3358_v43 = vmul.f32 %v5593_v3, %v7760_v18  ;;  %4710 = vmatprep.subr.bf16.mxu1 %v4709_v34  ;;  %v4745_v21 = vpack.c.bf16 %v3745_v42, %v3744_v56  ;;  %v3728_v34 = vld [vmem:[%s8402_s5 + $0x300] sm:$0xff]  ;;  %v3698_v42 = vld [vmem:[%s8402_s5 + $0x210] sm:$0xff] }
 0x40f   :  { %v5597_v49 = vpop.eup %5596  ;;  %v3505_v54 = vadd.f32 %v3504_v8, %v3357_v27  ;;  %v3517_v40 = vadd.f32 %v3516_v51, %v3348_v13  ;;  %v3367_v22 = vmul.f32 %v5595_v19, %v7764_v2  ;;  %4680 = vmatpush3.bf16.msra.mxu0 %v4679_v28  ;;  %v3715_v51 = vld [vmem:[%s8402_s5 + $0x298] sm:$0xff]  ;;  %v4747_v13 = vpack.c.bf16 %v3729_v20, %v3728_v34  ;;  %v3542_v34 = vld [vmem:[#allocation2 + $0x11] ss:$2 sm:$0x3] }
 0x410   :  { %v3619_v47 = vadd.f32 %v3601_v48, %v3540_v31  ;;  %v5599_v29 = vpop.eup %5598  ;;  %v3377_v14 = vmul.f32 %v5597_v49, %v7788_v39  ;;  %4714 = vmatprep.subr.bf16.mxu0 %v4713_v4  ;;  %v3805_v39 = vunpack.c.0.s8 %v3804_v35  ;;  %v3714_v31 = vld [vmem:[%s8402_s5 + $0x290] sm:$0xff]  ;;  %v3747_v8 = vld [vmem:[%s8402_s5 + $0x398] sm:$0xff]  ;;  %v3716_v49 = vld [vmem:[%s8402_s5 + $0x2a0] sm:$0xff] }
 0x411   :  { %v5601_v62 = vpop.eup %5600  ;;  %v3518_v10 = vadd.f32 %v3517_v40, %v3358_v43  ;;  %v3506_v36 = vadd.f32 %v3505_v54, %v3367_v22  ;;  %v3368_v18 = vmul.f32 %v5599_v29, %v7778_v33  ;;  %4712 = vmatpush3.bf16.msra.mxu1 %v4711_v63  ;;  %v3746_v48 = vld [vmem:[%s8402_s5 + $0x390] sm:$0xff]  ;;  %v3699_v19 = vld [vmem:[%s8402_s5 + $0x218] sm:$0xff]  ;;  %v4717_v4 = vpack.c.bf16 %v3715_v51, %v3714_v31  ;;  %v3705_v31 = vld [vmem:[%s8402_s5 + $0x248] sm:$0xff] }
 0x412   :  { %3621 = vst [vmem:[#allocation2 + $0x1] ss:$2 sm:$0xff] %v3619_v47  ;;  %v5603_v6 = vpop.eup %5602  ;;  %v3378_v50 = vmul.f32 %v5601_v62, %v7792_v38  ;;  %4746 = vmatprep.subr.bf16.mxu1 %v4745_v21  ;;  %v8615_v38 = vld [vmem:[#allocation6_spill] sm:$0xff]  ;;  %v3717_v47 = vld [vmem:[%s8402_s5 + $0x2a8] sm:$0xff]  ;;  %v4749_v40 = vpack.c.bf16 %v3747_v8, %v3746_v48  ;;  %v4719_v62 = vpack.c.bf16 %v3699_v19, %v3698_v42 }
 0x413   :  { %v5605_v25 = vpop.eup %5604  ;;  %v3507_v60 = vadd.f32 %v3506_v36, %v3377_v14  ;;  %v3519_v2 = vadd.f32 %v3518_v10, %v3368_v18  ;;  %v3387_v12 = vmul.f32 %v5603_v6, %v7816_v61  ;;  %v8080_v57 = vsub.s32 %v3805_v39, %v8615_v38  ;;  %v3730_v22 = vld [vmem:[%s8402_s5 + $0x310] sm:$0xff]  ;;  %v3731_v29 = vld [vmem:[%s8402_s5 + $0x318] sm:$0xff]  ;;  %v3748_v10 = vld [vmem:[%s8402_s5 + $0x3a0] sm:$0xff] }
 0x414   :  { %v5607_v30 = vpop.eup %5606  ;;  %v3397_v58 = vmul.f32 %v5605_v25, %v7835_v16  ;;  %v3696_v16 = vld [vmem:[%s8402_s5 + $0x200] sm:$0xff]  ;;  %v3749_v36 = vld [vmem:[%s8402_s5 + $0x3a8] sm:$0xff]  ;;  %v4721_v6 = vpack.c.bf16 %v3717_v47, %v3716_v49  ;;  %v3718_v39 = vld [vmem:[%s8402_s5 + $0x2b0] sm:$0xff] }
 0x415   :  { %v5609_v11 = vpop.eup %5608  ;;  %v3520_v5 = vadd.f32 %v3519_v2, %v3378_v50  ;;  %v3508_v24 = vadd.f32 %v3507_v60, %v3387_v12  ;;  %v3388_v33 = vmul.f32 %v5607_v30, %v7820_v17  ;;  %v3697_v17 = vld [vmem:[%s8402_s5 + $0x208] sm:$0xff]  ;;  %v3700_v50 = vld [vmem:[%s8402_s5 + $0x220] sm:$0xff]  ;;  %v4751_v12 = vpack.c.bf16 %v3731_v29, %v3730_v22  ;;  %v3719_v30 = vld [vmem:[%s8402_s5 + $0x2b8] sm:$0xff] }
 0x416   :  { %v3398_v52 = vmul.f32 %v5609_v11, %v7839_v44  ;;  %v4715_v55 = vpack.c.bf16 %v3697_v17, %v3696_v16  ;;  %v3701_v25 = vld [vmem:[%s8402_s5 + $0x228] sm:$0xff]  ;;  %v3732_v11 = vld [vmem:[%s8402_s5 + $0x320] sm:$0xff]  ;;  %v3702_v38 = vld [vmem:[%s8402_s5 + $0x230] sm:$0xff] }
 0x417   :  { %v3509_v37 = vadd.f32 %v3508_v24, %v3397_v58  ;;  %v3521_v46 = vadd.f32 %v3520_v5, %v3388_v33  ;;  %v4753_v58 = vpack.c.bf16 %v3749_v36, %v3748_v10  ;;  %v3733_v5 = vld [vmem:[%s8402_s5 + $0x328] sm:$0xff]  ;;  %v4723_v33 = vpack.c.bf16 %v3701_v25, %v3700_v50  ;;  %v3734_v17 = vld [vmem:[%s8402_s5 + $0x330] sm:$0xff]  ;;  %v3755_v42 = vld [vmem:[%s8402_s5 + $0x3d8] sm:$0xff] }
 0x418   :  { %v3724_v49 = vld [vmem:[%s8402_s5 + $0x2e0] sm:$0xff]  ;;  %v3725_v47 = vld [vmem:[%s8402_s5 + $0x2e8] sm:$0xff]  ;;  %v3739_v22 = vld [vmem:[%s8402_s5 + $0x358] sm:$0xff] }
 0x419   :  { %v3626_v26 = vld [vmem:[#allocation2] sm:$0xff]  ;;  %v3627_v45 = vld [vmem:[#allocation2 + $0x8] sm:$0xff]  ;;  %v3510_v7 = vrot.slane %v3509_v37, 4  ;;  %v3522_v61 = vadd.f32 %v3521_v46, %v3398_v52  ;;  %v3750_v52 = vld [vmem:[%s8402_s5 + $0x3b0] sm:$0xff]  ;;  %v4725_v46 = vpack.c.bf16 %v3719_v30, %v3718_v39 }
 0x41a   :  { %v3629_v1 = vmul.f32 0.015625, %v3626_v26  ;;  %v3630_v23 = vmul.f32 0.015625, %v3627_v45  ;;  %v3703_v26 = vld [vmem:[%s8402_s5 + $0x238] sm:$0xff]  ;;  %v3708_v10 = vld [vmem:[%s8402_s5 + $0x260] sm:$0xff]  ;;  %v3709_v36 = vld [vmem:[%s8402_s5 + $0x268] sm:$0xff] }
 0x41b   :  { %v3511_v44 = vadd.f32 %v3510_v7, %v3509_v37  ;;  %v3523_v32 = vrot.slane %v3522_v61, 4  ;;  %v3751_v37 = vld [vmem:[%s8402_s5 + $0x3b8] sm:$0xff]  ;;  %v4755_v7 = vpack.c.bf16 %v3733_v5, %v3732_v11  ;;  %v3758_v39 = vld [vmem:[%s8402_s5 + $0x3f0] sm:$0xff] }
 0x41c   :  { %v3809_v0 = vrot.slane %v3629_v1, %v8080_v57  ;;  %v3802_v9 = vcombine.high %v3629_v1, %v3629_v1  ;;  %v8096_v15 = vrot.slane %v3630_v23, %v8080_v57  ;;  %v3819_v27 = vcombine.high %v3630_v23, %v3630_v23  ;;  %v3721_v1 = vld [vmem:[%s8402_s5 + $0x2c8] sm:$0xff]  ;;  %v3735_v23 = vld [vmem:[%s8402_s5 + $0x338] sm:$0xff]  ;;  %v3710_v11 = vld [vmem:[%s8402_s5 + $0x270] sm:$0xff] }
 0x41d   :  { %v3512_v28 = vrot.slane %v3511_v44, 2  ;;  %v3524_v63 = vadd.f32 %v3523_v32, %v3522_v61  ;;  %v3720_v61 = vld [vmem:[%s8402_s5 + $0x2c0] sm:$0xff]  ;;  %v4757_v16 = vpack.c.bf16 %v3751_v37, %v3750_v52  ;;  %v4727_v32 = vpack.c.bf16 %v3703_v26, %v3702_v38  ;;  %v3727_v50 = vld [vmem:[%s8402_s5 + $0x2f8] sm:$0xff]  ;;  %v3777_v37 = vld [vmem:[%s8402_s5 + $0x488] sm:$0xff] }
 0x41e   :  { %v3817_v3 = vcombine.high %v3809_v0, %v3809_v0  ;;  %v3816_v59 = vrot.slane %v3802_v9, %v8080_v57  ;;  %v8112_v56 = vrot.slane %v3819_v27, %v8080_v57  ;;  %v3834_v54 = vcombine.high %v8096_v15, %v8096_v15  ;;  %v3753_v9 = vld [vmem:[%s8402_s5 + $0x3c8] sm:$0xff]  ;;  %v3759_v30 = vld [vmem:[%s8402_s5 + $0x3f8] sm:$0xff]  ;;  %v3776_v52 = vld [vmem:[%s8402_s5 + $0x480] sm:$0xff] }
 0x41f   :  { %v3513_v43 = vadd.f32 %v3512_v28, %v3511_v44  ;;  %v3525_v53 = vrot.slane %v3524_v63, 2  ;;  %v4729_v20 = vpack.c.bf16 %v3721_v1, %v3720_v61  ;;  %v4759_v27 = vpack.c.bf16 %v3735_v23, %v3734_v17  ;;  %v3722_v28 = vld [vmem:[%s8402_s5 + $0x2d0] sm:$0xff]  ;;  %v3711_v5 = vld [vmem:[%s8402_s5 + $0x278] sm:$0xff]  ;;  %v3760_v1 = vld [vmem:[%s8402_s5 + $0x400] sm:$0xff] }
 0x420   :  { %3918 = vmatprep.mubr.f32.mxu0 %v3817_v3  ;;  %v3818_v35 = vcombine.high %v3816_v59, %v3816_v59  ;;  %v3835_v18 = vcombine.high %v8112_v56, %v8112_v56  ;;  %v4773_v38 = vpack.c.bf16 %v3759_v30, %v3758_v39  ;;  %v3742_v26 = vld [vmem:[%s8402_s5 + $0x370] sm:$0xff]  ;;  %v4777_v61 = vpack.c.bf16 %v3777_v37, %v3776_v52  ;;  %v4437_v39 = vld [vmem:[%s8403_s6] ss:$0 sm:$0xff] }
 0x421   :  { %3919 = vmatmul.mubr.f32.vlgmr.msra.gmra.mrb[80].mxu0 %v3809_v0  ;;  %v3514_v14 = vrot.slane %v3513_v43, 1  ;;  %v3526_v21 = vadd.f32 %v3525_v53, %v3524_v63  ;;  %v3752_v0 = vld [vmem:[%s8402_s5 + $0x3c0] sm:$0xff]  ;;  %v3723_v63 = vld [vmem:[%s8402_s5 + $0x2d8] sm:$0xff] }
 0x422   :  { %4716 = vmatpush3.bf16.msra.mxu0 %v4715_v55  ;;  %3988 = vmatprep.mubr.f32.mxu1 %v3818_v35  ;;  %v3704_v55 = vld [vmem:[%s8402_s5 + $0x240] sm:$0xff]  ;;  %v4761_v3 = vpack.c.bf16 %v3753_v9, %v3752_v0  ;;  %v4733_v19 = vpack.c.bf16 %v3723_v63, %v3722_v28  ;;  %v3707_v53 = vld [vmem:[%s8402_s5 + $0x258] sm:$0xff]  ;;  %v3765_v63 = vld [vmem:[%s8402_s5 + $0x428] sm:$0xff] }
 0x423   :  { %4058 = vmatprep.mubr.f32.mxu0 %v3834_v54  ;;  %3989 = vmatmul.mubr.f32.vlgmr.msra.gmra.mrb[96].mxu1 %v3816_v59  ;;  %v3515_v60 = vadd.f32 %v3514_v14, %v3513_v43  ;;  %v3527_v2 = vrot.slane %v3526_v21, 1  ;;  %v3736_v59 = vld [vmem:[%s8402_s5 + $0x340] sm:$0xff]  ;;  %v4731_v8 = vpack.c.bf16 %v3705_v31, %v3704_v55  ;;  %v3706_v43 = vld [vmem:[%s8402_s5 + $0x250] sm:$0xff]  ;;  %v3781_v31 = vld [vmem:[%s8402_s5 + $0x4a8] sm:$0xff] }
 0x424   :  { %4748 = vmatpush3.bf16.msra.mxu1 %v4747_v13  ;;  %4718 = vmatprep.subr.bf16.mxu0 %v4717_v4  ;;  %v3754_v13 = vld [vmem:[%s8402_s5 + $0x3d0] sm:$0xff]  ;;  %v4735_v29 = vpack.c.bf16 %v3707_v53, %v3706_v43  ;;  %v3756_v14 = vld [vmem:[%s8402_s5 + $0x3e0] sm:$0xff]  ;;  %v3769_v53 = vld [vmem:[%s8402_s5 + $0x448] sm:$0xff] }
 0x425   :  { %4128 = vmatprep.mubr.f32.mxu1 %v3835_v18  ;;  %4750 = vmatprep.subr.bf16.mxu1 %v4749_v40  ;;  %v3528_v24 = vadd.f32 %v3527_v2, %v3526_v21  ;;  %v4765_v54 = vpack.c.bf16 %v3755_v42, %v3754_v13  ;;  %v3738_v40 = vld [vmem:[%s8402_s5 + $0x350] sm:$0xff]  ;;  %v3757_v21 = vld [vmem:[%s8402_s5 + $0x3e8] sm:$0xff]  ;;  %v3780_v55 = vld [vmem:[%s8402_s5 + $0x4a0] sm:$0xff] }
 0x426   :  { %4720 = vmatpush3.bf16.msra.mxu0 %v4719_v62  ;;  %v4737_v62 = vpack.c.bf16 %v3725_v47, %v3724_v49  ;;  %v4767_v18 = vpack.c.bf16 %v3739_v22, %v3738_v40  ;;  %v4769_v25 = vpack.c.bf16 %v3757_v21, %v3756_v14  ;;  %v3741_v2 = vld [vmem:[%s8402_s5 + $0x368] sm:$0xff]  ;;  %v3764_v28 = vld [vmem:[%s8402_s5 + $0x420] sm:$0xff]  ;;  %v3786_v35 = vld [vmem:[%s8402_s5 + $0x4d0] sm:$0xff] }
 0x427   :  { %4722 = vmatprep.subr.bf16.mxu0 %v4721_v6  ;;  %v3602_v45 = vcombine.low %v3515_v60, %v3528_v24  ;;  %v3726_v6 = vld [vmem:[%s8402_s5 + $0x2f0] sm:$0xff]  ;;  %v3740_v60 = vld [vmem:[%s8402_s5 + $0x360] sm:$0xff]  ;;  %v3785_v13 = vld [vmem:[%s8402_s5 + $0x4c8] sm:$0xff] }
 0x428   :  { %4752 = vmatpush3.bf16.msra.mxu1 %v4751_v12  ;;  %v4739_v12 = vpack.c.bf16 %v3709_v36, %v3708_v10  ;;  %v3768_v43 = vld [vmem:[%s8402_s5 + $0x440] sm:$0xff]  ;;  %v3771_v40 = vld [vmem:[%s8402_s5 + $0x458] sm:$0xff]  ;;  %v3773_v10 = vld [vmem:[%s8402_s5 + $0x468] sm:$0xff] }
 0x429   :  { %4754 = vmatprep.subr.bf16.mxu1 %v4753_v58  ;;  %v3609_v44 = vrot.slane %v3602_v45, %v8613_v41  ;;  %v4741_v58 = vpack.c.bf16 %v3727_v50, %v3726_v6  ;;  %v3743_v45 = vld [vmem:[%s8402_s5 + $0x378] sm:$0xff]  ;;  %v4795_v49 = vpack.c.bf16 %v3769_v53, %v3768_v43  ;;  %v3788_v22 = vld [vmem:[%s8402_s5 + $0x4e0] sm:$0xff]  ;;  %v3790_v36 = vld [vmem:[%s8402_s5 + $0x4f0] sm:$0xff] }
 0x42a   :  { %4724 = vmatpush3.bf16.msra.mxu0 %v4723_v33  ;;  %v4771_v33 = vpack.c.bf16 %v3741_v2, %v3740_v60  ;;  %v4775_v17 = vpack.c.bf16 %v3743_v45, %v3742_v26  ;;  %v3775_v60 = vld [vmem:[%s8402_s5 + $0x478] sm:$0xff] }
 0x42b   :  { %4726 = vmatprep.subr.bf16.mxu0 %v4725_v46  ;;  %v3616_v51 = vrot.slane %v3609_v44, %v8613_v41  ;;  %v3737_v41 = vld [vmem:[%s8402_s5 + $0x348] sm:$0xff]  ;;  %v3778_v44 = vld [vmem:[%s8402_s5 + $0x490] sm:$0xff] }
 0x42c   :  { %4756 = vmatpush3.bf16.msra.mxu1 %v4755_v7  ;;  %v4763_v4 = vpack.c.bf16 %v3737_v41, %v3736_v59  ;;  %v4743_v7 = vpack.c.bf16 %v3711_v5, %v3710_v11  ;;  %v3766_v41 = vld [vmem:[%s8402_s5 + $0x430] sm:$0xff] }
 0x42d   :  { %4758 = vmatprep.subr.bf16.mxu1 %v4757_v16  ;;  %v3620_v48 = vadd.f32 %v3616_v51, %v3542_v34  ;;  %v3761_v16 = vld [vmem:[%s8402_s5 + $0x408] sm:$0xff]  ;;  %v3762_v34 = vld [vmem:[%s8402_s5 + $0x410] sm:$0xff] }
 0x42e   :  { %4728 = vmatpush3.bf16.msra.mxu0 %v4727_v32  ;;  %v3779_v32 = vld [vmem:[%s8402_s5 + $0x498] sm:$0xff]  ;;  %v4779_v0 = vpack.c.bf16 %v3761_v16, %v3760_v1 }
 0x42f   :  { %4730 = vmatprep.subr.bf16.mxu0 %v4729_v20  ;;  %3622 = vst.msk [vmem:[#allocation2 + $0x11] ss:$2 sm:$0x3] %vm7136_vm1, %v3620_v48  ;;  %v4781_v9 = vpack.c.bf16 %v3779_v32, %v3778_v44  ;;  %v3767_v48 = vld [vmem:[%s8402_s5 + $0x438] sm:$0xff] }
 0x430   :  { %4760 = vmatpush3.bf16.msra.mxu1 %v4759_v27  ;;  %v4785_v27 = vpack.c.bf16 %v3781_v31, %v3780_v55  ;;  %v4791_v42 = vpack.c.bf16 %v3767_v48, %v3766_v41 }
 0x431   :  { %4762 = vmatprep.subr.bf16.mxu1 %v4761_v3  ;;  %v3782_v3 = vld [vmem:[%s8402_s5 + $0x4b0] sm:$0xff] }
 0x432   :  { %4732 = vmatpush3.bf16.msra.mxu0 %v4731_v8  ;;  %v3784_v8 = vld [vmem:[%s8402_s5 + $0x4c0] sm:$0xff] }
 0x433   :  { %4734 = vmatprep.subr.bf16.mxu0 %v4733_v19  ;;  %v4793_v19 = vpack.c.bf16 %v3785_v13, %v3784_v8 }
 0x434   :  { %4764 = vmatpush3.bf16.msra.mxu1 %v4763_v4  ;;  %v3787_v4 = vld [vmem:[%s8402_s5 + $0x4d8] sm:$0xff] }
 0x435   :  { %4766 = vmatprep.subr.bf16.mxu1 %v4765_v54  ;;  %v4797_v47 = vpack.c.bf16 %v3787_v4, %v3786_v35  ;;  %v3770_v54 = vld [vmem:[%s8402_s5 + $0x450] sm:$0xff] }
 0x436   :  { %4736 = vmatpush3.bf16.msra.mxu0 %v4735_v29  ;;  %v3628_v24 = vld [vmem:[#allocation2 + $0x10] sm:$0xf]  ;;  %v3789_v29 = vld [vmem:[%s8402_s5 + $0x4e8] sm:$0xff]  ;;  %v4799_v14 = vpack.c.bf16 %v3771_v40, %v3770_v54 }
 0x437   :  { %4738 = vmatprep.subr.bf16.mxu0 %v4737_v62  ;;  %v3631_v46 = vmul.f32 0.015625, %v3628_v24  ;;  %v4801_v21 = vpack.c.bf16 %v3789_v29, %v3788_v22  ;;  %v3772_v62 = vld [vmem:[%s8402_s5 + $0x460] sm:$0xff] }
 0x438   :  { %4768 = vmatpush3.bf16.msra.mxu1 %v4767_v18  ;;  %v3791_v18 = vld [vmem:[%s8402_s5 + $0x4f8] sm:$0xff]  ;;  %v4803_v6 = vpack.c.bf16 %v3773_v10, %v3772_v62 }
 0x439   :  { %4770 = vmatprep.subr.bf16.mxu1 %v4769_v25  ;;  %v8291_v23 = vrot.slane %v3631_v46, %v8080_v57  ;;  %v3763_v57 = vld [vmem:[%s8402_s5 + $0x418] sm:$0xff]  ;;  %v4805_v50 = vpack.c.bf16 %v3791_v18, %v3790_v36  ;;  %v3774_v25 = vld [vmem:[%s8402_s5 + $0x470] sm:$0xff] }
 0x43a   :  { %4740 = vmatpush3.bf16.msra.mxu0 %v4739_v12  ;;  %v4783_v51 = vpack.c.bf16 %v3763_v57, %v3762_v34  ;;  %v4807_v2 = vpack.c.bf16 %v3775_v60, %v3774_v25 }
 0x43b   :  { %4742 = vmatprep.subr.bf16.mxu0 %v4741_v58  ;;  %v3843_v20 = vcombine.high %v8291_v23, %v8291_v23 }
 0x43c   :  { %4772 = vmatpush3.bf16.msra.mxu1 %v4771_v33 }
 0x43d   :  { %4774 = vmatprep.subr.bf16.mxu1 %v4773_v38 }
 0x43e   :  { %4744 = vmatpush3.bf16.msra.mxu0 %v4743_v7 }
 0x43f   :  { %4778 = vmatprep.subr.bf16.mxu0 %v4777_v61 }
 0x440   :  { %4776 = vmatpush3.bf16.msra.mxu1 %v4775_v17 }
 0x441   :  { %4059 = vmatmul.mubr.f32.vlgmr.msra.gmra.mrb[82].mxu0 %v8096_v15  ;;  %v3783_v15 = vld [vmem:[%s8402_s5 + $0x4b8] sm:$0xff]  ;;  %s5642_s5 = smov [#allocation3]  }
 0x442   :  { %4780 = vmatpush3.bf16.msra.mxu0 %v4779_v0  ;;  %4198 = vmatprep.mubr.f32.mxu0 %v3843_v20  ;;  %v4789_v59 = vpack.c.bf16 %v3783_v15, %v3782_v3  ;;  %s4223_s6 = sshll.u32 %s5642_s5, 4  ;;  %s4224_s6 = int_to_ptr.vmem [resolvable:$true] %s4223_s6 }
 0x443   :  { %4129 = vmatmul.mubr.f32.vlgmr.msra.gmra.mrb[98].mxu1 %v8112_v56  ;;  %4782 = vmatprep.subr.bf16.mxu0 %v4781_v9  ;;  %v4787_v56 = vpack.c.bf16 %v3765_v63, %v3764_v28  ;;  %s5614_s25 = scalar_lea.vmem %s4224_s6, 32  ;;  %p5619_p1 = scmp.lt.s32.totalorder %s4224_s6, %s4224_s6 }
 0x444   :  { %p5615_p0 = scmp.ne.s32.totalorder %s4224_s6, %s5614_s25  ;;  %p5620_p2 = scmp.lt.s32.totalorder %s5614_s25, %s5614_s25 }
 0x446   :  { %4784 = vmatpush3.bf16.msra.mxu0 %v4783_v51  ;;  %p5621_p3 = por %p5620_p2, %p5619_p1 }
 0x447   :  { %4786 = vmatprep.subr.bf16.mxu0 %v4785_v27 }
 0x448   :  { %p5622_p4 = pnand %p5621_p3, %p5615_p0 }
 0x44a   :  { %4788 = vmatpush3.bf16.msra.mxu0 %v4787_v56 }
 0x44b   :  { %4790 = vmatprep.subr.bf16.mxu0 %v4789_v59 }
 0x44e   :  { %4792 = vmatpush3.bf16.msra.mxu0 %v4791_v42 }
 0x44f   :  { %4794 = vmatprep.subr.bf16.mxu0 %v4793_v19 }
 0x452   :  { %4796 = vmatpush3.bf16.msra.mxu0 %v4795_v49 }
 0x453   :  { %4798 = vmatprep.subr.bf16.mxu0 %v4797_v47 }
 0x456   :  { %4800 = vmatpush3.bf16.msra.mxu0 %v4799_v14 }
 0x457   :  { %4802 = vmatprep.subr.bf16.mxu0 %v4801_v21 }
 0x45a   :  { %4804 = vmatpush3.bf16.msra.mxu0 %v4803_v6 }
 0x45b   :  { %4806 = vmatprep.subr.bf16.mxu0 %v4805_v50 }
 0x45e   :  { %4808 = vmatpush3.bf16.msra.mxu0 %v4807_v2 }
 0x461   :  { %4199 = vmatmul.mubr.f32.vlgmr.msra.gmra.mrb[84].mxu0 %v8291_v23 }
 0x4f4   :  { %v4482_v12 = vpop.f32.mrb[80].mxu0 }
 0x4f5   :  { %v4483_v30 = vpop.f32.mrb[81].mxu0 }
 0x4f6   :  { %v4484_v58 = vadd.f32 %v4483_v30, %v4482_v12  ;;  %v4517_v11 = vpop.f32.mrb[96].mxu1 }
 0x4f7   :  { %v4518_v5 = vpop.f32.mrb[97].mxu1 }
 0x4f8   :  { %v3921_v24 = vadd.f32 %v4484_v58, %v4437_v39  ;;  %v4519_v33 = vadd.f32 %v4518_v5, %v4517_v11 }
 0x4fa   :  { %v3991_v52 = vadd.f32 %v4519_v33, %v3921_v24 }
 0x514   :  { %v4552_v37 = vpop.f32.mrb[82].mxu0 }
 0x515   :  { %v4553_v46 = vpop.f32.mrb[83].mxu0 }
 0x516   :  { %v4554_v38 = vadd.f32 %v4553_v46, %v4552_v37  ;;  %v4587_v26 = vpop.f32.mrb[98].mxu1 }
 0x517   :  { %v4588_v45 = vpop.f32.mrb[99].mxu1 }
 0x518   :  { %v4061_v7 = vadd.f32 %v4554_v38, %v3991_v52  ;;  %v4589_v61 = vadd.f32 %v4588_v45, %v4587_v26 }
 0x51a   :  { %v4131_v1 = vadd.f32 %v4589_v61, %v4061_v7 }
 0x534   :  { %v4622_v16 = vpop.f32.mrb[84].mxu0 }
 0x535   :  { %v4623_v17 = vpop.f32.mrb[85].mxu0 }
 0x536   :  { %v4624_v23 = vadd.f32 %v4623_v17, %v4622_v16 }
 0x538   :  { %v4201_v44 = vadd.f32 %v4624_v23, %v4131_v1 }
 0x53a   :  { %v4205_v32 = vsel %vm4204_vm2, %v4201_v44, -inf }
 0x53b   :  { %4206 = vmax.xlane.f32.xlu0 %v4205_v32 }
 0x5c8   :  { %v4207_v0 = vpop.xlane.xlu0 %4206 }
 0x5c9   :  { %v4208_v9 = vsub.f32 %v4201_v44, %v4207_v0 }
 0x5cb   :  { %v4209_v34 = vmul.f32 1.442695, %v4208_v9 }
 0x5cd   :  { %5610 = vpow2.f32 %v4209_v34 }
 0x5d7   :  { %v5611_v57 = vpop.eup %5610 }
 0x5d8   :  { %v4211_v20 = vsel %vm4204_vm2, %v5611_v57, 0.0 }
 0x5d9   :  { %4212 = vadd.xlane.f32.xlu0 %v4211_v20 }
 0x666   :  { %v4213_v55 = vpop.xlane.xlu0 %4212 }
 0x667   :  { %5612 = vrcp.f32 %v4213_v55 }
 0x671   :  { %v5613_v31 = vpop.eup %5612 }
 0x672   :  { %v4215_v51 = vmul.f32 %v5613_v31, %v5611_v57 }
 0x674   :  { %4216 = vst [vmem:[#allocation3] sm:$0x3] %v4215_v51 }
 0x675   :  { %5625 = shalt.err (!%p5622_p4)
}
 0x676   :  { %s5626_s28 = scalar_lea.hbm %s8404_s7, 32 }
 0x677   :  { %p5627_p5 = scmp.ne.s32.totalorder %s8404_s7, %s5626_s28  ;;  %p5630_p6 = scmp.lt.u32.totalorder %s5626_s28, %s8404_s7 }
 0x679   :  { %p5632_p7 = pnand %p5630_p6, %p5627_p5 }
 0x67b   :  { %5635 = shalt.err (!%p5632_p7)
}
 0x67c   :  { %4226 = dma.vmem_to_hbm [thread:$0]  %s4224_s6, 32, %s8404_s7, [#allocation4]  }
 0x67d   :  { %5636 = dma.done.wait [#allocation4], 32  }
 0x67e   :  { %5637 = vsyncadd [#allocation4], 4294967264 }
 0x67f   :  { %4230 = vsyncpa [#allocation4], 1 }

</bundles_post_ra>
